<compile_context>
chip_gen: v6e
topology: v6e:2x2x1
jax: 0.10.0
libtpu: 0.0.40
codegen_flags: <defaults>
</compile_context>

<pallas_src>
import functools

import jax
import jax.numpy as jnp
from jax.experimental import pallas as pl
from jax.experimental.pallas import tpu as pltpu


def _round_up(x, m):
    return ((x + m - 1) // m) * m


def _ceil_div(a, b):
    return -(-a // b)


# ----------------------------------------------------------------------------
# TPU-generation probe (Python-level, memoized) and tile selection
# ----------------------------------------------------------------------------
_GEN_CACHE = None


def _tpu_generation():
    """Returns 'v5' / 'v6' / 'v7' / 'unknown' based on the local device kind."""
    global _GEN_CACHE
    if _GEN_CACHE is None:
        try:
            kind = jax.devices()[0].device_kind.lower()
        except Exception:
            kind = ""
        if "v5" in kind:
            _GEN_CACHE = "v5"
        elif "v6" in kind:
            _GEN_CACHE = "v6"
        elif "v7" in kind:
            _GEN_CACHE = "v7"
        else:
            _GEN_CACHE = "unknown"
    return _GEN_CACHE


def _pick_batch_tile(B, cap, two_cores):
    """Multiple-of-128 batch tile <= cap; on 2-TC chips prefer an even grid length."""
    cap = max(128, _round_up(cap, 128))
    if not two_cores or B <= 128:
        return min(cap, _round_up(B, 128))
    steps = 2 * _ceil_div(B, 2 * cap)                 # even step count, each tile <= cap
    tb = _round_up(_ceil_div(B, steps), 128)
    for _ in range(4):                                # keep realized grid even after rounding
        grid = _ceil_div(B, tb)
        if grid <= 1 or grid % 2 == 0:
            break
        steps = grid + 1
        tb = _round_up(_ceil_div(B, steps), 128)
    return tb


# ----------------------------------------------------------------------------
# Pallas kernel
# ----------------------------------------------------------------------------
def _ncd_decoder_kernel(
    zse_ref, kp_ref,            # [TB, 2C] bf16, [TB, K] bf16
    wt_ref, bt_ref,             # fused transfer: [2C, 2K] bf16, [1, 2K] f32
    w1_ref, b1_ref,             # [K,  H1] bf16, [1, H1] f32
    w2_ref, b2_ref,             # [H1, H2] bf16, [1, H2] f32
    w3_ref, b3_ref,             # [H2, H3] bf16, [1, H3] f32
    w4_ref, b4_ref,             # [1,  H3] f32 (VPU path), [1, 1] f32
    out_ref,                    # [1, 1, TB] f32
    *, use_bf16_act,
):
    f32 = jnp.float32
    bf16 = jnp.bfloat16
    K = kp_ref.shape[-1]

    # Fused transfer layers: one MXU pass (contraction depth 2C) instead of two depth-C
    # passes; block-diagonal weight keeps student/exercise paths independent.
    se = jax.nn.sigmoid(
        jnp.dot(zse_ref[...], wt_ref[...], preferred_element_type=f32) + bt_ref[...]
    )
    # kp is {0,1} (exact in bf16); (s - e) subtracted in f32, rounded once to bf16.
    state = kp_ref[...] * (se[:, :K] - se[:, K:]).astype(bf16)        # [TB, K] bf16

    if use_bf16_act:
        # v6e/v7x: bf16 EUP tanh (~2x f32 rate) whose output feeds the next MXU pass
        # directly (the h.astype(bf16) below becomes a no-op -> no VPU pack copies).
        act = lambda y: jnp.tanh(y.astype(bf16))
    else:
        # v5e (no bf16 EUP) / unknown: keep the transcendental in f32.
        act = jnp.tanh

    # Positive_MLP: (Linear -> Dropout(eval: identity) -> Tanh) x3 -> Linear -> Sigmoid
    # bf16 operands on the MXU, f32 accumulation.
    h = act(jnp.dot(state, w1_ref[...], preferred_element_type=f32) + b1_ref[...])
    h = act(jnp.dot(h.astype(bf16), w2_ref[...], preferred_element_type=f32) + b2_ref[...])
    h = act(jnp.dot(h.astype(bf16), w3_ref[...], preferred_element_type=f32) + b3_ref[...])

    # Final Linear(H3 -> 1): N=1 matmul replaced by VPU multiply + lane reduction,
    # producing the result lane-dense along the batch (full-lane-width vst store).
    # (The sublane->lane relayout of `logit` rides the XLU slot, which has slack here.)
    logit = jnp.sum(h.astype(f32) * w4_ref[...], axis=-1)             # [TB]
    o = jax.nn.sigmoid(logit[None, :] + b4_ref[...])                  # [1, TB]
    out_ref[...] = o[:, None, :].astype(out_ref.dtype)                # [1, 1, TB]


# ----------------------------------------------------------------------------
# Wrapper
# ----------------------------------------------------------------------------
@functools.partial(jax.jit, static_argnames=("tb", "use_bf16_act", "vmem_limit"))
def _ncd_decoder_forward_impl(params, z, student_id, exercise_id, knowledge_point,
                              *, tb, use_bf16_act, vmem_limit):
    B = student_id.shape[0]
    C = z.shape[1]
    K = knowledge_point.shape[1]

    (ws, bs), (we, be), (w1, b1), (w2, b2), (w3, b3), (w4, b4) = params
    H1, H2, H3 = w1.shape[1], w2.shape[1], w3.shape[1]

    # --- glue: data-dependent row gathers + weight packing/casting ------------
    z_s = z[student_id]                                   # [B, C]
    z_e = z[exercise_id]                                  # [B, C]
    zse = jnp.concatenate([z_s, z_e], axis=1).astype(jnp.bfloat16)    # [B, 2C]

    zeros_ck = jnp.zeros((C, K), ws.dtype)
    wt = jnp.concatenate(
        [jnp.concatenate([ws, zeros_ck], axis=1),
         jnp.concatenate([zeros_ck, we], axis=1)],
        axis=0,
    ).astype(jnp.bfloat16)                                # [2C, 2K] block-diagonal
    bt = jnp.concatenate([bs, be], axis=1).astype(jnp.float32)        # [1, 2K]
    w1b, w2b, w3b = (w.astype(jnp.bfloat16) for w in (w1, w2, w3))
    b1f, b2f, b3f = (b.astype(jnp.float32) for b in (b1, b2, b3))
    w4r = w4.reshape(1, H3).astype(jnp.float32)           # f32 row for the VPU final layer
    b4f = b4.astype(jnp.float32)
    # knowledge_point is a {0,1} indicator -> exact in bf16 (halves its HBM stream).
    kp = knowledge_point.astype(jnp.bfloat16)

    # --- batch padding to the (static) lane-dense tile ------------------------
    Bp = _round_up(B, tb)
    grid_len = Bp // tb
    if Bp != B:
        pad = Bp - B
        zse = jnp.pad(zse, ((0, pad), (0, 0)))
        kp = jnp.pad(kp, ((0, pad), (0, 0)))

    row_spec = lambda shp: pl.BlockSpec(shp, lambda i: (i, 0))
    full_spec = lambda shp: pl.BlockSpec(shp, lambda i: (0, 0))

    out = pl.pallas_call(
        functools.partial(_ncd_decoder_kernel, use_bf16_act=use_bf16_act),
        out_shape=jax.ShapeDtypeStruct((grid_len, 1, tb), jnp.float32),
        grid_spec=pltpu.PrefetchScalarGridSpec(
            num_scalar_prefetch=0,
            grid=(grid_len,),
            in_specs=[
                row_spec((tb, 2 * C)),                        # zse (bf16)
                row_spec((tb, K)),                            # knowledge_point (bf16)
                full_spec((2 * C, 2 * K)), full_spec((1, 2 * K)),   # fused transfer
                full_spec((K, H1)),  full_spec((1, H1)),            # mlp layer 1
                full_spec((H1, H2)), full_spec((1, H2)),            # mlp layer 2
                full_spec((H2, H3)), full_spec((1, H3)),            # mlp layer 3
                full_spec((1, H3)),  full_spec((1, 1)),             # mlp layer 4 (VPU)
            ],
            out_specs=pl.BlockSpec((1, 1, tb), lambda i: (i, 0, 0)),
        ),
        compiler_params=pltpu.CompilerParams(
            # 'parallel' batch axis shards grid steps across the 2 TCs on v7x.
            dimension_semantics=("parallel",),
            # Explicit VMEM budget so the [TB,512] intermediates never spill to HBM.
            vmem_limit_bytes=vmem_limit,
        ),
    )(zse, kp, wt, bt, w1b, b1f, w2b, b2f, w3b, b3f, w4r, b4f)

    return out.reshape(-1)[:B]   # .view(-1), drop batch padding


def ncd_decoder_forward(params, z, student_id, exercise_id, knowledge_point,
                        batch_tile=None):
    """Replicates NCDDecoder.forward(z, student_id, exercise_id, knowledge_point)."""
    gen = _tpu_generation()
    use_bf16_act = gen in ("v6", "v7")          # bf16 EUP only on v6e/v7x
    two_cores = (gen == "v7")                   # megacore: prefer an even grid length
    if batch_tile is None:
        # v5e/v6e: 128 MiB VMEM -> up to 4096 rows; v7x/unknown: 64 MiB -> cap 2048.
        cap = 4096 if gen in ("v5", "v6") else 2048
    else:
        cap = batch_tile
    B = student_id.shape[0]
    tb = _pick_batch_tile(B, cap, two_cores)
    vmem_limit = (64 << 20) if gen in ("v5", "v6") else (40 << 20)
    return _ncd_decoder_forward_impl(
        params, z, student_id, exercise_id, knowledge_point,
        tb=tb, use_bf16_act=use_bf16_act, vmem_limit=vmem_limit)


# ----------------------------------------------------------------------------
# Deterministic parameter init (xavier_normal on weights, zeros on biases)
# ----------------------------------------------------------------------------
def _xavier_normal(key, fan_in, fan_out):
    std = (2.0 / (fan_in + fan_out)) ** 0.5
    # stored as [in, out]  (transpose of PyTorch's [out, in])
    return std * jax.random.normal(key, (fan_in, fan_out), dtype=jnp.float32)


def init_params(key, out_channels, know_num, hidden_dim=512, num_layers=3):
    dims = [know_num] + [hidden_dim // (2 ** i) for i in range(num_layers)] + [1]
    # dims = [K, 512, 256, 128, 1]
    keys = jax.random.split(key, 2 + len(dims) - 1)

    params = []
    # transfer_student_layer, transfer_exercise_layer : Linear(out_channels -> know_num)
    params.append((_xavier_normal(keys[0], out_channels, know_num),
                   jnp.zeros((1, know_num), jnp.float32)))
    params.append((_xavier_normal(keys[1], out_channels, know_num),
                   jnp.zeros((1, know_num), jnp.float32)))
    # Positive_MLP linears
    for i in range(len(dims) - 1):
        params.append((_xavier_normal(keys[2 + i], dims[i], dims[i + 1]),
                       jnp.zeros((1, dims[i + 1]), jnp.float32)))
    return tuple(params)


# ----------------------------------------------------------------------------
# Pure-JAX f32 reference for sanity check
# ----------------------------------------------------------------------------
def reference_forward(params, z, student_id, exercise_id, knowledge_point):
    (ws, bs), (we, be), (w1, b1), (w2, b2), (w3, b3), (w4, b4) = params
    s = jax.nn.sigmoid(z[student_id] @ ws + bs)
    e = jax.nn.sigmoid(z[exercise_id] @ we + be)
    state = knowledge_point * (s - e)
    h = jnp.tanh(state @ w1 + b1)
    h = jnp.tanh(h @ w2 + b2)
    h = jnp.tanh(h @ w3 + b3)
    return jax.nn.sigmoid(h @ w4 + b4).reshape(-1)


# ----------------------------------------------------------------------------
if __name__ == "__main__":
    # small config consistent with the module
    STU_NUM, EXE_NUM = 20, 20
    N = STU_NUM + EXE_NUM            # total graph nodes with embeddings
    OUT_CHANNELS = 16                # config['out_channels']
    KNOW_NUM = 32                    # config['know_num']
    B = 200                          # batch of (student, exercise) interactions (tests padding)

    key = jax.random.PRNGKey(0)
    k_par, k_z, k_s, k_e, k_kp = jax.random.split(key, 5)

    params = init_params(k_par, OUT_CHANNELS, KNOW_NUM)

    z = jax.random.normal(k_z, (N, OUT_CHANNELS), dtype=jnp.float32)
    student_id = jax.random.randint(k_s, (B,), 0, STU_NUM)
    exercise_id = jax.random.randint(k_e, (B,), STU_NUM, N)
    knowledge_point = (jax.random.uniform(k_kp, (B, KNOW_NUM)) < 0.3).astype(jnp.float32)

    out = ncd_decoder_forward(params, z, student_id, exercise_id, knowledge_point)
    out = jax.block_until_ready(out)

    ref = reference_forward(params, z, student_id, exercise_id, knowledge_point)
    assert out.shape == (B,)
    # bf16 matmul operands (+ bf16 tanh on v6e/v7x) -> relaxed tolerance vs f32 reference
    max_err = float(jnp.max(jnp.abs(out - ref)))
    assert jnp.allclose(out, ref, atol=3e-2, rtol=3e-2), max_err

    print("KERNEL_OK")
</pallas_src>

<mosaic_0001>
module attributes {stable_mosaic.version = 11 : i64} {
  func.func @_ncd_decoder_kernel(%arg0: i32, %arg1: memref<256x32xbf16, #tpu.memory_space<vmem>>, %arg2: memref<256x32xbf16, #tpu.memory_space<vmem>>, %arg3: memref<32x64xbf16, #tpu.memory_space<vmem>>, %arg4: memref<1x64xf32, #tpu.memory_space<vmem>>, %arg5: memref<32x512xbf16, #tpu.memory_space<vmem>>, %arg6: memref<1x512xf32, #tpu.memory_space<vmem>>, %arg7: memref<512x256xbf16, #tpu.memory_space<vmem>>, %arg8: memref<1x256xf32, #tpu.memory_space<vmem>>, %arg9: memref<256x128xbf16, #tpu.memory_space<vmem>>, %arg10: memref<1x128xf32, #tpu.memory_space<vmem>>, %arg11: memref<1x128xf32, #tpu.memory_space<vmem>>, %arg12: memref<1x1xf32, #tpu.memory_space<vmem>>, %arg13: memref<1x1x256xf32, #tpu.memory_space<vmem>>) attributes {dimension_semantics = [#tpu.dimension_semantics<parallel>], iteration_bounds = array<i64: 1>, scalar_prefetch = 0 : i64, scratch_operands = 0 : i64, tpu.core_type = #tpu.core_type<tc>, window_params = [{transform_indices = @transform_0, window_bounds = array<i64: 256, 32>}, {transform_indices = @transform_1, window_bounds = array<i64: 256, 32>}, {pipeline_mode = #tpu.pipeline_mode<synchronous>, transform_indices = @transform_2, window_bounds = array<i64: 32, 64>}, {pipeline_mode = #tpu.pipeline_mode<synchronous>, transform_indices = @transform_3, window_bounds = array<i64: 1, 64>}, {pipeline_mode = #tpu.pipeline_mode<synchronous>, transform_indices = @transform_4, window_bounds = array<i64: 32, 512>}, {pipeline_mode = #tpu.pipeline_mode<synchronous>, transform_indices = @transform_5, window_bounds = array<i64: 1, 512>}, {pipeline_mode = #tpu.pipeline_mode<synchronous>, transform_indices = @transform_6, window_bounds = array<i64: 512, 256>}, {pipeline_mode = #tpu.pipeline_mode<synchronous>, transform_indices = @transform_7, window_bounds = array<i64: 1, 256>}, {pipeline_mode = #tpu.pipeline_mode<synchronous>, transform_indices = @transform_8, window_bounds = array<i64: 256, 128>}, {pipeline_mode = #tpu.pipeline_mode<synchronous>, transform_indices = @transform_9, window_bounds = array<i64: 1, 128>}, {pipeline_mode = #tpu.pipeline_mode<synchronous>, transform_indices = @transform_10, window_bounds = array<i64: 1, 128>}, {pipeline_mode = #tpu.pipeline_mode<synchronous>, transform_indices = @transform_11, window_bounds = array<i64: 1, 1>}, {transform_indices = @transform_12, window_bounds = array<i64: 1, 1, 256>}]} {
    %c0 = arith.constant 0 : index
    %c0_0 = arith.constant 0 : index
    %0 = vector.load %arg1[%c0, %c0_0] : memref<256x32xbf16, #tpu.memory_space<vmem>>, vector<256x32xbf16>
    %c0_1 = arith.constant 0 : index
    %c0_2 = arith.constant 0 : index
    %1 = vector.load %arg3[%c0_1, %c0_2] : memref<32x64xbf16, #tpu.memory_space<vmem>>, vector<32x64xbf16>
    %cst = arith.constant dense<0.000000e+00> : vector<256x64xf32>
    %2 = tpu.matmul %0, %1, %cst {dimension_numbers = #tpu.dot_dimension_numbers<[1], [0], [0], [1], [0, 0, 1, 1], [], []>} : vector<256x32xbf16>, vector<32x64xbf16>, vector<256x64xf32> -> vector<256x64xf32>
    %c0_3 = arith.constant 0 : index
    %c0_4 = arith.constant 0 : index
    %3 = vector.load %arg4[%c0_3, %c0_4] : memref<1x64xf32, #tpu.memory_space<vmem>>, vector<1x64xf32>
    %4 = vector.broadcast %3 : vector<1x64xf32> to vector<256x64xf32>
    %5 = arith.addf %2, %4 : vector<256x64xf32>
    %6 = arith.negf %5 : vector<256x64xf32>
    %7 = math.exp %6 : vector<256x64xf32>
    %cst_5 = arith.constant 1.000000e+00 : f32
    %8 = vector.broadcast %cst_5 : f32 to vector<256x64xf32>
    %9 = arith.addf %8, %7 : vector<256x64xf32>
    %10 = arith.divf %8, %9 : vector<256x64xf32>
    %c0_6 = arith.constant 0 : index
    %c0_7 = arith.constant 0 : index
    %11 = vector.load %arg2[%c0_6, %c0_7] : memref<256x32xbf16, #tpu.memory_space<vmem>>, vector<256x32xbf16>
    %12 = vector.extract_strided_slice %10 {offsets = [0, 0], sizes = [256, 32], strides = [1, 1]} : vector<256x64xf32> to vector<256x32xf32>
    %13 = vector.extract_strided_slice %10 {offsets = [0, 32], sizes = [256, 32], strides = [1, 1]} : vector<256x64xf32> to vector<256x32xf32>
    %14 = arith.subf %12, %13 : vector<256x32xf32>
    %15 = arith.truncf %14 : vector<256x32xf32> to vector<256x32xbf16>
    %16 = arith.mulf %11, %15 : vector<256x32xbf16>
    %c0_8 = arith.constant 0 : index
    %c0_9 = arith.constant 0 : index
    %17 = vector.load %arg5[%c0_8, %c0_9] : memref<32x512xbf16, #tpu.memory_space<vmem>>, vector<32x512xbf16>
    %cst_10 = arith.constant dense<0.000000e+00> : vector<256x512xf32>
    %18 = tpu.matmul %16, %17, %cst_10 {dimension_numbers = #tpu.dot_dimension_numbers<[1], [0], [0], [1], [0, 0, 1, 1], [], []>} : vector<256x32xbf16>, vector<32x512xbf16>, vector<256x512xf32> -> vector<256x512xf32>
    %c0_11 = arith.constant 0 : index
    %c0_12 = arith.constant 0 : index
    %19 = vector.load %arg6[%c0_11, %c0_12] : memref<1x512xf32, #tpu.memory_space<vmem>>, vector<1x512xf32>
    %20 = vector.broadcast %19 : vector<1x512xf32> to vector<256x512xf32>
    %21 = arith.addf %18, %20 : vector<256x512xf32>
    %22 = math.tanh %21 : vector<256x512xf32>
    %23 = arith.truncf %22 : vector<256x512xf32> to vector<256x512xbf16>
    %c0_13 = arith.constant 0 : index
    %c0_14 = arith.constant 0 : index
    %24 = vector.load %arg7[%c0_13, %c0_14] : memref<512x256xbf16, #tpu.memory_space<vmem>>, vector<512x256xbf16>
    %cst_15 = arith.constant dense<0.000000e+00> : vector<256x256xf32>
    %25 = tpu.matmul %23, %24, %cst_15 {dimension_numbers = #tpu.dot_dimension_numbers<[1], [0], [0], [1], [0, 0, 1, 1], [], []>} : vector<256x512xbf16>, vector<512x256xbf16>, vector<256x256xf32> -> vector<256x256xf32>
    %c0_16 = arith.constant 0 : index
    %c0_17 = arith.constant 0 : index
    %26 = vector.load %arg8[%c0_16, %c0_17] : memref<1x256xf32, #tpu.memory_space<vmem>>, vector<1x256xf32>
    %27 = vector.broadcast %26 : vector<1x256xf32> to vector<256x256xf32>
    %28 = arith.addf %25, %27 : vector<256x256xf32>
    %29 = math.tanh %28 : vector<256x256xf32>
    %30 = arith.truncf %29 : vector<256x256xf32> to vector<256x256xbf16>
    %c0_18 = arith.constant 0 : index
    %c0_19 = arith.constant 0 : index
    %31 = vector.load %arg9[%c0_18, %c0_19] : memref<256x128xbf16, #tpu.memory_space<vmem>>, vector<256x128xbf16>
    %cst_20 = arith.constant dense<0.000000e+00> : vector<256x128xf32>
    %32 = tpu.matmul %30, %31, %cst_20 {dimension_numbers = #tpu.dot_dimension_numbers<[1], [0], [0], [1], [0, 0, 1, 1], [], []>} : vector<256x256xbf16>, vector<256x128xbf16>, vector<256x128xf32> -> vector<256x128xf32>
    %c0_21 = arith.constant 0 : index
    %c0_22 = arith.constant 0 : index
    %33 = vector.load %arg10[%c0_21, %c0_22] : memref<1x128xf32, #tpu.memory_space<vmem>>, vector<1x128xf32>
    %34 = vector.broadcast %33 : vector<1x128xf32> to vector<256x128xf32>
    %35 = arith.addf %32, %34 : vector<256x128xf32>
    %36 = math.tanh %35 : vector<256x128xf32>
    %c0_23 = arith.constant 0 : index
    %c0_24 = arith.constant 0 : index
    %37 = vector.load %arg11[%c0_23, %c0_24] : memref<1x128xf32, #tpu.memory_space<vmem>>, vector<1x128xf32>
    %38 = vector.broadcast %37 : vector<1x128xf32> to vector<256x128xf32>
    %39 = arith.mulf %36, %38 : vector<256x128xf32>
    %cst_25 = arith.constant dense<0.000000e+00> : vector<256xf32>
    %40 = vector.multi_reduction <add>, %39, %cst_25 [1] : vector<256x128xf32> to vector<256xf32>
    %41 = vector.shape_cast %40 : vector<256xf32> to vector<1x256xf32>
    %c0_26 = arith.constant 0 : index
    %c0_27 = arith.constant 0 : index
    %42 = vector.load %arg12[%c0_26, %c0_27] : memref<1x1xf32, #tpu.memory_space<vmem>>, vector<1x1xf32>
    %43 = vector.broadcast %42 : vector<1x1xf32> to vector<1x256xf32>
    %44 = arith.addf %41, %43 : vector<1x256xf32>
    %45 = arith.negf %44 : vector<1x256xf32>
    %46 = math.exp %45 : vector<1x256xf32>
    %cst_28 = arith.constant 1.000000e+00 : f32
    %47 = vector.broadcast %cst_28 : f32 to vector<1x256xf32>
    %48 = arith.addf %47, %46 : vector<1x256xf32>
    %49 = arith.divf %47, %48 : vector<1x256xf32>
    %50 = vector.shape_cast %49 : vector<1x256xf32> to vector<1x1x256xf32>
    %c0_29 = arith.constant 0 : index
    %c0_30 = arith.constant 0 : index
    %c0_31 = arith.constant 0 : index
    %51 = vector.load %arg13[%c0_29, %c0_30, %c0_31] : memref<1x1x256xf32, #tpu.memory_space<vmem>>, vector<1x1x256xf32>
    tpu.vector_store %arg13[%c0_29, %c0_30, %c0_31], %50 {strides = array<i32>} : memref<1x1x256xf32, #tpu.memory_space<vmem>>, vector<1x1x256xf32>,
    return
  }
  func.func @transform_0(%arg0: i32) -> (i32, i32) {
    %c0_i32 = arith.constant 0 : i32
    %c0_i32_0 = arith.constant 0 : i32
    return %arg0, %c0_i32 : i32, i32
  }
  func.func @transform_1(%arg0: i32) -> (i32, i32) {
    %c0_i32 = arith.constant 0 : i32
    %c0_i32_0 = arith.constant 0 : i32
    return %arg0, %c0_i32 : i32, i32
  }
  func.func @transform_2(%arg0: i32) -> (i32, i32) {
    %c0_i32 = arith.constant 0 : i32
    %c0_i32_0 = arith.constant 0 : i32
    %c0_i32_1 = arith.constant 0 : i32
    return %c0_i32, %c0_i32_0 : i32, i32
  }
  func.func @transform_3(%arg0: i32) -> (i32, i32) {
    %c0_i32 = arith.constant 0 : i32
    %c0_i32_0 = arith.constant 0 : i32
    %c0_i32_1 = arith.constant 0 : i32
    return %c0_i32, %c0_i32_0 : i32, i32
  }
  func.func @transform_4(%arg0: i32) -> (i32, i32) {
    %c0_i32 = arith.constant 0 : i32
    %c0_i32_0 = arith.constant 0 : i32
    %c0_i32_1 = arith.constant 0 : i32
    return %c0_i32, %c0_i32_0 : i32, i32
  }
  func.func @transform_5(%arg0: i32) -> (i32, i32) {
    %c0_i32 = arith.constant 0 : i32
    %c0_i32_0 = arith.constant 0 : i32
    %c0_i32_1 = arith.constant 0 : i32
    return %c0_i32, %c0_i32_0 : i32, i32
  }
  func.func @transform_6(%arg0: i32) -> (i32, i32) {
    %c0_i32 = arith.constant 0 : i32
    %c0_i32_0 = arith.constant 0 : i32
    %c0_i32_1 = arith.constant 0 : i32
    return %c0_i32, %c0_i32_0 : i32, i32
  }
  func.func @transform_7(%arg0: i32) -> (i32, i32) {
    %c0_i32 = arith.constant 0 : i32
    %c0_i32_0 = arith.constant 0 : i32
    %c0_i32_1 = arith.constant 0 : i32
    return %c0_i32, %c0_i32_0 : i32, i32
  }
  func.func @transform_8(%arg0: i32) -> (i32, i32) {
    %c0_i32 = arith.constant 0 : i32
    %c0_i32_0 = arith.constant 0 : i32
    %c0_i32_1 = arith.constant 0 : i32
    return %c0_i32, %c0_i32_0 : i32, i32
  }
  func.func @transform_9(%arg0: i32) -> (i32, i32) {
    %c0_i32 = arith.constant 0 : i32
    %c0_i32_0 = arith.constant 0 : i32
    %c0_i32_1 = arith.constant 0 : i32
    return %c0_i32, %c0_i32_0 : i32, i32
  }
  func.func @transform_10(%arg0: i32) -> (i32, i32) {
    %c0_i32 = arith.constant 0 : i32
    %c0_i32_0 = arith.constant 0 : i32
    %c0_i32_1 = arith.constant 0 : i32
    return %c0_i32, %c0_i32_0 : i32, i32
  }
  func.func @transform_11(%arg0: i32) -> (i32, i32) {
    %c0_i32 = arith.constant 0 : i32
    %c0_i32_0 = arith.constant 0 : i32
    %c0_i32_1 = arith.constant 0 : i32
    return %c0_i32, %c0_i32_0 : i32, i32
  }
  func.func @transform_12(%arg0: i32) -> (i32, i32, i32) {
    %c0_i32 = arith.constant 0 : i32
    %c0_i32_0 = arith.constant 0 : i32
    %c0_i32_1 = arith.constant 0 : i32
    return %arg0, %c0_i32, %c0_i32_0 : i32, i32, i32
  }
}

</mosaic_0001>

<bundles_post_ra>
// kernel: _ncd_decoder_forward_impl.1
= control target key start
LH: loop header
LB: loop body
LE: loop exit
PB: predicated region body
PF: predicated region fallthrough
CT: control target
= control target key end

     0   :  { %s9732_s0 = inlined_call_operand.vmem [shape: bf16[256,32], index: 0, kind: input, shape index: {}]   ;;  %s9733_s1 = inlined_call_operand.vmem [shape: bf16[256,32], index: 1, kind: input, shape index: {}]   ;;  %s9734_s2 = inlined_call_operand.vmem [shape: bf16[32,64], index: 2, kind: input, shape index: {}]   ;;  %s9735_s3 = inlined_call_operand.vmem [shape: f32[1,64], index: 3, kind: input, shape index: {}]   ;;  %s9736_s4 = inlined_call_operand.vmem [shape: bf16[32,512], index: 4, kind: input, shape index: {}]   ;;  %s9737_s5 = inlined_call_operand.vmem [shape: f32[1,512], index: 5, kind: input, shape index: {}]   ;;  %s9738_s6 = inlined_call_operand.vmem [shape: bf16[512,256], index: 6, kind: input, shape index: {}]   ;;  %s9739_s7 = inlined_call_operand.vmem [shape: f32[1,256], index: 7, kind: input, shape index: {}]   ;;  %s9740_s8 = inlined_call_operand.vmem [shape: bf16[256,128], index: 8, kind: input, shape index: {}]   ;;  %s9741_s9 = inlined_call_operand.vmem [shape: f32[1,128], index: 9, kind: input, shape index: {}]   ;;  %s9742_s10 = inlined_call_operand.vmem [shape: f32[1,128], index: 10, kind: input, shape index: {}]   ;;  %s9743_s11 = inlined_call_operand.<no memory space> [shape: f32[1,1], index: 11, kind: input, shape index: {}]   ;;  %s9744_s12 = inlined_call_operand.hbm [shape: f32[1,1,256], index: 12, kind: output, shape index: {}]  }
   0x1   :  { %v17_v0 = vstv %s9743_s11 }
   0x2   :  { %18 = vst [vmem:[#allocation2] sm:$0x1] %v17_v0 }
   0x3   :  { %v6675_v1 = vld [vmem:[%s9734_s2 + $0x8] sm:$0xff]   ;;  %v6676_v2 = vld [vmem:[%s9734_s2] sm:$0xff]   ;;  %vm180_vm0 = vcmask 261120   ;;  %v6679_v5 = vld [vmem:[%s9732_s0 + $0x10] sm:$0xff]  }
   0x4   :  { %6629 = vmatprep.subr.bf16.mxu0 %v6675_v1  ;;  %v6677_v3 = vld [vmem:[%s9732_s0] sm:$0xff]   ;;  %v6678_v4 = vld [vmem:[%s9732_s0 + $0x8] sm:$0xff]   ;;  %v6680_v6 = vld [vmem:[%s9732_s0 + $0x18] sm:$0xff]  }
   0x5   :  { %6630 = vmatpush3.bf16.msra.mxu0 %v6675_v1  ;;  %6633 = vmatprep.mubr.msk.bf16.mxu0 %vm180_vm0, %v6677_v3  ;;  %v6681_v7 = vld [vmem:[%s9732_s0 + $0x20] sm:$0xff]   ;;  %v6682_v8 = vld [vmem:[%s9732_s0 + $0x28] sm:$0xff]   ;;  %v6683_v9 = vld [vmem:[%s9732_s0 + $0x30] sm:$0xff]  }
   0x6   :  { %6631 = vmatprep.subr.bf16.mxu0 %v6676_v2  ;;  %v6684_v10 = vld [vmem:[%s9732_s0 + $0x38] sm:$0xff]   ;;  %v6685_v11 = vld [vmem:[%s9732_s0 + $0x40] sm:$0xff]   ;;  %v6686_v12 = vld [vmem:[%s9732_s0 + $0x48] sm:$0xff]  }
   0x7   :  { %v6687_v13 = vld [vmem:[%s9732_s0 + $0x50] sm:$0xff]   ;;  %v6688_v14 = vld [vmem:[%s9732_s0 + $0x58] sm:$0xff]   ;;  %v6689_v15 = vld [vmem:[%s9732_s0 + $0x60] sm:$0xff]  }
   0x9   :  { %6632 = vmatpush3.bf16.msra.mxu0 %v6676_v2 }
   0xc   :  { %6634 = vmatmul.mubr.msk.bf16.vlgmr.msra.gmra.mxu0 %vm180_vm0, %v6678_v4 }
   0xd   :  { %6637 = vmatprep.mubr.msk.bf16.mxu0 %vm180_vm0, %v6679_v5 }
  0x14   :  { %6638 = vmatmul.mubr.msk.bf16.gmra.mxu0 %vm180_vm0, %v6680_v6 }
  0x15   :  { %6641 = vmatprep.mubr.msk.bf16.mxu0 %vm180_vm0, %v6681_v7 }
  0x1c   :  { %6642 = vmatmul.mubr.msk.bf16.gmra.mxu0 %vm180_vm0, %v6682_v8 }
  0x1d   :  { %6645 = vmatprep.mubr.msk.bf16.mxu0 %vm180_vm0, %v6683_v9 }
  0x24   :  { %6646 = vmatmul.mubr.msk.bf16.gmra.mxu0 %vm180_vm0, %v6684_v10 }
  0x25   :  { %6649 = vmatprep.mubr.msk.bf16.mxu0 %vm180_vm0, %v6685_v11 }
  0x2c   :  { %6650 = vmatmul.mubr.msk.bf16.gmra.mxu0 %vm180_vm0, %v6686_v12 }
  0x2d   :  { %6653 = vmatprep.mubr.msk.bf16.mxu0 %vm180_vm0, %v6687_v13 }
  0x34   :  { %6654 = vmatmul.mubr.msk.bf16.gmra.mxu0 %vm180_vm0, %v6688_v14 }
  0x35   :  { %6657 = vmatprep.mubr.msk.bf16.mxu0 %vm180_vm0, %v6689_v15 }
  0x36   :  { %19 = vsyncpa [#allocation4], 0  ;;  %v6690_v16 = vld [vmem:[%s9732_s0 + $0x68] sm:$0xff]   ;;  %v6691_v17 = vld [vmem:[%s9732_s0 + $0x70] sm:$0xff]   ;;  %vm5984_vm1 = vcmask 130112   ;;  %vm5991_vm2 = vcmask 195712  }
  0x37   :  { %v6692_v18 = vld [vmem:[%s9732_s0 + $0x78] sm:$0xff]   ;;  %v6693_v19 = vld [vmem:[%s9736_s4 + $0x20] ss:$16 sps:$4 sm:$0xff]   ;;  %v6695_v20 = vld [vmem:[%s9736_s4 + $0x24] ss:$16 sps:$4 sm:$0xff]   ;;  %vm5998_vm3 = vcmask 261312  }
  0x38   :  { %1144 = vmatprep.subr.bf16.mxu0 %v6695_v20  ;;  %6665 = vmatprep.subr.bf16.mxu1 %v6695_v20  ;;  %v6696_v21 = vld [vmem:[%s9736_s4] ss:$16 sps:$4 sm:$0xff]   ;;  %v6698_v22 = vld [vmem:[%s9736_s4 + $0x4] ss:$16 sps:$4 sm:$0xff]   ;;  %vm6005_vm4 = vcmask 326912   ;;  %vm6012_vm5 = vcmask 392512  }
  0x39   :  { %1145 = vmatpush1.bf16.msra.mxu0 %v6693_v19  ;;  %6667 = vmatpush1.bf16.msra.mxu1 %v6693_v19  ;;  %v7700_v23 = vld [vmem:[%s9735_s3] ss:$0 sm:$0xff]  ;;  %s7543_s3 = smov 96   ;;  %vm6019_vm6 = vcmask 458112   ;;  %vm6026_vm7 = vcmask 523712   ;;  %vm6033_vm8 = vcmask 589312  }
  0x3a   :  { %1146 = vmatprep.subr.bf16.mxu0 %v6698_v22  ;;  %6666 = vmatprep.subr.bf16.mxu1 %v6698_v22  ;;  %vm6040_vm9 = vcmask 654912   ;;  %vm6047_vm10 = vcmask 720512   ;;  %vm6054_vm11 = vcmask 786112   ;;  %vm6061_vm12 = vcmask 851712  }
  0x3b   :  { %vm6068_vm13 = vcmask 917312   ;;  %vm6075_vm14 = vcmask 982912   ;;  %vm6082_vm15 = vcmask 1048512  }
  0x3c   :  { %6658 = vmatmul.mubr.msk.bf16.gmra.mxu0 %vm180_vm0, %v6690_v16 }
  0x3d   :  { %6661 = vmatprep.mubr.msk.bf16.mxu0 %vm180_vm0, %v6691_v17  ;;  %1147 = vmatpush1.bf16.msra.mxu0 %v6696_v21 }
  0x3e   :  { %6668 = vmatpush1.bf16.msra.mxu1 %v6696_v21 }
  0x44   :  { %6662 = vmatmul.mubr.msk.bf16.gmra.mxu0 %vm180_vm0, %v6692_v18 }
  0xcc   :  { %v6635_v24 = vpop.f32.mrf.mxu0 }
  0xcd   :  { %v272_v25 = vadd.f32 %v6635_v24, %v7700_v23 }
  0xce   :  { %v263_v26 = vpop.f32.mrf.mxu0 }
  0xcf   :  { %v6235_v27 = vmul.f32 -1.442695, %v272_v25  ;;  %v264_v28 = vadd.f32 %v7700_v23, %v263_v26 }
  0xd0   :  { %v6636_v29 = vpop.f32.mrf.mxu0 }
  0xd1   :  { %6817 = vpow2.f32 %v6235_v27  ;;  %v6233_v30 = vmul.f32 -1.442695, %v264_v28  ;;  %v275_v31 = vadd.f32 %v6636_v29, %v7700_v23 }
  0xd2   :  { %v266_v32 = vpop.f32.mrf.mxu0 }
  0xd3   :  { %6819 = vpow2.f32 %v6233_v30  ;;  %v6236_v33 = vmul.f32 -1.442695, %v275_v31  ;;  %v267_v34 = vadd.f32 %v7700_v23, %v266_v32 }
  0xd4   :  { %v6639_v35 = vpop.f32.mrf.mxu0 }
  0xd5   :  { %6821 = vpow2.f32 %v6236_v33  ;;  %v6234_v36 = vmul.f32 -1.442695, %v267_v34  ;;  %v288_v37 = vadd.f32 %v6639_v35, %v7700_v23  ;;  %v7544_v35 = vmov 0  }
  0xd6   :  { %v279_v38 = vpop.f32.mrf.mxu0  ;;  %1164 = vmatprep.mubr.bf16.mxu0 %v7544_v35  ;;  %1204 = vmatprep.mubr.bf16.mxu1 %v7544_v35 }
  0xd7   :  { %6823 = vpow2.f32 %v6234_v36  ;;  %v6239_v39 = vmul.f32 -1.442695, %v288_v37  ;;  %v280_v40 = vadd.f32 %v7700_v23, %v279_v38  ;;  %v6701_v36 = vld [vmem:[%s9736_s4 + $0x2c] ss:$16 sps:$4 sm:$0xff]   ;;  %6673 = vset.pattern.permute.xlu1 %v7544_v35  ;;  %6674 = vset.pattern.permute.xlu0 %v7544_v35 }
  0xd8   :  { %v6640_v41 = vpop.f32.mrf.mxu0  ;;  %1337 = vmatprep.subr.bf16.mxu0 %v6701_v36 }
  0xd9   :  { %6825 = vpow2.f32 %v6239_v39  ;;  %v6237_v42 = vmul.f32 -1.442695, %v280_v40  ;;  %v291_v43 = vadd.f32 %v6640_v41, %v7700_v23 }
  0xda   :  { %v282_v44 = vpop.f32.mrf.mxu0 }
  0xdb   :  { %6827 = vpow2.f32 %v6237_v42  ;;  %v6240_v45 = vmul.f32 -1.442695, %v291_v43  ;;  %v283_v46 = vadd.f32 %v7700_v23, %v282_v44 }
  0xdc   :  { %v6643_v47 = vpop.f32.mrf.mxu0 }
  0xdd   :  { %6829 = vpow2.f32 %v6240_v45  ;;  %v6238_v48 = vmul.f32 -1.442695, %v283_v46  ;;  %v304_v49 = vadd.f32 %v6643_v47, %v7700_v23 }
  0xde   :  { %v6818_v50 = vpop.eup %6817  ;;  %v295_v51 = vpop.f32.mrf.mxu0 }
  0xdf   :  { %v488_v52 = vadd.f32 1.0, %v6818_v50  ;;  %6831 = vpow2.f32 %v6238_v48  ;;  %v6243_v53 = vmul.f32 -1.442695, %v304_v49  ;;  %v296_v54 = vadd.f32 %v7700_v23, %v295_v51 }
  0xe0   :  { %v6820_v55 = vpop.eup %6819  ;;  %v6644_v56 = vpop.f32.mrf.mxu0 }
  0xe1   :  { %6833 = vrcp.f32 %v488_v52  ;;  %v486_v57 = vadd.f32 1.0, %v6820_v55  ;;  %v6241_v58 = vmul.f32 -1.442695, %v296_v54  ;;  %v307_v59 = vadd.f32 %v6644_v56, %v7700_v23 }
  0xe2   :  { %v6822_v60 = vpop.eup %6821  ;;  %6835 = vpow2.f32 %v6243_v53  ;;  %v298_v61 = vpop.f32.mrf.mxu0 }
  0xe3   :  { %6837 = vrcp.f32 %v486_v57  ;;  %v489_v62 = vadd.f32 1.0, %v6822_v60  ;;  %v6244_v63 = vmul.f32 -1.442695, %v307_v59  ;;  %v299_v0 = vadd.f32 %v7700_v23, %v298_v61 }
  0xe4   :  { %v6824_v1 = vpop.eup %6823  ;;  %6839 = vpow2.f32 %v6241_v58  ;;  %v6647_v2 = vpop.f32.mrf.mxu0 }
  0xe5   :  { %6841 = vrcp.f32 %v489_v62  ;;  %v487_v3 = vadd.f32 1.0, %v6824_v1  ;;  %v6242_v4 = vmul.f32 -1.442695, %v299_v0  ;;  %v320_v5 = vadd.f32 %v6647_v2, %v7700_v23 }
  0xe6   :  { %v6826_v6 = vpop.eup %6825  ;;  %6843 = vpow2.f32 %v6244_v63  ;;  %v311_v7 = vpop.f32.mrf.mxu0 }
  0xe7   :  { %6845 = vrcp.f32 %v487_v3  ;;  %v492_v8 = vadd.f32 1.0, %v6826_v6  ;;  %v6247_v9 = vmul.f32 -1.442695, %v320_v5  ;;  %v312_v10 = vadd.f32 %v7700_v23, %v311_v7 }
  0xe8   :  { %v6828_v11 = vpop.eup %6827  ;;  %6847 = vpow2.f32 %v6242_v4  ;;  %v6648_v12 = vpop.f32.mrf.mxu0 }
  0xe9   :  { %6849 = vrcp.f32 %v492_v8  ;;  %v490_v13 = vadd.f32 1.0, %v6828_v11  ;;  %v6245_v14 = vmul.f32 -1.442695, %v312_v10  ;;  %v323_v15 = vadd.f32 %v6648_v12, %v7700_v23 }
  0xea   :  { %v6830_v16 = vpop.eup %6829  ;;  %6851 = vpow2.f32 %v6247_v9  ;;  %v314_v17 = vpop.f32.mrf.mxu0 }
  0xeb   :  { %6853 = vrcp.f32 %v490_v13  ;;  %v493_v18 = vadd.f32 1.0, %v6830_v16  ;;  %v6248_v19 = vmul.f32 -1.442695, %v323_v15  ;;  %v315_v20 = vadd.f32 %v7700_v23, %v314_v17 }
  0xec   :  { %v6832_v21 = vpop.eup %6831  ;;  %6855 = vpow2.f32 %v6245_v14  ;;  %v6651_v22 = vpop.f32.mrf.mxu0 }
  0xed   :  { %6857 = vrcp.f32 %v493_v18  ;;  %v491_v24 = vadd.f32 1.0, %v6832_v21  ;;  %v6246_v25 = vmul.f32 -1.442695, %v315_v20  ;;  %v336_v26 = vadd.f32 %v6651_v22, %v7700_v23 }
  0xee   :  { %v7719_v27 = vpop.eup %6833  ;;  %6859 = vpow2.f32 %v6248_v19  ;;  %v327_v28 = vpop.f32.mrf.mxu0 }
  0xef   :  { %v6836_v29 = vpop.eup %6835  ;;  %6861 = vrcp.f32 %v491_v24  ;;  %v6251_v30 = vmul.f32 -1.442695, %v336_v26  ;;  %v328_v31 = vadd.f32 %v7700_v23, %v327_v28  ;;  %650 = vrot.lane.b32.xlu1 %v7719_v27, %s7543_s3 }
  0xf0   :  { %v7724_v32 = vpop.eup %6837  ;;  %v496_v33 = vadd.f32 1.0, %v6836_v29  ;;  %6863 = vpow2.f32 %v6246_v25  ;;  %v6652_v34 = vpop.f32.mrf.mxu0 }
  0xf1   :  { %v6840_v37 = vpop.eup %6839  ;;  %6865 = vpow2.f32 %v6251_v30  ;;  %v6249_v38 = vmul.f32 -1.442695, %v328_v31  ;;  %v339_v39 = vadd.f32 %v6652_v34, %v7700_v23  ;;  %646 = vrot.lane.b32.xlu0 %v7724_v32, %s7543_s3 }
  0xf2   :  { %v7735_v40 = vpop.eup %6841  ;;  %6867 = vrcp.f32 %v496_v33  ;;  %v494_v41 = vadd.f32 1.0, %v6840_v37  ;;  %v330_v42 = vpop.f32.mrf.mxu0 }
  0xf3   :  { %v6844_v43 = vpop.eup %6843  ;;  %6869 = vpow2.f32 %v6249_v38  ;;  %v6252_v44 = vmul.f32 -1.442695, %v339_v39  ;;  %v331_v45 = vadd.f32 %v7700_v23, %v330_v42  ;;  %652 = vrot.lane.b32.xlu1 %v7735_v40, %s7543_s3 }
  0xf4   :  { %v7741_v46 = vpop.eup %6845  ;;  %6871 = vrcp.f32 %v494_v41  ;;  %v497_v47 = vadd.f32 1.0, %v6844_v43  ;;  %v6655_v48 = vpop.f32.mrf.mxu0 }
  0xf5   :  { %v6848_v49 = vpop.eup %6847  ;;  %6873 = vpow2.f32 %v6252_v44  ;;  %v6250_v50 = vmul.f32 -1.442695, %v331_v45  ;;  %v352_v51 = vadd.f32 %v6655_v48, %v7700_v23  ;;  %648 = vrot.lane.b32.xlu0 %v7741_v46, %s7543_s3 }
  0xf6   :  { %v7746_v52 = vpop.eup %6849  ;;  %6875 = vrcp.f32 %v497_v47  ;;  %v495_v53 = vadd.f32 1.0, %v6848_v49  ;;  %v343_v54 = vpop.f32.mrf.mxu0 }
  0xf7   :  { %v6852_v55 = vpop.eup %6851  ;;  %6877 = vpow2.f32 %v6250_v50  ;;  %v6255_v56 = vmul.f32 -1.442695, %v352_v51  ;;  %v344_v57 = vadd.f32 %v7700_v23, %v343_v54 }
  0xf8   :  { %v7749_v58 = vpop.eup %6853  ;;  %6879 = vrcp.f32 %v495_v53  ;;  %v500_v59 = vadd.f32 1.0, %v6852_v55  ;;  %v6656_v60 = vpop.f32.mrf.mxu0 }
  0xf9   :  { %v6856_v61 = vpop.eup %6855  ;;  %6881 = vpow2.f32 %v6255_v56  ;;  %v6253_v62 = vmul.f32 -1.442695, %v344_v57  ;;  %v355_v63 = vadd.f32 %v6656_v60, %v7700_v23  ;;  %654 = vrot.lane.b32.xlu0 %v7749_v58, %s7543_s3 }
  0xfa   :  { %v7754_v0 = vpop.eup %6857  ;;  %6883 = vrcp.f32 %v500_v59  ;;  %v498_v1 = vadd.f32 1.0, %v6856_v61  ;;  %v346_v2 = vpop.f32.mrf.mxu0 }
  0xfb   :  { %v6860_v3 = vpop.eup %6859  ;;  %6885 = vpow2.f32 %v6253_v62  ;;  %v6256_v4 = vmul.f32 -1.442695, %v355_v63  ;;  %v347_v5 = vadd.f32 %v7700_v23, %v346_v2 }
  0xfc   :  { %v7757_v6 = vpop.eup %6861  ;;  %6887 = vrcp.f32 %v498_v1  ;;  %v501_v7 = vadd.f32 1.0, %v6860_v3  ;;  %v6659_v8 = vpop.f32.mrf.mxu0 }
  0xfd   :  { %v6864_v9 = vpop.eup %6863  ;;  %6889 = vpow2.f32 %v6256_v4  ;;  %v6254_v10 = vmul.f32 -1.442695, %v347_v5  ;;  %v368_v11 = vadd.f32 %v6659_v8, %v7700_v23  ;;  %656 = vrot.lane.b32.xlu1 %v7757_v6, %s7543_s3  ;;  %658 = vrot.lane.b32.xlu0 %v7746_v52, %s7543_s3 }
  0xfe   :  { %v6866_v12 = vpop.eup %6865  ;;  %6891 = vrcp.f32 %v501_v7  ;;  %v499_v13 = vadd.f32 1.0, %v6864_v9  ;;  %v359_v14 = vpop.f32.mrf.mxu0 }
  0xff   :  { %v7764_v15 = vpop.eup %6867  ;;  %v504_v16 = vadd.f32 1.0, %v6866_v12  ;;  %6893 = vpow2.f32 %v6254_v10  ;;  %v6259_v17 = vmul.f32 -1.442695, %v368_v11  ;;  %v360_v18 = vadd.f32 %v7700_v23, %v359_v14 }
 0x100   :  { %v6870_v19 = vpop.eup %6869  ;;  %6895 = vrcp.f32 %v499_v13  ;;  %v6660_v20 = vpop.f32.mrf.mxu0 }
 0x101   :  { %v7767_v21 = vpop.eup %6871  ;;  %6897 = vrcp.f32 %v504_v16  ;;  %v502_v22 = vadd.f32 1.0, %v6870_v19  ;;  %v6257_v24 = vmul.f32 -1.442695, %v360_v18  ;;  %v371_v25 = vadd.f32 %v6660_v20, %v7700_v23  ;;  %660 = vrot.lane.b32.xlu1 %v7754_v0, %s7543_s3 }
 0x102   :  { %v6874_v26 = vpop.eup %6873  ;;  %6899 = vpow2.f32 %v6259_v17  ;;  %662 = vrot.lane.b32.xlu0 %v7767_v21, %s7543_s3  ;;  %v362_v28 = vpop.f32.mrf.mxu0 }
 0x103   :  { %v7774_v29 = vpop.eup %6875  ;;  %6901 = vrcp.f32 %v502_v22  ;;  %v505_v30 = vadd.f32 1.0, %v6874_v26  ;;  %v6260_v31 = vmul.f32 -1.442695, %v371_v25  ;;  %v363_v33 = vadd.f32 %v7700_v23, %v362_v28 }
 0x104   :  { %v6878_v34 = vpop.eup %6877  ;;  %6903 = vpow2.f32 %v6257_v24  ;;  %v6663_v36 = vpop.f32.mrf.mxu0 }
 0x105   :  { %v7777_v37 = vpop.eup %6879  ;;  %6905 = vrcp.f32 %v505_v30  ;;  %v503_v38 = vadd.f32 1.0, %v6878_v34  ;;  %v6258_v39 = vmul.f32 -1.442695, %v363_v33  ;;  %v384_v41 = vadd.f32 %v6663_v36, %v7700_v23 }
 0x106   :  { %v6882_v42 = vpop.eup %6881  ;;  %6907 = vpow2.f32 %v6260_v31  ;;  %664 = vrot.lane.b32.xlu1 %v7777_v37, %s7543_s3  ;;  %666 = vrot.lane.b32.xlu0 %v7764_v15, %s7543_s3  ;;  %v375_v43 = vpop.f32.mrf.mxu0 }
 0x107   :  { %v7784_v44 = vpop.eup %6883  ;;  %6909 = vrcp.f32 %v503_v38  ;;  %v6263_v45 = vmul.f32 -1.442695, %v384_v41  ;;  %v376_v47 = vadd.f32 %v7700_v23, %v375_v43  ;;  %v508_v51 = vadd.f32 1.0, %v6882_v42 }
 0x108   :  { %v6886_v48 = vpop.eup %6885  ;;  %6911 = vpow2.f32 %v6258_v39  ;;  %v6664_v49 = vpop.f32.mrf.mxu0 }
 0x109   :  { %v7787_v50 = vpop.eup %6887  ;;  %v506_v53 = vadd.f32 1.0, %v6886_v48  ;;  %v6261_v54 = vmul.f32 -1.442695, %v376_v47  ;;  %v387_v55 = vadd.f32 %v6664_v49, %v7700_v23  ;;  %6913 = vpow2.f32 %v6263_v45 }
 0x10a   :  { %v6890_v56 = vpop.eup %6889  ;;  %668 = vrot.lane.b32.xlu1 %v7774_v29, %s7543_s3  ;;  %670 = vrot.lane.b32.xlu0 %v7787_v50, %s7543_s3  ;;  %v378_v57 = vpop.f32.mrf.mxu0 }
 0x10b   :  { %v7794_v59 = vpop.eup %6891  ;;  %6915 = vrcp.f32 %v506_v53  ;;  %v6264_v60 = vmul.f32 -1.442695, %v387_v55  ;;  %v379_v61 = vadd.f32 %v7700_v23, %v378_v57  ;;  %v509_v4 = vadd.f32 1.0, %v6890_v56  ;;  %v582_v56 = vld [vmem:[%s9733_s1] sm:$0xf] }
 0x10c   :  { %v6894_v62 = vpop.eup %6893  ;;  %6917 = vpow2.f32 %v6261_v54  ;;  %v583_v57 = vld [vmem:[%s9733_s1 + $0x4] sm:$0xf] }
 0x10d   :  { %v7797_v63 = vpop.eup %6895  ;;  %6919 = vrcp.f32 %v508_v51  ;;  %v507_v1 = vadd.f32 1.0, %v6894_v62  ;;  %v6262_v2 = vmul.f32 -1.442695, %v379_v61 }
 0x10e   :  { %v7799_v3 = vpop.eup %6897  ;;  %6921 = vpow2.f32 %v6264_v60  ;;  %672 = vrot.lane.b32.xlu1 %v7797_v63, %s7543_s3  ;;  %674 = vrot.lane.b32.xlu0 %v7784_v44, %s7543_s3 }
 0x10f   :  { %v6900_v5 = vpop.eup %6899  ;;  %6923 = vrcp.f32 %v507_v1 }
 0x110   :  { %v7805_v23 = vpop.eup %6901  ;;  %6925 = vpow2.f32 %v6262_v2  ;;  %v512_v9 = vadd.f32 1.0, %v6900_v5 }
 0x111   :  { %v6904_v7 = vpop.eup %6903  ;;  %6927 = vrcp.f32 %v509_v4 }
 0x112   :  { %v7807_v8 = vpop.eup %6905  ;;  %v510_v10 = vadd.f32 1.0, %v6904_v7  ;;  %676 = vrot.lane.b32.xlu1 %v7794_v59, %s7543_s3  ;;  %678 = vrot.lane.b32.xlu0 %v7805_v23, %s7543_s3  ;;  %v6704_v7 = vld [vmem:[%s9736_s4 + $0xc] ss:$16 sps:$4 sm:$0xff]  }
 0x113   :  { %v6908_v11 = vpop.eup %6907 }
 0x114   :  { %v7813_v12 = vpop.eup %6909  ;;  %6929 = vrcp.f32 %v510_v10  ;;  %v513_v14 = vadd.f32 1.0, %v6908_v11  ;;  %v584_v11 = vld [vmem:[%s9733_s1 + $0x8] sm:$0xf] }
 0x115   :  { %v6912_v13 = vpop.eup %6911  ;;  %6931 = vrcp.f32 %v512_v9 }
 0x116   :  { %v511_v16 = vadd.f32 1.0, %v6912_v13  ;;  %680 = vrot.lane.b32.xlu1 %v7813_v12, %s7543_s3  ;;  %682 = vrot.lane.b32.xlu0 %v7799_v3, %s7543_s3  ;;  %v6914_v17 = vpop.eup %6913  ;;  %v6702_v13 = vld [vmem:[%s9736_s4 + $0x8] ss:$16 sps:$4 sm:$0xff]  }
 0x117   :  { %v516_v22 = vadd.f32 1.0, %v6914_v17  ;;  %v6707_v17 = vld [vmem:[%s9738_s6 + $0x174] ss:$8 sps:$4 sm:$0xff]  }
 0x118   :  { %v7819_v18 = vpop.eup %6915  ;;  %6933 = vrcp.f32 %v511_v16 }
 0x119   :  { %v6918_v19 = vpop.eup %6917  ;;  %6935 = vrcp.f32 %v513_v14 }
 0x11a   :  { %v7821_v20 = vpop.eup %6919  ;;  %v514_v24 = vadd.f32 1.0, %v6918_v19  ;;  %684 = vrot.lane.b32.xlu1 %v7807_v8, %s7543_s3  ;;  %686 = vrot.lane.b32.xlu0 %v7819_v18, %s7543_s3 }
 0x11b   :  { %v6922_v25 = vpop.eup %6921 }
 0x11c   :  { %v7827_v26 = vpop.eup %6923  ;;  %6937 = vrcp.f32 %v514_v24  ;;  %v517_v30 = vadd.f32 1.0, %v6922_v25 }
 0x11d   :  { %v6926_v28 = vpop.eup %6925  ;;  %6939 = vrcp.f32 %v516_v22 }
 0x11e   :  { %v515_v31 = vadd.f32 1.0, %v6926_v28  ;;  %688 = vrot.lane.b32.xlu1 %v7827_v26, %s7543_s3  ;;  %690 = vrot.lane.b32.xlu0 %v7821_v20, %s7543_s3  ;;  %v7833_v33 = vpop.eup %6927 }
 0x120   :  { %6941 = vrcp.f32 %v515_v31 }
 0x121   :  { %v7835_v34 = vpop.eup %6929  ;;  %6943 = vrcp.f32 %v517_v30 }
 0x122   :  { %692 = vrot.lane.b32.xlu1 %v7833_v33, %s7543_s3  ;;  %694 = vrot.lane.b32.xlu0 %v7835_v34, %s7543_s3  ;;  %v7841_v36 = vpop.eup %6931 }
 0x125   :  { %v7843_v38 = vpop.eup %6933 }
 0x126   :  { %696 = vrot.lane.b32.xlu1 %v7843_v38, %s7543_s3  ;;  %698 = vrot.lane.b32.xlu0 %v7841_v36, %s7543_s3  ;;  %v7849_v39 = vpop.eup %6935 }
 0x129   :  { %v7851_v41 = vpop.eup %6937 }
 0x12a   :  { %700 = vrot.lane.b32.xlu1 %v7849_v39, %s7543_s3  ;;  %702 = vrot.lane.b32.xlu0 %v7851_v41, %s7543_s3  ;;  %v7857_v42 = vpop.eup %6939 }
 0x12d   :  { %v7859_v43 = vpop.eup %6941 }
 0x12e   :  { %704 = vrot.lane.b32.xlu1 %v7859_v43, %s7543_s3  ;;  %706 = vrot.lane.b32.xlu0 %v7857_v42, %s7543_s3  ;;  %v7865_v45 = vpop.eup %6943 }
 0x132   :  { %708 = vrot.lane.b32.xlu1 %v7865_v45, %s7543_s3 }
 0x161   :  { %v651_v47 = vpop.permute.xlu1 %650 }
 0x162   :  { %v744_v1 = vsub.f32 %v7719_v27, %v651_v47 }
 0x163   :  { %v647_v48 = vpop.permute.xlu0 %646 }
 0x164   :  { %v742_v49 = vsub.f32 %v7724_v32, %v647_v48  ;;  %v6469_v27 = vpack.c.bf16 %v744_v1, %v744_v1 }
 0x165   :  { %v653_v51 = vpop.permute.xlu1 %652 }
 0x166   :  { %v6467_v54 = vpack.c.bf16 %v742_v49, %v742_v49  ;;  %v745_v60 = vsub.f32 %v7735_v40, %v653_v51  ;;  %v585_v40 = vld [vmem:[%s9733_s1 + $0xc] sm:$0xf]  ;;  %v904_v22 = vmul.bf16 %v6469_v27, %v584_v11  ;;  %v6717_v27 = vld [vmem:[%s9738_s6 + $0x70] ss:$8 sps:$4 sm:$0xff]   ;;  %v6719_v11 = vld [vmem:[%s9738_s6 + $0x74] ss:$8 sps:$4 sm:$0xff]  }
 0x167   :  { %v649_v53 = vpop.permute.xlu0 %648  ;;  %2106 = vmatprep.subr.bf16.mxu1 %v6719_v11 }
 0x168   :  { %v743_v55 = vsub.f32 %v7741_v46, %v649_v53  ;;  %v902_v32 = vmul.bf16 %v6467_v54, %v582_v56  ;;  %v6699_v46 = vld [vmem:[%s9736_s4 + $0x28] ss:$16 sps:$4 sm:$0xff]   ;;  %v6470_v4 = vpack.c.bf16 %v745_v60, %v745_v60  ;;  %v590_v54 = vld [vmem:[%s9733_s1 + $0x20] sm:$0xf] }
 0x16a   :  { %v6468_v61 = vpack.c.bf16 %v743_v55, %v743_v55  ;;  %v905_v14 = vmul.bf16 %v6470_v4, %v585_v40  ;;  %v591_v55 = vld [vmem:[%s9733_s1 + $0x24] sm:$0xf]  ;;  %v589_v4 = vld [vmem:[%s9733_s1 + $0x1c] sm:$0xf] }
 0x16b   :  { %v655_v62 = vpop.permute.xlu0 %654 }
 0x16c   :  { %v903_v2 = vmul.bf16 %v6468_v61, %v583_v57  ;;  %v746_v24 = vsub.f32 %v7749_v58, %v655_v62  ;;  %v7905_v30 = vcombine.low %v904_v22, %v905_v14  ;;  %v586_v58 = vld [vmem:[%s9733_s1 + $0x10] sm:$0xf]  ;;  %v592_v14 = vld [vmem:[%s9733_s1 + $0x28] sm:$0xf] }
 0x16e   :  { %v7882_v5 = vcombine.low %v902_v32, %v903_v2  ;;  %v6471_v47 = vpack.c.bf16 %v746_v24, %v746_v24 }
 0x16f   :  { %v657_v9 = vpop.permute.xlu1 %656  ;;  %v659_v10 = vpop.permute.xlu0 %658 }
 0x170   :  { %6321 = vmatmul.mubr.msk.bf16.vlgmr.msra.gmra.mxu0 %vm180_vm0, %v7882_v5  ;;  %v747_v16 = vsub.f32 %v7757_v6, %v657_v9  ;;  %v587_v6 = vld [vmem:[%s9733_s1 + $0x14] sm:$0xf]  ;;  %v906_v60 = vmul.bf16 %v6471_v47, %v586_v58  ;;  %v748_v61 = vsub.f32 %v7746_v52, %v659_v10  ;;  %v593_v52 = vld [vmem:[%s9733_s1 + $0x2c] sm:$0xf] }
 0x171   :  { %1338 = vmatpush1.bf16.msra.mxu0 %v6699_v46  ;;  %1174 = vmatprep.mubr.bf16.mxu0 %v7544_v35  ;;  %v595_v47 = vld [vmem:[%s9733_s1 + $0x34] sm:$0xf] }
 0x172   :  { %1339 = vmatprep.subr.bf16.mxu0 %v6704_v7  ;;  %v6472_v31 = vpack.c.bf16 %v747_v16, %v747_v16  ;;  %v6473_v9 = vpack.c.bf16 %v748_v61, %v748_v61 }
 0x173   :  { %v661_v19 = vpop.permute.xlu1 %660 }
 0x174   :  { %v663_v25 = vpop.permute.xlu0 %662  ;;  %v907_v51 = vmul.bf16 %v6472_v31, %v587_v6  ;;  %v749_v53 = vsub.f32 %v7754_v0, %v661_v19 }
 0x175   :  { %v750_v28 = vsub.f32 %v7767_v21, %v663_v25  ;;  %1340 = vmatpush1.bf16.msra.mxu0 %v6702_v13 }
 0x176   :  { %2299 = vmatprep.subr.bf16.mxu0 %v6707_v17  ;;  %v7927_v2 = vcombine.low %v906_v60, %v907_v51  ;;  %v6474_v46 = vpack.c.bf16 %v749_v53, %v749_v53  ;;  %v6731_v51 = vld [vmem:[%s9738_s6 + $0x54] ss:$8 sps:$4 sm:$0xff]  }
 0x177   :  { %v6475_v49 = vpack.c.bf16 %v750_v28, %v750_v28 }
 0x178   :  { %v665_v48 = vpop.permute.xlu1 %664  ;;  %6322 = vmatmul.mubr.msk.bf16.gmra.mxu0 %vm180_vm0, %v7905_v30  ;;  %v667_v56 = vpop.permute.xlu0 %666  ;;  %v909_v13 = vmul.bf16 %v6474_v46, %v589_v4  ;;  %v6740_v46 = vld [vmem:[%s9738_s6 + $0x34] ss:$8 sps:$4 sm:$0xff]  }
 0x179   :  { %v751_v21 = vsub.f32 %v7777_v37, %v665_v48  ;;  %1184 = vmatprep.mubr.bf16.mxu0 %v7544_v35  ;;  %v910_v37 = vmul.bf16 %v6475_v49, %v590_v54  ;;  %v752_v32 = vsub.f32 %v7764_v15, %v667_v56  ;;  %v588_v15 = vld [vmem:[%s9733_s1 + $0x18] sm:$0xf]  ;;  %v594_v49 = vld [vmem:[%s9733_s1 + $0x30] sm:$0xf] }
 0x17a   :  { %v908_v22 = vmul.bf16 %v6473_v9, %v588_v15 }
 0x17b   :  { %v6476_v57 = vpack.c.bf16 %v751_v21, %v751_v21 }
 0x17c   :  { %v669_v62 = vpop.permute.xlu1 %668  ;;  %v671_v16 = vpop.permute.xlu0 %670  ;;  %v7957_v28 = vcombine.low %v908_v22, %v909_v13  ;;  %v6738_v13 = vld [vmem:[%s9738_s6 + $0x30] ss:$8 sps:$4 sm:$0xff]   ;;  %v598_v22 = vld [vmem:[%s9733_s1 + $0x40] sm:$0xf] }
 0x17d   :  { %v911_v1 = vmul.bf16 %v6476_v57, %v591_v55  ;;  %v753_v0 = vsub.f32 %v7774_v29, %v669_v62  ;;  %v6477_v29 = vpack.c.bf16 %v752_v32, %v752_v32  ;;  %v754_v25 = vsub.f32 %v7787_v50, %v671_v16  ;;  %v6725_v50 = vld [vmem:[%s9738_s6 + $0x64] ss:$8 sps:$4 sm:$0xff]   ;;  %v6729_v55 = vld [vmem:[%s9738_s6 + $0x50] ss:$8 sps:$4 sm:$0xff]   ;;  %v6732_v32 = vld [vmem:[%s9738_s6 + $0x40] ss:$8 sps:$4 sm:$0xff]  }
 0x17e   :  { %v6705_v62 = vld [vmem:[%s9738_s6 + $0x170] ss:$8 sps:$4 sm:$0xff]  }
 0x17f   :  { %v7932_v7 = vcombine.low %v910_v37, %v911_v1  ;;  %v6478_v40 = vpack.c.bf16 %v753_v0, %v753_v0  ;;  %v912_v24 = vmul.bf16 %v6477_v29, %v592_v14  ;;  %v6479_v58 = vpack.c.bf16 %v754_v25, %v754_v25  ;;  %v597_v37 = vld [vmem:[%s9733_s1 + $0x3c] sm:$0xf]  ;;  %v599_v14 = vld [vmem:[%s9733_s1 + $0x44] sm:$0xf] }
 0x180   :  { %v673_v10 = vpop.permute.xlu1 %672  ;;  %6323 = vmatmul.mubr.msk.bf16.gmra.mxu0 %vm180_vm0, %v7927_v2  ;;  %v675_v21 = vpop.permute.xlu0 %674 }
 0x181   :  { %6325 = vmatmul.mubr.msk.bf16.vlgmr.msra.gmra.mxu1 %vm180_vm0, %v7932_v7  ;;  %1194 = vmatprep.mubr.bf16.mxu0 %v7544_v35  ;;  %v913_v17 = vmul.bf16 %v6478_v40, %v593_v52  ;;  %v755_v19 = vsub.f32 %v7797_v63, %v673_v10  ;;  %v6723_v63 = vld [vmem:[%s9738_s6 + $0x60] ss:$8 sps:$4 sm:$0xff]   ;;  %v914_v56 = vmul.bf16 %v6479_v58, %v594_v49  ;;  %v6713_v10 = vld [vmem:[%s9738_s6 + $0x154] ss:$8 sps:$4 sm:$0xff]   ;;  %v6720_v49 = vld [vmem:[%s9738_s6 + $0x130] ss:$8 sps:$4 sm:$0xff]  }
 0x182   :  { %1214 = vmatprep.mubr.bf16.mxu1 %v7544_v35  ;;  %2107 = vmatpush1.bf16.msra.mxu1 %v6717_v27  ;;  %v756_v57 = vsub.f32 %v7784_v44, %v675_v21  ;;  %v6710_v44 = vld [vmem:[%s9738_s6 + $0x164] ss:$8 sps:$4 sm:$0xff]   ;;  %v6708_v52 = vld [vmem:[%s9738_s6 + $0x160] ss:$8 sps:$4 sm:$0xff]   ;;  %v6749_v21 = vld [vmem:[%s9738_s6 + $0x14] ss:$8 sps:$4 sm:$0xff]  }
 0x183   :  { %v7959_v31 = vcombine.low %v912_v24, %v913_v17  ;;  %v6480_v6 = vpack.c.bf16 %v755_v19, %v755_v19  ;;  %2108 = vmatprep.subr.bf16.mxu1 %v6725_v50  ;;  %v6743_v17 = vld [vmem:[%s9738_s6 + $0x24] ss:$8 sps:$4 sm:$0xff]  }
 0x184   :  { %v677_v48 = vpop.permute.xlu1 %676  ;;  %v6481_v0 = vpack.c.bf16 %v756_v57, %v756_v57  ;;  %v679_v4 = vpop.permute.xlu0 %678 }
 0x185   :  { %v915_v53 = vmul.bf16 %v6480_v6, %v595_v47  ;;  %v757_v54 = vsub.f32 %v7794_v59, %v677_v48  ;;  %v6734_v59 = vld [vmem:[%s9738_s6 + $0x44] ss:$8 sps:$4 sm:$0xff]   ;;  %v758_v29 = vsub.f32 %v7805_v23, %v679_v4  ;;  %v6714_v6 = vld [vmem:[%s9738_s6 + $0x140] ss:$8 sps:$4 sm:$0xff]   ;;  %v6722_v48 = vld [vmem:[%s9738_s6 + $0x134] ss:$8 sps:$4 sm:$0xff]  }
 0x186   :  { %2109 = vmatpush1.bf16.msra.mxu1 %v6723_v63  ;;  %v6716_v23 = vld [vmem:[%s9738_s6 + $0x144] ss:$8 sps:$4 sm:$0xff]   ;;  %v6741_v47 = vld [vmem:[%s9738_s6 + $0x20] ss:$8 sps:$4 sm:$0xff]  }
 0x187   :  { %2110 = vmatprep.subr.bf16.mxu1 %v6731_v51  ;;  %v7987_v60 = vcombine.low %v914_v56, %v915_v53  ;;  %v6482_v61 = vpack.c.bf16 %v757_v54, %v757_v54  ;;  %v6483_v19 = vpack.c.bf16 %v758_v29, %v758_v29  ;;  %v601_v51 = vld [vmem:[%s9733_s1 + $0x4c] sm:$0xf]  ;;  %v6747_v54 = vld [vmem:[%s9738_s6 + $0x10] ss:$8 sps:$4 sm:$0xff]  }
 0x188   :  { %6324 = vmatmul.mubr.msk.bf16.gmra.mxu0 %vm180_vm0, %v7957_v28  ;;  %v681_v1 = vpop.permute.xlu1 %680  ;;  %v683_v24 = vpop.permute.xlu0 %682  ;;  %v6752_v56 = vld [vmem:[%s9738_s6 + $0x4] ss:$8 sps:$4 sm:$0xff]  }
 0x189   :  { %6326 = vmatmul.mubr.msk.bf16.gmra.mxu1 %vm180_vm0, %v7959_v31  ;;  %1357 = vmatprep.mubr.bf16.mxu0 %v7544_v35  ;;  %v917_v40 = vmul.bf16 %v6482_v61, %v597_v37  ;;  %v759_v9 = vsub.f32 %v7813_v12, %v681_v1  ;;  %v6711_v12 = vld [vmem:[%s9738_s6 + $0x150] ss:$8 sps:$4 sm:$0xff]   ;;  %v918_v63 = vmul.bf16 %v6483_v19, %v598_v22  ;;  %v6737_v37 = vld [vmem:[%s9738_s6 + $0x114] ss:$8 sps:$4 sm:$0xff]  }
 0x18a   :  { %1224 = vmatprep.mubr.bf16.mxu1 %v7544_v35  ;;  %2111 = vmatpush1.bf16.msra.mxu1 %v6729_v55  ;;  %v760_v58 = vsub.f32 %v7799_v3, %v683_v24  ;;  %v6728_v3 = vld [vmem:[%s9738_s6 + $0x124] ss:$8 sps:$4 sm:$0xff]   ;;  %v6753_v19 = vld [vmem:[%s9738_s6 + $0x1f0] ss:$8 sps:$4 sm:$0xff]   ;;  %v605_v22 = vld [vmem:[%s9733_s1 + $0x5c] sm:$0xf] }
 0x18b   :  { %2112 = vmatprep.subr.bf16.mxu1 %v6734_v59  ;;  %v6484_v11 = vpack.c.bf16 %v759_v9, %v759_v9  ;;  %v6726_v59 = vld [vmem:[%s9738_s6 + $0x120] ss:$8 sps:$4 sm:$0xff]  }
 0x18c   :  { %v685_v16 = vpop.permute.xlu1 %684  ;;  %v6485_v55 = vpack.c.bf16 %v760_v58, %v760_v58  ;;  %v687_v57 = vpop.permute.xlu0 %686  ;;  %v6764_v58 = vld [vmem:[%s9738_s6 + $0x1e4] ss:$8 sps:$4 sm:$0xff]  }
 0x18d   :  { %v761_v25 = vsub.f32 %v7807_v8, %v685_v16 }
 0x18e   :  { %2113 = vmatpush1.bf16.msra.mxu1 %v6732_v32 }
 0x18f   :  { %2114 = vmatprep.subr.bf16.mxu1 %v6740_v46  ;;  %v6486_v50 = vpack.c.bf16 %v761_v25, %v761_v25  ;;  %v6735_v46 = vld [vmem:[%s9738_s6 + $0x110] ss:$8 sps:$4 sm:$0xff]  }
 0x190   :  { %6337 = vmatmul.mubr.msk.bf16.vlgmr.msra.gmra.mxu0 %vm180_vm0, %v7882_v5  ;;  %v596_v5 = vld [vmem:[%s9733_s1 + $0x38] sm:$0xf]  ;;  %v689_v53 = vpop.permute.xlu1 %688 }
 0x191   :  { %6327 = vmatmul.mubr.msk.bf16.gmra.mxu1 %vm180_vm0, %v7987_v60  ;;  %1367 = vmatprep.mubr.bf16.mxu0 %v7544_v35  ;;  %v916_v15 = vmul.bf16 %v6481_v0, %v596_v5  ;;  %v921_v61 = vmul.bf16 %v6486_v50, %v601_v51  ;;  %v6758_v5 = vld [vmem:[%s9738_s6 + $0xf4] ss:$8 sps:$4 sm:$0xff]   ;;  %v604_v25 = vld [vmem:[%s9733_s1 + $0x58] sm:$0xf] }
 0x192   :  { %1234 = vmatprep.mubr.bf16.mxu1 %v7544_v35  ;;  %2300 = vmatpush1.bf16.msra.mxu0 %v6705_v62  ;;  %v763_v62 = vsub.f32 %v7827_v26, %v689_v53  ;;  %v6750_v26 = vld [vmem:[%s9738_s6] ss:$8 sps:$4 sm:$0xff]  }
 0x193   :  { %2301 = vmatprep.subr.bf16.mxu0 %v6710_v44  ;;  %v8024_v27 = vcombine.low %v916_v15, %v917_v40  ;;  %2115 = vmatpush1.bf16.msra.mxu1 %v6738_v13  ;;  %v762_v44 = vsub.f32 %v7819_v18, %v687_v57  ;;  %v603_v18 = vld [vmem:[%s9733_s1 + $0x54] sm:$0xf]  ;;  %v6746_v40 = vld [vmem:[%s9738_s6 + $0x104] ss:$8 sps:$4 sm:$0xff]  }
 0x194   :  { %2116 = vmatprep.subr.bf16.mxu1 %v6743_v17  ;;  %v6488_v0 = vpack.c.bf16 %v763_v62, %v763_v62  ;;  %v693_v4 = vpop.permute.xlu1 %692  ;;  %v6755_v13 = vld [vmem:[%s9738_s6 + $0x1f4] ss:$8 sps:$4 sm:$0xff]   ;;  %v6771_v62 = vld [vmem:[%s9738_s6 + $0x1d0] ss:$8 sps:$4 sm:$0xff]  }
 0x195   :  { %v6487_v9 = vpack.c.bf16 %v762_v44, %v762_v44  ;;  %v765_v29 = vsub.f32 %v7833_v33, %v693_v4  ;;  %v6759_v33 = vld [vmem:[%s9738_s6 + $0xe0] ss:$8 sps:$4 sm:$0xff]   ;;  %v6779_v44 = vld [vmem:[%s9738_s6 + $0xa4] ss:$8 sps:$4 sm:$0xff]  }
 0x196   :  { %2302 = vmatpush1.bf16.msra.mxu0 %v6708_v52  ;;  %v602_v52 = vld [vmem:[%s9733_s1 + $0x50] sm:$0xf]  ;;  %v923_v15 = vmul.bf16 %v6488_v0, %v603_v18  ;;  %v6785_v18 = vld [vmem:[%s9738_s6 + $0x94] ss:$8 sps:$4 sm:$0xff]   ;;  %v608_v4 = vld [vmem:[%s9733_s1 + $0x68] sm:$0xf] }
 0x197   :  { %2303 = vmatprep.subr.bf16.mxu0 %v6713_v10  ;;  %2117 = vmatpush1.bf16.msra.mxu1 %v6741_v47  ;;  %v691_v10 = vpop.permute.xlu0 %690  ;;  %v6490_v17 = vpack.c.bf16 %v765_v29, %v765_v29 }
 0x198   :  { %6338 = vmatmul.mubr.msk.bf16.gmra.mxu0 %vm180_vm0, %v7905_v30  ;;  %v919_v30 = vmul.bf16 %v6484_v11, %v599_v14  ;;  %2118 = vmatprep.subr.bf16.mxu1 %v6749_v21  ;;  %v6744_v11 = vld [vmem:[%s9738_s6 + $0x100] ss:$8 sps:$4 sm:$0xff]   ;;  %v922_v14 = vmul.bf16 %v6487_v9, %v602_v52  ;;  %v764_v16 = vsub.f32 %v7821_v20, %v691_v10  ;;  %v697_v24 = vpop.permute.xlu1 %696  ;;  %v6770_v21 = vld [vmem:[%s9738_s6 + $0xc4] ss:$8 sps:$4 sm:$0xff]  }
 0x199   :  { %6328 = vmatmul.mubr.msk.bf16.gmra.mxu1 %vm180_vm0, %v8024_v27  ;;  %1377 = vmatprep.mubr.bf16.mxu0 %v7544_v35  ;;  %v925_v47 = vmul.bf16 %v6490_v17, %v605_v22  ;;  %v6780_v10 = vld [vmem:[%s9738_s6 + $0x1c0] ss:$8 sps:$4 sm:$0xff]  }
 0x19a   :  { %1244 = vmatprep.mubr.bf16.mxu1 %v7544_v35  ;;  %2304 = vmatpush1.bf16.msra.mxu0 %v6711_v12  ;;  %v8061_v8 = vcombine.low %v918_v63, %v919_v30  ;;  %v6761_v12 = vld [vmem:[%s9738_s6 + $0xe4] ss:$8 sps:$4 sm:$0xff]   ;;  %v6489_v20 = vpack.c.bf16 %v764_v16, %v764_v16  ;;  %v6767_v30 = vld [vmem:[%s9738_s6 + $0xd4] ss:$8 sps:$4 sm:$0xff]   ;;  %v6762_v63 = vld [vmem:[%s9738_s6 + $0x1e0] ss:$8 sps:$4 sm:$0xff]  }
 0x19b   :  { %2305 = vmatprep.subr.bf16.mxu0 %v6716_v23  ;;  %2119 = vmatpush1.bf16.msra.mxu1 %v6747_v54  ;;  %v8141_v23 = vcombine.low %v922_v14, %v923_v15  ;;  %v611_v14 = vld [vmem:[%s9733_s1 + $0x74] sm:$0xf] }
 0x19c   :  { %2120 = vmatprep.subr.bf16.mxu1 %v6752_v56  ;;  %v924_v50 = vmul.bf16 %v6489_v20, %v604_v25  ;;  %v606_v56 = vld [vmem:[%s9733_s1 + $0x60] sm:$0xf] }
 0x19e   :  { %2306 = vmatpush1.bf16.msra.mxu0 %v6714_v6  ;;  %v695_v6 = vpop.permute.xlu0 %694  ;;  %v8178_v51 = vcombine.low %v924_v50, %v925_v47  ;;  %v6797_v50 = vld [vmem:[%s9738_s6 + $0x194] ss:$8 sps:$4 sm:$0xff]  }
 0x19f   :  { %2307 = vmatprep.subr.bf16.mxu0 %v6722_v48  ;;  %2121 = vmatpush1.bf16.msra.mxu1 %v6750_v26  ;;  %v767_v48 = vsub.f32 %v7843_v38, %v697_v24  ;;  %v6768_v38 = vld [vmem:[%s9738_s6 + $0xc0] ss:$8 sps:$4 sm:$0xff]   ;;  %v6791_v24 = vld [vmem:[%s9738_s6 + $0x1b4] ss:$8 sps:$4 sm:$0xff]  }
 0x1a0   :  { %6339 = vmatmul.mubr.msk.bf16.gmra.mxu0 %vm180_vm0, %v7927_v2  ;;  %v600_v2 = vld [vmem:[%s9733_s1 + $0x48] sm:$0xf]  ;;  %2122 = vmatprep.subr.bf16.mxu1 %v6758_v5 }
 0x1a1   :  { %6329 = vmatmul.mubr.msk.bf16.gmra.mxu1 %vm180_vm0, %v8061_v8  ;;  %1387 = vmatprep.mubr.bf16.mxu0 %v7544_v35  ;;  %v920_v1 = vmul.bf16 %v6485_v55, %v600_v2  ;;  %v6492_v53 = vpack.c.bf16 %v767_v48, %v767_v48  ;;  %v6776_v55 = vld [vmem:[%s9738_s6 + $0xb4] ss:$8 sps:$4 sm:$0xff]   ;;  %v6792_v48 = vld [vmem:[%s9738_s6 + $0x1a0] ss:$8 sps:$4 sm:$0xff]  }
 0x1a2   :  { %1254 = vmatprep.mubr.bf16.mxu1 %v7544_v35  ;;  %2308 = vmatpush1.bf16.msra.mxu0 %v6720_v49  ;;  %v766_v49 = vsub.f32 %v7835_v34, %v695_v6  ;;  %v701_v34 = vpop.permute.xlu1 %700  ;;  %v699_v2 = vpop.permute.xlu0 %698 }
 0x1a3   :  { %2309 = vmatprep.subr.bf16.mxu0 %v6728_v3  ;;  %v8101_v32 = vcombine.low %v920_v1, %v921_v61  ;;  %v607_v3 = vld [vmem:[%s9733_s1 + $0x64] sm:$0xf]  ;;  %v769_v61 = vsub.f32 %v7849_v39, %v701_v34  ;;  %v768_v1 = vsub.f32 %v7841_v36, %v699_v2  ;;  %v6777_v39 = vld [vmem:[%s9738_s6 + $0xa0] ss:$8 sps:$4 sm:$0xff]  }
 0x1a4   :  { %v6491_v54 = vpack.c.bf16 %v766_v49, %v766_v49  ;;  %v927_v57 = vmul.bf16 %v6492_v53, %v607_v3  ;;  %v6795_v49 = vld [vmem:[%s9738_s6 + $0x190] ss:$8 sps:$4 sm:$0xff]   ;;  %v8321_v53 = vld [vmem:[%s9737_s5] sm:$0xf] }
 0x1a5   :  { %v6494_v0 = vpack.c.bf16 %v769_v61, %v769_v61  ;;  %v6493_v5 = vpack.c.bf16 %v768_v1, %v768_v1 }
 0x1a6   :  { %2310 = vmatpush1.bf16.msra.mxu0 %v6726_v59  ;;  %v6773_v59 = vld [vmem:[%s9738_s6 + $0x1d4] ss:$8 sps:$4 sm:$0xff]   ;;  %v705_v36 = vpop.permute.xlu1 %704 }
 0x1a7   :  { %2311 = vmatprep.subr.bf16.mxu0 %v6737_v37  ;;  %v926_v37 = vmul.bf16 %v6491_v54, %v606_v56  ;;  %v771_v52 = vsub.f32 %v7859_v43, %v705_v36  ;;  %v928_v15 = vmul.bf16 %v6493_v5, %v608_v4  ;;  %v6786_v43 = vld [vmem:[%s9738_s6 + $0x80] ss:$8 sps:$4 sm:$0xff]  }
 0x1a8   :  { %6340 = vmatmul.mubr.msk.bf16.gmra.mxu0 %vm180_vm0, %v7957_v28  ;;  %v6756_v28 = vld [vmem:[%s9738_s6 + $0xf0] ss:$8 sps:$4 sm:$0xff]  }
 0x1a9   :  { %6330 = vmatmul.mubr.msk.bf16.gmra.mxu1 %vm180_vm0, %v8101_v32  ;;  %1397 = vmatprep.mubr.bf16.mxu0 %v7544_v35  ;;  %v8212_v26 = vcombine.low %v926_v37, %v927_v57 }
 0x1aa   :  { %1264 = vmatprep.mubr.bf16.mxu1 %v7544_v35  ;;  %2312 = vmatpush1.bf16.msra.mxu0 %v6735_v46  ;;  %v609_v46 = vld [vmem:[%s9733_s1 + $0x6c] sm:$0xf]  ;;  %v709_v16 = vpop.permute.xlu1 %708 }
 0x1ab   :  { %2313 = vmatprep.subr.bf16.mxu0 %v6746_v40  ;;  %2123 = vmatpush2.bf16.msra.mxu1 %v6756_v28  ;;  %v703_v40 = vpop.permute.xlu0 %702  ;;  %v929_v9 = vmul.bf16 %v6494_v0, %v609_v46  ;;  %v6782_v28 = vld [vmem:[%s9738_s6 + $0x1c4] ss:$8 sps:$4 sm:$0xff]   ;;  %v773_v22 = vsub.f32 %v7865_v45, %v709_v16 }
 0x1ac   :  { %2124 = vmatprep.subr.bf16.mxu1 %v6761_v12  ;;  %v770_v29 = vsub.f32 %v7851_v41, %v703_v40 }
 0x1ad   :  { %v6310_v12 = vcombine.low %v928_v15, %v929_v9  ;;  %v6498_v6 = vpack.c.bf16 %v773_v22, %v773_v22  ;;  %v6801_v15 = vld [vmem:[%s9740_s8 + $0x78] sm:$0xff]  }
 0x1ae   :  { %2314 = vmatpush1.bf16.msra.mxu0 %v6744_v11  ;;  %v6788_v11 = vld [vmem:[%s9738_s6 + $0x84] ss:$8 sps:$4 sm:$0xff]   ;;  %v6495_v41 = vpack.c.bf16 %v770_v29, %v770_v29 }
 0x1af   :  { %2315 = vmatprep.subr.bf16.mxu0 %v6755_v13  ;;  %2125 = vmatpush2.bf16.msra.mxu1 %v6759_v33  ;;  %v6496_v13 = vpack.c.bf16 %v771_v52, %v771_v52  ;;  %v610_v33 = vld [vmem:[%s9733_s1 + $0x70] sm:$0xf]  ;;  %v707_v17 = vpop.permute.xlu0 %706 }
 0x1b0   :  { %6341 = vmatmul.mubr.msk.bf16.gmra.mxu0 %vm180_vm0, %v7932_v7  ;;  %v6765_v7 = vld [vmem:[%s9738_s6 + $0xd0] ss:$8 sps:$4 sm:$0xff]   ;;  %2126 = vmatprep.subr.bf16.mxu1 %v6767_v30  ;;  %v930_v20 = vmul.bf16 %v6495_v41, %v610_v33  ;;  %v772_v30 = vsub.f32 %v7857_v42, %v707_v17 }
 0x1b1   :  { %6331 = vmatmul.mubr.msk.bf16.gmra.mxu1 %vm180_vm0, %v8141_v23  ;;  %1407 = vmatprep.mubr.bf16.mxu0 %v7544_v35  ;;  %v612_v42 = vld [vmem:[%s9733_s1 + $0x78] sm:$0xf] }
 0x1b2   :  { %1274 = vmatprep.mubr.bf16.mxu1 %v7544_v35  ;;  %2316 = vmatpush2.bf16.msra.mxu0 %v6753_v19  ;;  %v931_v19 = vmul.bf16 %v6496_v13, %v611_v14  ;;  %v6497_v45 = vpack.c.bf16 %v772_v30, %v772_v30  ;;  %v6802_v41 = vld [vmem:[%s9740_s8 + $0x38] sm:$0xff]  }
 0x1b3   :  { %2317 = vmatprep.subr.bf16.mxu0 %v6764_v58  ;;  %2127 = vmatpush2.bf16.msra.mxu1 %v6765_v7  ;;  %v613_v7 = vld [vmem:[%s9733_s1 + $0x7c] sm:$0xf] }
 0x1b4   :  { %2128 = vmatprep.subr.bf16.mxu1 %v6770_v21  ;;  %v6311_v25 = vcombine.low %v930_v20, %v931_v19  ;;  %v933_v47 = vmul.bf16 %v6498_v6, %v613_v7  ;;  %v944_v21 = vlaneseq }
 0x1b6   :  { %2318 = vmatpush2.bf16.msra.mxu0 %v6762_v63  ;;  %v932_v63 = vmul.bf16 %v6497_v45, %v612_v42 }
 0x1b7   :  { %2129 = vmatpush2.bf16.msra.mxu1 %v6768_v38  ;;  %2319 = vmatprep.subr.bf16.mxu0 %v6773_v59  ;;  %v8313_v38 = vshrl.u32 %v944_v21, 7 }
 0x1b8   :  { %6342 = vmatmul.mubr.msk.bf16.gmra.mxu0 %vm180_vm0, %v7959_v31  ;;  %v6774_v31 = vld [vmem:[%s9738_s6 + $0xb0] ss:$8 sps:$4 sm:$0xff]   ;;  %2130 = vmatprep.subr.bf16.mxu1 %v6776_v55  ;;  %v6312_v58 = vcombine.low %v932_v63, %v933_v47 }
 0x1b9   :  { %6332 = vmatmul.mubr.msk.bf16.gmra.mxu1 %vm180_vm0, %v8178_v51  ;;  %1417 = vmatprep.mubr.bf16.mxu0 %v7544_v35  ;;  %v8324_v3 = vsub.s32 0, %v8313_v38  ;;  %v8362_v63 = vsub.s32 2, %v8313_v38 }
 0x1ba   :  { %1284 = vmatprep.mubr.bf16.mxu1 %v7544_v35  ;;  %2320 = vmatpush2.bf16.msra.mxu0 %v6771_v62 }
 0x1bb   :  { %2131 = vmatpush2.bf16.msra.mxu1 %v6774_v31  ;;  %2321 = vmatprep.subr.bf16.mxu0 %v6782_v28  ;;  %v8332_v54 = vrot.slane %v8321_v53, %v8324_v3 }
 0x1bc   :  { %2132 = vmatprep.subr.bf16.mxu1 %v6779_v44 }
 0x1be   :  { %2322 = vmatpush2.bf16.msra.mxu0 %v6780_v10 }
 0x1bf   :  { %2133 = vmatpush2.bf16.msra.mxu1 %v6777_v39  ;;  %2323 = vmatprep.subr.bf16.mxu0 %v6791_v24  ;;  %v8356_v24 = vsub.s32 3, %v8313_v38 }
 0x1c0   :  { %6343 = vmatmul.mubr.msk.bf16.gmra.mxu0 %vm180_vm0, %v7987_v60  ;;  %v6783_v60 = vld [vmem:[%s9738_s6 + $0x90] ss:$8 sps:$4 sm:$0xff]   ;;  %2134 = vmatprep.subr.bf16.mxu1 %v6785_v18 }
 0x1c1   :  { %6333 = vmatmul.mubr.msk.bf16.gmra.mxu1 %vm180_vm0, %v8212_v26  ;;  %1427 = vmatprep.mubr.bf16.mxu0 %v7544_v35 }
 0x1c2   :  { %1294 = vmatprep.mubr.bf16.mxu1 %v7544_v35 }
 0x1c3   :  { %2135 = vmatpush2.bf16.msra.mxu1 %v6783_v60 }
 0x1c4   :  { %2136 = vmatprep.subr.bf16.mxu1 %v6788_v11 }
 0x1c7   :  { %2137 = vmatpush2.bf16.msra.mxu1 %v6786_v43 }
 0x1c8   :  { %6344 = vmatmul.mubr.msk.bf16.gmra.mxu0 %vm180_vm0, %v8024_v27  ;;  %v6789_v27 = vld [vmem:[%s9738_s6 + $0x1b0] ss:$8 sps:$4 sm:$0xff]   ;;  %6517 = vmatprep.subr.bf16.mxu1 %v6801_v15 }
 0x1c9   :  { %6334 = vmatmul.mubr.msk.bf16.gmra.mxu1 %vm180_vm0, %v6310_v12  ;;  %1437 = vmatprep.mubr.bf16.mxu0 %v7544_v35 }
 0x1ca   :  { %1304 = vmatprep.mubr.bf16.mxu1 %v7544_v35  ;;  %2324 = vmatpush2.bf16.msra.mxu0 %v6789_v27 }
 0x1d0   :  { %6345 = vmatmul.mubr.msk.bf16.gmra.mxu0 %vm180_vm0, %v8061_v8  ;;  %v6794_v8 = vld [vmem:[%s9738_s6 + $0x1a4] ss:$8 sps:$4 sm:$0xff]  }
 0x1d1   :  { %6335 = vmatmul.mubr.msk.bf16.gmra.mxu1 %vm180_vm0, %v6311_v25  ;;  %1447 = vmatprep.mubr.bf16.mxu0 %v7544_v35 }
 0x1d2   :  { %1314 = vmatprep.mubr.bf16.mxu1 %v7544_v35  ;;  %2325 = vmatprep.subr.bf16.mxu0 %v6794_v8 }
 0x1d3   :  { %2326 = vmatpush2.bf16.msra.mxu0 %v6792_v48 }
 0x1d4   :  { %2327 = vmatprep.subr.bf16.mxu0 %v6797_v50 }
 0x1d7   :  { %2328 = vmatpush2.bf16.msra.mxu0 %v6795_v49 }
 0x1d8   :  { %6346 = vmatmul.mubr.msk.bf16.gmra.mxu0 %vm180_vm0, %v8101_v32  ;;  %v6798_v32 = vld [vmem:[%s9738_s6 + $0x180] ss:$8 sps:$4 sm:$0xff]  }
 0x1d9   :  { %6336 = vmatmul.mubr.msk.bf16.gmra.mxu1 %vm180_vm0, %v6312_v58  ;;  %1457 = vmatprep.mubr.bf16.mxu0 %v7544_v35 }
 0x1e0   :  { %6347 = vmatmul.mubr.msk.bf16.gmra.mxu0 %vm180_vm0, %v8141_v23  ;;  %v6800_v23 = vld [vmem:[%s9738_s6 + $0x184] ss:$8 sps:$4 sm:$0xff]  }
 0x1e1   :  { %1467 = vmatprep.mubr.bf16.mxu0 %v7544_v35  ;;  %2329 = vmatprep.subr.bf16.mxu0 %v6800_v23 }
 0x1e2   :  { %2330 = vmatpush2.bf16.msra.mxu0 %v6798_v32 }
 0x1e8   :  { %6348 = vmatmul.mubr.msk.bf16.gmra.mxu0 %vm180_vm0, %v8178_v51  ;;  %v8316_v51 = vsub.s32 1, %v8313_v38 }
 0x1e9   :  { %1477 = vmatprep.mubr.bf16.mxu0 %v7544_v35 }
 0x1f0   :  { %6349 = vmatmul.mubr.msk.bf16.gmra.mxu0 %vm180_vm0, %v8212_v26 }
 0x1f1   :  { %1487 = vmatprep.mubr.bf16.mxu0 %v7544_v35 }
 0x1f8   :  { %6350 = vmatmul.mubr.msk.bf16.gmra.mxu0 %vm180_vm0, %v6310_v12 }
 0x1f9   :  { %1497 = vmatprep.mubr.bf16.mxu0 %v7544_v35 }
 0x200   :  { %6351 = vmatmul.mubr.msk.bf16.gmra.mxu0 %vm180_vm0, %v6311_v25 }
 0x201   :  { %1507 = vmatprep.mubr.bf16.mxu0 %v7544_v35  ;;  %v8328_v35 = vrot.slane %v8321_v53, %v8316_v51 }
 0x208   :  { %6352 = vmatmul.mubr.msk.bf16.gmra.mxu0 %vm180_vm0, %v6312_v58  ;;  %v8366_v58 = vrot.slane %v8321_v53, %v8356_v24  ;;  %vm6181_vm0 = vcmp.lt.s32.totalorder %v944_v21, 256 }
 0x230   :  { %v1166_v34 = vpop.f32.mrf.mxu0 }
 0x231   :  { %v1167_v57 = vadd.f32 %v1166_v34, %v8332_v54 }
 0x232   :  { %v1168_v55 = vpop.f32.mrf.mxu0 }
 0x233   :  { %v1169_v56 = vadd.f32 %v1168_v55, %v8328_v35 }
 0x234   :  { %v1170_v2 = vpop.f32.mrf.mxu0 }
 0x235   :  { %v1171_v31 = vadd.f32 %v1170_v2, %v8332_v54  ;;  %6945 = vtanh.f32 %v1169_v56 }
 0x236   :  { %v1172_v61 = vpop.f32.mrf.mxu0 }
 0x237   :  { %v1173_v62 = vadd.f32 %v1172_v61, %v8328_v35  ;;  %6947 = vtanh.f32 %v1171_v31 }
 0x238   :  { %v1176_v59 = vpop.f32.mrf.mxu0 }
 0x239   :  { %6949 = vtanh.f32 %v1173_v62  ;;  %v1177_v26 = vadd.f32 %v1176_v59, %v8332_v54  ;;  %v8377_v62 = vrot.slane %v8321_v53, %v8362_v63 }
 0x23a   :  { %6951 = vtanh.f32 %v1167_v57  ;;  %v1178_v37 = vpop.f32.mrf.mxu0 }
 0x23b   :  { %v1179_v1 = vadd.f32 %v1178_v37, %v8328_v35  ;;  %v6803_v37 = vld [vmem:[%s9740_s8 + $0x70] sm:$0xff]  }
 0x23c   :  { %v1180_v44 = vpop.f32.mrf.mxu0 }
 0x23d   :  { %v1181_v39 = vadd.f32 %v1180_v44, %v8332_v54  ;;  %6953 = vtanh.f32 %v1179_v1  ;;  %v6804_v1 = vld [vmem:[%s9740_s8 + $0x30] sm:$0xff]  }
 0x23e   :  { %v1182_v0 = vpop.f32.mrf.mxu0 }
 0x23f   :  { %v1183_v46 = vadd.f32 %v1182_v0, %v8328_v35  ;;  %6955 = vtanh.f32 %v1181_v39 }
 0x240   :  { %v1186_v36 = vpop.f32.mrf.mxu0 }
 0x241   :  { %6957 = vtanh.f32 %v1183_v46  ;;  %v1206_v5 = vpop.f32.mrf.mxu1  ;;  %v1187_v11 = vadd.f32 %v1186_v36, %v8332_v54 }
 0x242   :  { %6959 = vtanh.f32 %v1177_v26  ;;  %v1188_v18 = vpop.f32.mrf.mxu0  ;;  %v6946_v60 = vpop.eup %6945  ;;  %v1207_v55 = vadd.f32 %v1206_v5, %v8332_v54 }
 0x243   :  { %v1189_v4 = vadd.f32 %v1188_v18, %v8328_v35  ;;  %v1208_v40 = vpop.f32.mrf.mxu1 }
 0x244   :  { %v1190_v9 = vpop.f32.mrf.mxu0  ;;  %v6948_v52 = vpop.eup %6947  ;;  %v1209_v49 = vadd.f32 %v1208_v40, %v8328_v35 }
 0x245   :  { %v1191_v10 = vadd.f32 %v1190_v9, %v8332_v54  ;;  %v1210_v28 = vpop.f32.mrf.mxu1  ;;  %6961 = vtanh.f32 %v1189_v4 }
 0x246   :  { %v6950_v29 = vpop.eup %6949  ;;  %v1192_v43 = vpop.f32.mrf.mxu0  ;;  %v1211_v31 = vadd.f32 %v1210_v28, %v8332_v54 }
 0x247   :  { %v6952_v12 = vpop.eup %6951  ;;  %v1193_v13 = vadd.f32 %v1192_v43, %v8328_v35  ;;  %v1212_v14 = vpop.f32.mrf.mxu1  ;;  %v1647_v16 = vpack.c.bf16 %v6950_v29, %v6946_v60  ;;  %6963 = vtanh.f32 %v1191_v10 }
 0x248   :  { %v1196_v33 = vpop.f32.mrf.mxu0  ;;  %v1646_v17 = vpack.c.bf16 %v6948_v52, %v6952_v12  ;;  %v1213_v22 = vadd.f32 %v1212_v14, %v8328_v35 }
 0x249   :  { %6965 = vtanh.f32 %v1193_v13  ;;  %v8352_v19 = vpop.f32.mrf.mxu1  ;;  %2138 = vmatprep.mubr.bf16.mxu1 %v1647_v16  ;;  %v1197_v48 = vadd.f32 %v1196_v33, %v8332_v54 }
 0x24a   :  { %6967 = vtanh.f32 %v1187_v11  ;;  %v1198_v27 = vpop.f32.mrf.mxu0  ;;  %2139 = vmatmul.mubr.bf16.vlgmr.msra.gmra.mxu1 %v1646_v17  ;;  %v6954_v25 = vpop.eup %6953  ;;  %v1217_v28 = vadd.f32 %v8352_v19, %v8332_v54 }
 0x24b   :  { %v1199_v20 = vadd.f32 %v1198_v27, %v8328_v35  ;;  %v1218_v30 = vpop.f32.mrf.mxu1  ;;  %6518 = vmatpush3.bf16.msra.mxu1 %v6802_v41  ;;  %6969 = vtanh.f32 %v1213_v22 }
 0x24c   :  { %v1200_v6 = vpop.f32.mrf.mxu0  ;;  %v6956_v7 = vpop.eup %6955  ;;  %6519 = vmatprep.subr.bf16.mxu1 %v6803_v37  ;;  %v1219_v60 = vadd.f32 %v1218_v30, %v8328_v35 }
 0x24d   :  { %v1201_v45 = vadd.f32 %v1200_v6, %v8332_v54  ;;  %v1220_v42 = vpop.f32.mrf.mxu1  ;;  %6971 = vtanh.f32 %v1199_v20 }
 0x24e   :  { %v6958_v47 = vpop.eup %6957  ;;  %v1202_v8 = vpop.f32.mrf.mxu0  ;;  %v1221_v11 = vadd.f32 %v1220_v42, %v8332_v54 }
 0x24f   :  { %v6960_v50 = vpop.eup %6959  ;;  %v1203_v32 = vadd.f32 %v1202_v8, %v8328_v35  ;;  %v1222_v23 = vpop.f32.mrf.mxu1  ;;  %v1651_v34 = vpack.c.bf16 %v6958_v47, %v6954_v25  ;;  %6973 = vtanh.f32 %v1201_v45  ;;  %6520 = vmatpush3.bf16.msra.mxu1 %v6804_v1 }
 0x250   :  { %v1359_v56 = vpop.f32.mrf.mxu0  ;;  %v1650_v2 = vpack.c.bf16 %v6956_v7, %v6960_v50  ;;  %v1223_v61 = vadd.f32 %v1222_v23, %v8328_v35 }
 0x251   :  { %6975 = vtanh.f32 %v1203_v32  ;;  %v8372_v57 = vpop.f32.mrf.mxu1  ;;  %2148 = vmatprep.mubr.bf16.mxu1 %v1651_v34  ;;  %v1360_v18 = vadd.f32 %v1359_v56, %v8377_v62 }
 0x252   :  { %6977 = vtanh.f32 %v1197_v48  ;;  %v1361_v59 = vpop.f32.mrf.mxu0  ;;  %2149 = vmatmul.mubr.bf16.gmra.mxu1 %v1650_v2  ;;  %v6962_v26 = vpop.eup %6961  ;;  %v1227_v8 = vadd.f32 %v8372_v57, %v8332_v54  ;;  %v6805_v57 = vld [vmem:[%s9740_s8 + $0x68] sm:$0xff]  }
 0x253   :  { %6979 = vtanh.f32 %v1209_v49  ;;  %v1228_v44 = vpop.f32.mrf.mxu1  ;;  %v1362_v39 = vadd.f32 %v1361_v59, %v8366_v58  ;;  %v6807_v59 = vld [vmem:[%s9740_s8 + $0x60] sm:$0xff]   ;;  %6521 = vmatprep.subr.bf16.mxu1 %v6805_v57 }
 0x254   :  { %6981 = vtanh.f32 %v1207_v55  ;;  %v1363_v0 = vpop.f32.mrf.mxu0  ;;  %v6964_v53 = vpop.eup %6963  ;;  %v1229_v7 = vadd.f32 %v1228_v44, %v8328_v35 }
 0x255   :  { %6983 = vtanh.f32 %v1211_v31  ;;  %v1230_v46 = vpop.f32.mrf.mxu1  ;;  %v1364_v36 = vadd.f32 %v1363_v0, %v8377_v62 }
 0x256   :  { %v6966_v5 = vpop.eup %6965  ;;  %6985 = vtanh.f32 %v1223_v61  ;;  %v1365_v4 = vpop.f32.mrf.mxu0  ;;  %v1231_v23 = vadd.f32 %v1230_v46, %v8332_v54  ;;  %v6806_v61 = vld [vmem:[%s9740_s8 + $0x28] sm:$0xff]  }
 0x257   :  { %v6968_v40 = vpop.eup %6967  ;;  %6987 = vtanh.f32 %v1362_v39  ;;  %v1232_v9 = vpop.f32.mrf.mxu1  ;;  %v1366_v52 = vadd.f32 %v1365_v4, %v8366_v58  ;;  %v1655_v10 = vpack.c.bf16 %v6966_v5, %v6962_v26  ;;  %6522 = vmatpush3.bf16.msra.mxu1 %v6806_v61 }
 0x258   :  { %6989 = vtanh.f32 %v1364_v36  ;;  %v1369_v15 = vpop.f32.mrf.mxu0  ;;  %v1654_v29 = vpack.c.bf16 %v6964_v53, %v6968_v40  ;;  %v1233_v12 = vadd.f32 %v1232_v9, %v8328_v35  ;;  %v6970_v14 = vpop.eup %6969  ;;  %v6808_v36 = vld [vmem:[%s9740_s8 + $0x20] sm:$0xff]   ;;  %6523 = vmatprep.subr.bf16.mxu1 %v6807_v59 }
 0x259   :  { %6991 = vtanh.f32 %v1366_v52  ;;  %v8393_v43 = vpop.f32.mrf.mxu1  ;;  %2158 = vmatprep.mubr.bf16.mxu1 %v1655_v10  ;;  %v1370_v30 = vadd.f32 %v1369_v15, %v8377_v62 }
 0x25a   :  { %6993 = vtanh.f32 %v1360_v18  ;;  %v1371_v13 = vpop.f32.mrf.mxu0  ;;  %2159 = vmatmul.mubr.bf16.gmra.mxu1 %v1654_v29  ;;  %v6972_v33 = vpop.eup %6971 }
 0x25b   :  { %6995 = vtanh.f32 %v1219_v60  ;;  %v1238_v16 = vpop.f32.mrf.mxu1  ;;  %v1372_v41 = vadd.f32 %v1371_v13, %v8366_v58  ;;  %6524 = vmatpush3.bf16.msra.mxu1 %v6808_v36 }
 0x25c   :  { %6997 = vtanh.f32 %v1217_v28  ;;  %v1373_v17 = vpop.f32.mrf.mxu0  ;;  %v6974_v19 = vpop.eup %6973  ;;  %v1239_v60 = vadd.f32 %v1238_v16, %v8328_v35  ;;  %v6809_v28 = vld [vmem:[%s9740_s8 + $0x58] sm:$0xff]  }
 0x25d   :  { %6999 = vtanh.f32 %v1221_v11  ;;  %v8397_v22 = vpop.f32.mrf.mxu1  ;;  %v1374_v27 = vadd.f32 %v1373_v17, %v8377_v62  ;;  %v1237_v11 = vadd.f32 %v8393_v43, %v8332_v54  ;;  %v6810_v17 = vld [vmem:[%s9740_s8 + $0x18] sm:$0xff]   ;;  %6525 = vmatprep.subr.bf16.mxu1 %v6809_v28 }
 0x25e   :  { %v6976_v20 = vpop.eup %6975  ;;  %7001 = vtanh.f32 %v1233_v12  ;;  %v1375_v25 = vpop.f32.mrf.mxu0  ;;  %v1241_v16 = vadd.f32 %v8397_v22, %v8332_v54 }
 0x25f   :  { %v6978_v6 = vpop.eup %6977  ;;  %7003 = vtanh.f32 %v1372_v41  ;;  %v1242_v45 = vpop.f32.mrf.mxu1  ;;  %v1376_v42 = vadd.f32 %v1375_v25, %v8366_v58  ;;  %v1659_v47 = vpack.c.bf16 %v6976_v20, %v6972_v33  ;;  %6526 = vmatpush3.bf16.msra.mxu1 %v6810_v17 }
 0x260   :  { %v6980_v48 = vpop.eup %6979  ;;  %7005 = vtanh.f32 %v1374_v27  ;;  %v1379_v50 = vpop.f32.mrf.mxu0  ;;  %v1658_v49 = vpack.c.bf16 %v6974_v19, %v6978_v6  ;;  %v1243_v2 = vadd.f32 %v1242_v45, %v8328_v35 }
 0x261   :  { %v6982_v32 = vpop.eup %6981  ;;  %7007 = vtanh.f32 %v1376_v42  ;;  %v8406_v34 = vpop.f32.mrf.mxu1  ;;  %2168 = vmatprep.mubr.bf16.mxu1 %v1659_v47  ;;  %v1663_v55 = vpack.c.bf16 %v6970_v14, %v6980_v48  ;;  %v1380_v18 = vadd.f32 %v1379_v50, %v8377_v62 }
 0x262   :  { %v6984_v56 = vpop.eup %6983  ;;  %7009 = vtanh.f32 %v1370_v30  ;;  %v1381_v31 = vpop.f32.mrf.mxu0  ;;  %2169 = vmatmul.mubr.bf16.gmra.mxu1 %v1658_v49 }
 0x263   :  { %v6986_v37 = vpop.eup %6985  ;;  %7011 = vtanh.f32 %v1229_v7  ;;  %v8418_v1 = vpop.f32.mrf.mxu1  ;;  %v1382_v44 = vadd.f32 %v1381_v31, %v8366_v58  ;;  %2178 = vmatprep.mubr.bf16.mxu1 %v1663_v55  ;;  %v1662_v13 = vpack.c.bf16 %v6984_v56, %v6982_v32 }
 0x264   :  { %v6988_v39 = vpop.eup %6987  ;;  %7013 = vtanh.f32 %v1227_v8  ;;  %v1383_v26 = vpop.f32.mrf.mxu0  ;;  %v1249_v49 = vadd.f32 %v8418_v1, %v8328_v35 }
 0x265   :  { %v6990_v0 = vpop.eup %6989  ;;  %7015 = vtanh.f32 %v1231_v23  ;;  %v8421_v53 = vpop.f32.mrf.mxu1  ;;  %v1384_v46 = vadd.f32 %v1383_v26, %v8377_v62 }
 0x266   :  { %v6992_v5 = vpop.eup %6991  ;;  %7017 = vtanh.f32 %v1243_v2  ;;  %v1385_v4 = vpop.f32.mrf.mxu0  ;;  %v1247_v2 = vadd.f32 %v8406_v34, %v8332_v54 }
 0x267   :  { %v6994_v40 = vpop.eup %6993  ;;  %7019 = vtanh.f32 %v1382_v44  ;;  %v1252_v9 = vpop.f32.mrf.mxu1  ;;  %v1386_v52 = vadd.f32 %v1385_v4, %v8366_v58  ;;  %v1649_v10 = vpack.c.bf16 %v6992_v5, %v6988_v39 }
 0x268   :  { %v6996_v15 = vpop.eup %6995  ;;  %v1648_v29 = vpack.c.bf16 %v6990_v0, %v6994_v40  ;;  %7021 = vtanh.f32 %v1384_v46  ;;  %v1389_v12 = vpop.f32.mrf.mxu0  ;;  %v1253_v43 = vadd.f32 %v1252_v9, %v8328_v35 }
 0x269   :  { %v6998_v14 = vpop.eup %6997  ;;  %7023 = vtanh.f32 %v1386_v52  ;;  %v8437_v41 = vpop.f32.mrf.mxu1  ;;  %2331 = vmatprep.mubr.bf16.mxu0 %v1649_v10  ;;  %v1667_v33 = vpack.c.bf16 %v6986_v37, %v6996_v15  ;;  %v1390_v48 = vadd.f32 %v1389_v12, %v8377_v62  ;;  %v1251_v37 = vadd.f32 %v8421_v53, %v8332_v54 }
 0x26a   :  { %v7000_v19 = vpop.eup %6999  ;;  %7025 = vtanh.f32 %v1380_v18  ;;  %v1391_v27 = vpop.f32.mrf.mxu0  ;;  %2179 = vmatmul.mubr.bf16.gmra.mxu1 %v1662_v13  ;;  %2332 = vmatmul.mubr.bf16.vlgmr.msra.gmra.mxu0 %v1648_v29  ;;  %v1257_v13 = vadd.f32 %v8437_v41, %v8332_v54 }
 0x26b   :  { %v7002_v20 = vpop.eup %7001  ;;  %7027 = vtanh.f32 %v1239_v60  ;;  %v1258_v22 = vpop.f32.mrf.mxu1  ;;  %v1392_v30 = vadd.f32 %v1391_v27, %v8366_v58  ;;  %2188 = vmatprep.mubr.bf16.mxu1 %v1667_v33  ;;  %v1666_v57 = vpack.c.bf16 %v7000_v19, %v6998_v14 }
 0x26c   :  { %v7004_v25 = vpop.eup %7003  ;;  %7029 = vtanh.f32 %v1237_v11  ;;  %v1393_v6 = vpop.f32.mrf.mxu0  ;;  %v1259_v28 = vadd.f32 %v1258_v22, %v8328_v35 }
 0x26d   :  { %v7006_v7 = vpop.eup %7005  ;;  %7031 = vtanh.f32 %v1241_v16  ;;  %v1260_v45 = vpop.f32.mrf.mxu1  ;;  %v1394_v42 = vadd.f32 %v1393_v6, %v8377_v62 }
 0x26e   :  { %v7008_v47 = vpop.eup %7007  ;;  %7033 = vtanh.f32 %v1253_v43  ;;  %v1395_v8 = vpop.f32.mrf.mxu0  ;;  %v1261_v19 = vadd.f32 %v1260_v45, %v8332_v54 }
 0x26f   :  { %v7010_v50 = vpop.eup %7009  ;;  %7035 = vtanh.f32 %v1392_v30  ;;  %v1262_v32 = vpop.f32.mrf.mxu1  ;;  %v1396_v23 = vadd.f32 %v1395_v8, %v8366_v58  ;;  %v1653_v55 = vpack.c.bf16 %v7008_v47, %v7004_v25 }
 0x270   :  { %v7012_v56 = vpop.eup %7011  ;;  %7037 = vtanh.f32 %v1394_v42  ;;  %v1399_v31 = vpop.f32.mrf.mxu0  ;;  %v1652_v61 = vpack.c.bf16 %v7006_v7, %v7010_v50  ;;  %v1263_v26 = vadd.f32 %v1262_v32, %v8328_v35 }
 0x271   :  { %v7014_v59 = vpop.eup %7013  ;;  %7039 = vtanh.f32 %v1396_v23  ;;  %v8453_v44 = vpop.f32.mrf.mxu1  ;;  %2341 = vmatprep.mubr.bf16.mxu0 %v1653_v55  ;;  %v1671_v1 = vpack.c.bf16 %v7002_v20, %v7012_v56  ;;  %v1400_v9 = vadd.f32 %v1399_v31, %v8377_v62 }
 0x272   :  { %v7016_v39 = vpop.eup %7015  ;;  %7041 = vtanh.f32 %v1390_v48  ;;  %v1401_v0 = vpop.f32.mrf.mxu0  ;;  %2189 = vmatmul.mubr.bf16.gmra.mxu1 %v1666_v57  ;;  %2342 = vmatmul.mubr.bf16.gmra.mxu0 %v1652_v61  ;;  %v1267_v57 = vadd.f32 %v8453_v44, %v8332_v54 }
 0x273   :  { %v7018_v34 = vpop.eup %7017  ;;  %7043 = vtanh.f32 %v1249_v49  ;;  %v1268_v46 = vpop.f32.mrf.mxu1  ;;  %v1402_v36 = vadd.f32 %v1401_v0, %v8366_v58  ;;  %2198 = vmatprep.mubr.bf16.mxu1 %v1671_v1  ;;  %v1670_v16 = vpack.c.bf16 %v7016_v39, %v7014_v59 }
 0x274   :  { %v7020_v5 = vpop.eup %7019  ;;  %7045 = vtanh.f32 %v1247_v2  ;;  %v1403_v53 = vpop.f32.mrf.mxu0  ;;  %v1269_v23 = vadd.f32 %v1268_v46, %v8328_v35 }
 0x275   :  { %v7022_v18 = vpop.eup %7021  ;;  %7047 = vtanh.f32 %v1251_v37  ;;  %v1270_v4 = vpop.f32.mrf.mxu1  ;;  %v1404_v40 = vadd.f32 %v1403_v53, %v8377_v62 }
 0x276   :  { %v7024_v60 = vpop.eup %7023  ;;  %7049 = vtanh.f32 %v1263_v26  ;;  %v1405_v52 = vpop.f32.mrf.mxu0  ;;  %v1271_v39 = vadd.f32 %v1270_v4, %v8332_v54 }
 0x277   :  { %v7026_v10 = vpop.eup %7025  ;;  %7051 = vtanh.f32 %v1402_v36  ;;  %v1272_v15 = vpop.f32.mrf.mxu1  ;;  %v1406_v29 = vadd.f32 %v1405_v52, %v8366_v58  ;;  %v1657_v11 = vpack.c.bf16 %v7024_v60, %v7020_v5 }
 0x278   :  { %v7028_v12 = vpop.eup %7027  ;;  %7053 = vtanh.f32 %v1404_v40  ;;  %v1409_v14 = vpop.f32.mrf.mxu0  ;;  %v1656_v33 = vpack.c.bf16 %v7022_v18, %v7026_v10  ;;  %v1273_v22 = vadd.f32 %v1272_v15, %v8328_v35 }
 0x279   :  { %v7030_v17 = vpop.eup %7029  ;;  %7055 = vtanh.f32 %v1406_v29  ;;  %v8464_v43 = vpop.f32.mrf.mxu1  ;;  %2351 = vmatprep.mubr.bf16.mxu0 %v1657_v11  ;;  %v1675_v27 = vpack.c.bf16 %v7018_v34, %v7028_v12  ;;  %v1410_v50 = vadd.f32 %v1409_v14, %v8377_v62 }
 0x27a   :  { %v7032_v20 = vpop.eup %7031  ;;  %7057 = vtanh.f32 %v1400_v9  ;;  %v1411_v30 = vpop.f32.mrf.mxu0  ;;  %2199 = vmatmul.mubr.bf16.gmra.mxu1 %v1670_v16  ;;  %2352 = vmatmul.mubr.bf16.gmra.mxu0 %v1656_v33  ;;  %v1277_v16 = vadd.f32 %v8464_v43, %v8332_v54 }
 0x27b   :  { %v7034_v41 = vpop.eup %7033  ;;  %7059 = vtanh.f32 %v1259_v28  ;;  %v1278_v25 = vpop.f32.mrf.mxu1  ;;  %v1412_v6 = vadd.f32 %v1411_v30, %v8366_v58  ;;  %2208 = vmatprep.mubr.bf16.mxu1 %v1675_v27  ;;  %v1674_v59 = vpack.c.bf16 %v7032_v20, %v7030_v17 }
 0x27c   :  { %v7036_v7 = vpop.eup %7035  ;;  %7061 = vtanh.f32 %v1257_v13  ;;  %v1413_v45 = vpop.f32.mrf.mxu0  ;;  %v1279_v29 = vadd.f32 %v1278_v25, %v8328_v35 }
 0x27d   :  { %v7038_v42 = vpop.eup %7037  ;;  %7063 = vtanh.f32 %v1261_v19  ;;  %v1280_v47 = vpop.f32.mrf.mxu1  ;;  %v1414_v48 = vadd.f32 %v1413_v45, %v8377_v62 }
 0x27e   :  { %v7040_v8 = vpop.eup %7039  ;;  %7065 = vtanh.f32 %v1273_v22  ;;  %v1415_v49 = vpop.f32.mrf.mxu0  ;;  %v1281_v20 = vadd.f32 %v1280_v47, %v8332_v54 }
 0x27f   :  { %v7042_v32 = vpop.eup %7041  ;;  %7067 = vtanh.f32 %v1412_v6  ;;  %v1282_v55 = vpop.f32.mrf.mxu1  ;;  %v1416_v56 = vadd.f32 %v1415_v49, %v8366_v58  ;;  %v1661_v2 = vpack.c.bf16 %v7040_v8, %v7036_v7 }
 0x280   :  { %v7044_v31 = vpop.eup %7043  ;;  %7069 = vtanh.f32 %v1414_v48  ;;  %v1419_v61 = vpop.f32.mrf.mxu0  ;;  %v1660_v37 = vpack.c.bf16 %v7038_v42, %v7042_v32  ;;  %v1283_v46 = vadd.f32 %v1282_v55, %v8328_v35 }
 0x281   :  { %v7046_v1 = vpop.eup %7045  ;;  %7071 = vtanh.f32 %v1416_v56  ;;  %v8475_v26 = vpop.f32.mrf.mxu1  ;;  %2361 = vmatprep.mubr.bf16.mxu0 %v1661_v2  ;;  %v1679_v0 = vpack.c.bf16 %v7034_v41, %v7044_v31  ;;  %v1420_v10 = vadd.f32 %v1419_v61, %v8377_v62 }
 0x282   :  { %v7048_v34 = vpop.eup %7047  ;;  %7073 = vtanh.f32 %v1410_v50  ;;  %v1421_v36 = vpop.f32.mrf.mxu0  ;;  %2209 = vmatmul.mubr.bf16.gmra.mxu1 %v1674_v59  ;;  %2362 = vmatmul.mubr.bf16.gmra.mxu0 %v1660_v37  ;;  %v1287_v59 = vadd.f32 %v8475_v26, %v8332_v54 }
 0x283   :  { %v7050_v44 = vpop.eup %7049  ;;  %7075 = vtanh.f32 %v1269_v23  ;;  %v1288_v5 = vpop.f32.mrf.mxu1  ;;  %v1422_v53 = vadd.f32 %v1421_v36, %v8366_v58  ;;  %2218 = vmatprep.mubr.bf16.mxu1 %v1679_v0  ;;  %v1678_v17 = vpack.c.bf16 %v7048_v34, %v7046_v1 }
 0x284   :  { %v7052_v18 = vpop.eup %7051  ;;  %7077 = vtanh.f32 %v1267_v57  ;;  %v1423_v4 = vpop.f32.mrf.mxu0  ;;  %v1289_v56 = vadd.f32 %v1288_v5, %v8328_v35 }
 0x285   :  { %v7054_v40 = vpop.eup %7053  ;;  %7079 = vtanh.f32 %v1271_v39  ;;  %v1290_v60 = vpop.f32.mrf.mxu1  ;;  %v1424_v9 = vadd.f32 %v1423_v4, %v8377_v62 }
 0x286   :  { %v7056_v52 = vpop.eup %7055  ;;  %7081 = vtanh.f32 %v1283_v46  ;;  %v1425_v28 = vpop.f32.mrf.mxu0  ;;  %v1291_v34 = vadd.f32 %v1290_v60, %v8332_v54 }
 0x287   :  { %v7058_v15 = vpop.eup %7057  ;;  %7083 = vtanh.f32 %v1422_v53  ;;  %v1292_v11 = vpop.f32.mrf.mxu1  ;;  %v1426_v12 = vadd.f32 %v1425_v28, %v8366_v58  ;;  %v1665_v13 = vpack.c.bf16 %v7056_v52, %v7052_v18 }
 0x288   :  { %v7060_v14 = vpop.eup %7059  ;;  %7085 = vtanh.f32 %v1424_v9  ;;  %v1429_v33 = vpop.f32.mrf.mxu0  ;;  %v1664_v19 = vpack.c.bf16 %v7054_v40, %v7058_v15  ;;  %v1293_v25 = vadd.f32 %v1292_v11, %v8328_v35  ;;  %v6811_v40 = vld [vmem:[%s9740_s8 + $0x50] sm:$0xff]  }
 0x289   :  { %v7062_v27 = vpop.eup %7061  ;;  %7087 = vtanh.f32 %v1426_v12  ;;  %v8486_v22 = vpop.f32.mrf.mxu1  ;;  %2371 = vmatprep.mubr.bf16.mxu0 %v1665_v13  ;;  %v1683_v30 = vpack.c.bf16 %v7050_v44, %v7060_v14  ;;  %v1430_v32 = vadd.f32 %v1429_v33, %v8377_v62  ;;  %6527 = vmatprep.subr.bf16.mxu1 %v6811_v40  ;;  %v6812_v15 = vld [vmem:[%s9740_s8 + $0x10] sm:$0xff]  }
 0x28a   :  { %v7064_v41 = vpop.eup %7063  ;;  %7089 = vtanh.f32 %v1420_v10  ;;  %v1431_v6 = vpop.f32.mrf.mxu0  ;;  %2219 = vmatmul.mubr.bf16.gmra.mxu1 %v1678_v17  ;;  %2372 = vmatmul.mubr.bf16.gmra.mxu0 %v1664_v19 }
 0x28b   :  { %v7066_v43 = vpop.eup %7065  ;;  %7091 = vtanh.f32 %v1279_v29  ;;  %v1298_v7 = vpop.f32.mrf.mxu1  ;;  %v1432_v45 = vadd.f32 %v1431_v6, %v8366_v58  ;;  %2228 = vmatprep.mubr.bf16.mxu1 %v1683_v30  ;;  %v1682_v1 = vpack.c.bf16 %v7064_v41, %v7062_v27  ;;  %6528 = vmatpush3.bf16.msra.mxu1 %v6812_v15  ;;  %v1297_v27 = vadd.f32 %v8486_v22, %v8332_v54 }
 0x28c   :  { %v7068_v42 = vpop.eup %7067  ;;  %7093 = vtanh.f32 %v1277_v16  ;;  %v1433_v47 = vpop.f32.mrf.mxu0  ;;  %v1299_v14 = vadd.f32 %v1298_v7, %v8328_v35 }
 0x28d   :  { %v7070_v48 = vpop.eup %7069  ;;  %7095 = vtanh.f32 %v1281_v20  ;;  %v8490_v8 = vpop.f32.mrf.mxu1  ;;  %v1434_v50 = vadd.f32 %v1433_v47, %v8377_v62 }
 0x28e   :  { %v7072_v49 = vpop.eup %7071  ;;  %7097 = vtanh.f32 %v1293_v25  ;;  %v1435_v23 = vpop.f32.mrf.mxu0  ;;  %v1301_v6 = vadd.f32 %v8490_v8, %v8332_v54 }
 0x28f   :  { %v7074_v55 = vpop.eup %7073  ;;  %7099 = vtanh.f32 %v1432_v45  ;;  %v1302_v2 = vpop.f32.mrf.mxu1  ;;  %v1436_v31 = vadd.f32 %v1435_v23, %v8366_v58  ;;  %v1669_v57 = vpack.c.bf16 %v7072_v49, %v7068_v42 }
 0x290   :  { %v7076_v61 = vpop.eup %7075  ;;  %7101 = vtanh.f32 %v1434_v50  ;;  %v1439_v37 = vpop.f32.mrf.mxu0  ;;  %v1668_v39 = vpack.c.bf16 %v7070_v48, %v7074_v55  ;;  %v1303_v5 = vadd.f32 %v1302_v2, %v8328_v35 }
 0x291   :  { %v7078_v0 = vpop.eup %7077  ;;  %7103 = vtanh.f32 %v1436_v31  ;;  %v8499_v46 = vpop.f32.mrf.mxu1  ;;  %2381 = vmatprep.mubr.bf16.mxu0 %v1669_v57  ;;  %v1687_v36 = vpack.c.bf16 %v7066_v43, %v7076_v61  ;;  %v1440_v11 = vadd.f32 %v1439_v37, %v8377_v62 }
 0x292   :  { %v7080_v44 = vpop.eup %7079  ;;  %7105 = vtanh.f32 %v1430_v32  ;;  %v1441_v53 = vpop.f32.mrf.mxu0  ;;  %2229 = vmatmul.mubr.bf16.gmra.mxu1 %v1682_v1  ;;  %2382 = vmatmul.mubr.bf16.gmra.mxu0 %v1668_v39 }
 0x293   :  { %v7082_v26 = vpop.eup %7081  ;;  %7107 = vtanh.f32 %v1289_v56  ;;  %v1308_v18 = vpop.f32.mrf.mxu1  ;;  %v1442_v4 = vadd.f32 %v1441_v53, %v8366_v58  ;;  %2238 = vmatprep.mubr.bf16.mxu1 %v1687_v36  ;;  %v1686_v30 = vpack.c.bf16 %v7080_v44, %v7078_v0  ;;  %v1307_v0 = vadd.f32 %v8499_v46, %v8332_v54 }
 0x294   :  { %v7084_v60 = vpop.eup %7083  ;;  %7109 = vtanh.f32 %v1287_v59  ;;  %v1443_v9 = vpop.f32.mrf.mxu0  ;;  %v1309_v61 = vadd.f32 %v1308_v18, %v8328_v35 }
 0x295   :  { %v7086_v52 = vpop.eup %7085  ;;  %7111 = vtanh.f32 %v1291_v34  ;;  %v1310_v10 = vpop.f32.mrf.mxu1  ;;  %v1444_v28 = vadd.f32 %v1443_v9, %v8377_v62  ;;  %v6813_v9 = vld [vmem:[%s9740_s8 + $0x48] sm:$0xff]  }
 0x296   :  { %v7088_v29 = vpop.eup %7087  ;;  %7113 = vtanh.f32 %v1303_v5  ;;  %v1445_v12 = vpop.f32.mrf.mxu0  ;;  %v1311_v53 = vadd.f32 %v1310_v10, %v8332_v54  ;;  %6529 = vmatprep.subr.bf16.mxu1 %v6813_v9 }
 0x297   :  { %v7090_v13 = vpop.eup %7089  ;;  %7115 = vtanh.f32 %v1442_v4  ;;  %v1312_v16 = vpop.f32.mrf.mxu1  ;;  %v1446_v33 = vadd.f32 %v1445_v12, %v8366_v58  ;;  %v1673_v17 = vpack.c.bf16 %v7088_v29, %v7084_v60  ;;  %v6814_v29 = vld [vmem:[%s9740_s8 + $0x8] sm:$0xff]  }
 0x298   :  { %v7092_v19 = vpop.eup %7091  ;;  %7117 = vtanh.f32 %v1444_v28  ;;  %v1449_v20 = vpop.f32.mrf.mxu0  ;;  %v1672_v41 = vpack.c.bf16 %v7086_v52, %v7090_v13  ;;  %v1313_v42 = vadd.f32 %v1312_v16, %v8328_v35  ;;  %6530 = vmatpush3.bf16.msra.mxu1 %v6814_v29 }
 0x299   :  { %v7094_v25 = vpop.eup %7093  ;;  %7119 = vtanh.f32 %v1446_v33  ;;  %v8517_v43 = vpop.f32.mrf.mxu1  ;;  %2391 = vmatprep.mubr.bf16.mxu0 %v1673_v17  ;;  %v1691_v7 = vpack.c.bf16 %v7082_v26, %v7092_v19  ;;  %v1450_v2 = vadd.f32 %v1449_v20, %v8377_v62 }
 0x29a   :  { %v7096_v45 = vpop.eup %7095  ;;  %7121 = vtanh.f32 %v1440_v11  ;;  %v1451_v47 = vpop.f32.mrf.mxu0  ;;  %2239 = vmatmul.mubr.bf16.gmra.mxu1 %v1686_v30  ;;  %2392 = vmatmul.mubr.bf16.gmra.mxu0 %v1672_v41 }
 0x29b   :  { %v7098_v22 = vpop.eup %7097  ;;  %7123 = vtanh.f32 %v1299_v14  ;;  %v1318_v48 = vpop.f32.mrf.mxu1  ;;  %v1452_v50 = vadd.f32 %v1451_v47, %v8366_v58  ;;  %2248 = vmatprep.mubr.bf16.mxu1 %v1691_v7  ;;  %v1690_v36 = vpack.c.bf16 %v7096_v45, %v7094_v25  ;;  %v1317_v25 = vadd.f32 %v8517_v43, %v8332_v54 }
 0x29c   :  { %v7100_v49 = vpop.eup %7099  ;;  %7125 = vtanh.f32 %v1297_v27  ;;  %v1453_v8 = vpop.f32.mrf.mxu0  ;;  %v1319_v16 = vadd.f32 %v1318_v48, %v8328_v35 }
 0x29d   :  { %v7102_v32 = vpop.eup %7101  ;;  %7127 = vtanh.f32 %v1301_v6  ;;  %v8521_v23 = vpop.f32.mrf.mxu1  ;;  %v1454_v55 = vadd.f32 %v1453_v8, %v8377_v62 }
 0x29e   :  { %v7104_v56 = vpop.eup %7103  ;;  %7129 = vtanh.f32 %v1313_v42  ;;  %v1455_v31 = vpop.f32.mrf.mxu0 }
 0x29f   :  { %v7106_v57 = vpop.eup %7105  ;;  %7131 = vtanh.f32 %v1452_v50  ;;  %v1322_v59 = vpop.f32.mrf.mxu1  ;;  %v1456_v37 = vadd.f32 %v1455_v31, %v8366_v58  ;;  %v1677_v1 = vpack.c.bf16 %v7104_v56, %v7100_v49 }
 0x2a0   :  { %v7108_v39 = vpop.eup %7107  ;;  %7133 = vtanh.f32 %v1454_v55  ;;  %v1459_v34 = vpop.f32.mrf.mxu0  ;;  %v1676_v44 = vpack.c.bf16 %v7102_v32, %v7106_v57  ;;  %v1323_v4 = vadd.f32 %v1322_v59, %v8328_v35  ;;  %v1321_v35 = vadd.f32 %v8521_v23, %v8332_v54 }
 0x2a1   :  { %v7110_v5 = vpop.eup %7109  ;;  %7135 = vtanh.f32 %v1456_v37  ;;  %2401 = vmatprep.mubr.bf16.mxu0 %v1677_v1  ;;  %v1695_v26 = vpack.c.bf16 %v7098_v22, %v7108_v39  ;;  %v1460_v12 = vadd.f32 %v1459_v34, %v8377_v62 }
 0x2a2   :  { %v7112_v18 = vpop.eup %7111  ;;  %7137 = vtanh.f32 %v1450_v2  ;;  %v1461_v40 = vpop.f32.mrf.mxu0  ;;  %2249 = vmatmul.mubr.bf16.gmra.mxu1 %v1690_v36  ;;  %2402 = vmatmul.mubr.bf16.gmra.mxu0 %v1676_v44 }
 0x2a3   :  { %v7114_v60 = vpop.eup %7113  ;;  %7139 = vtanh.f32 %v1309_v61  ;;  %v1462_v46 = vadd.f32 %v1461_v40, %v8366_v58  ;;  %2258 = vmatprep.mubr.bf16.mxu1 %v1695_v26  ;;  %v1694_v20 = vpack.c.bf16 %v7112_v18, %v7110_v5 }
 0x2a4   :  { %v7116_v52 = vpop.eup %7115  ;;  %7141 = vtanh.f32 %v1307_v0  ;;  %v1463_v10 = vpop.f32.mrf.mxu0 }
 0x2a5   :  { %v7118_v28 = vpop.eup %7117  ;;  %7143 = vtanh.f32 %v1311_v53  ;;  %v1464_v15 = vadd.f32 %v1463_v10, %v8377_v62 }
 0x2a6   :  { %v7120_v11 = vpop.eup %7119  ;;  %7145 = vtanh.f32 %v1323_v4  ;;  %v1465_v13 = vpop.f32.mrf.mxu0 }
 0x2a7   :  { %v7122_v14 = vpop.eup %7121  ;;  %7147 = vtanh.f32 %v1462_v46  ;;  %v1466_v33 = vadd.f32 %v1465_v13, %v8366_v58  ;;  %v1681_v17 = vpack.c.bf16 %v7120_v11, %v7116_v52 }
 0x2a8   :  { %v7124_v19 = vpop.eup %7123  ;;  %7149 = vtanh.f32 %v1464_v15  ;;  %v1469_v27 = vpop.f32.mrf.mxu0  ;;  %v1680_v30 = vpack.c.bf16 %v7118_v28, %v7122_v14 }
 0x2a9   :  { %v7126_v41 = vpop.eup %7125  ;;  %7151 = vtanh.f32 %v1466_v33  ;;  %2411 = vmatprep.mubr.bf16.mxu0 %v1681_v17  ;;  %v1699_v6 = vpack.c.bf16 %v7114_v60, %v7124_v19  ;;  %v1470_v8 = vadd.f32 %v1469_v27, %v8377_v62 }
 0x2aa   :  { %v7128_v7 = vpop.eup %7127  ;;  %7153 = vtanh.f32 %v1460_v12  ;;  %v1471_v45 = vpop.f32.mrf.mxu0  ;;  %2259 = vmatmul.mubr.bf16.gmra.mxu1 %v1694_v20  ;;  %2412 = vmatmul.mubr.bf16.gmra.mxu0 %v1680_v30 }
 0x2ab   :  { %v7130_v42 = vpop.eup %7129  ;;  %7155 = vtanh.f32 %v1319_v16  ;;  %v1472_v47 = vadd.f32 %v1471_v45, %v8366_v58  ;;  %2268 = vmatprep.mubr.bf16.mxu1 %v1699_v6  ;;  %v1698_v31 = vpack.c.bf16 %v7128_v7, %v7126_v41  ;;  %v6816_v6 = vld [vmem:[%s9740_s8] sm:$0xff]  }
 0x2ac   :  { %v7132_v22 = vpop.eup %7131  ;;  %v1473_v48 = vpop.f32.mrf.mxu0  ;;  %7157 = vtanh.f32 %v1317_v25  ;;  %v6815_v25 = vld [vmem:[%s9740_s8 + $0x40] sm:$0xff]  }
 0x2ad   :  { %v7134_v50 = vpop.eup %7133  ;;  %v1474_v43 = vadd.f32 %v1473_v48, %v8377_v62  ;;  %7159 = vtanh.f32 %v1321_v35  ;;  %6531 = vmatprep.subr.bf16.mxu1 %v6815_v25  ;;  %v1774_v25 = vld [vmem:[%s9739_s7] sm:$0x3] }
 0x2ae   :  { %v7136_v49 = vpop.eup %7135  ;;  %v1475_v54 = vpop.f32.mrf.mxu0  ;;  %7161 = vtanh.f32 %v1472_v47  ;;  %6532 = vmatpush3.bf16.msra.mxu1 %v6816_v6 }
 0x2af   :  { %v7138_v32 = vpop.eup %7137  ;;  %v1476_v23 = vadd.f32 %v1475_v54, %v8366_v58  ;;  %v1685_v55 = vpack.c.bf16 %v7136_v49, %v7132_v22  ;;  %7163 = vtanh.f32 %v1474_v43 }
 0x2b0   :  { %v7140_v56 = vpop.eup %7139  ;;  %v1479_v2 = vpop.f32.mrf.mxu0  ;;  %v1684_v57 = vpack.c.bf16 %v7134_v50, %v7138_v32 }
 0x2b1   :  { %v7142_v61 = vpop.eup %7141  ;;  %7165 = vtanh.f32 %v1476_v23  ;;  %2421 = vmatprep.mubr.bf16.mxu0 %v1685_v55  ;;  %v1703_v59 = vpack.c.bf16 %v7130_v42, %v7140_v56  ;;  %v1480_v26 = vadd.f32 %v1479_v2, %v8377_v62 }
 0x2b2   :  { %v7144_v37 = vpop.eup %7143  ;;  %7167 = vtanh.f32 %v1470_v8  ;;  %v1481_v1 = vpop.f32.mrf.mxu0  ;;  %2269 = vmatmul.mubr.bf16.gmra.mxu1 %v1698_v31  ;;  %2422 = vmatmul.mubr.bf16.gmra.mxu0 %v1684_v57 }
 0x2b3   :  { %v7146_v39 = vpop.eup %7145  ;;  %v1482_v0 = vadd.f32 %v1481_v1, %v8366_v58  ;;  %2278 = vmatprep.mubr.bf16.mxu1 %v1703_v59  ;;  %v1702_v52 = vpack.c.bf16 %v7144_v37, %v7142_v61 }
 0x2b4   :  { %v7148_v34 = vpop.eup %7147  ;;  %v1483_v36 = vpop.f32.mrf.mxu0 }
 0x2b5   :  { %v7150_v44 = vpop.eup %7149  ;;  %v1484_v5 = vadd.f32 %v1483_v36, %v8377_v62  ;;  %7169 = vtanh.f32 %v1482_v0 }
 0x2b6   :  { %v7152_v53 = vpop.eup %7151  ;;  %v1485_v18 = vpop.f32.mrf.mxu0 }
 0x2b7   :  { %v7154_v4 = vpop.eup %7153  ;;  %v1486_v40 = vadd.f32 %v1485_v18, %v8366_v58  ;;  %v1689_v60 = vpack.c.bf16 %v7152_v53, %v7148_v34  ;;  %7171 = vtanh.f32 %v1484_v5 }
 0x2b8   :  { %v7156_v46 = vpop.eup %7155  ;;  %v1489_v9 = vpop.f32.mrf.mxu0  ;;  %v1688_v10 = vpack.c.bf16 %v7150_v44, %v7154_v4 }
 0x2b9   :  { %7173 = vtanh.f32 %v1486_v40  ;;  %2431 = vmatprep.mubr.bf16.mxu0 %v1689_v60  ;;  %v1707_v28 = vpack.c.bf16 %v7146_v39, %v7156_v46  ;;  %v7158_v15 = vpop.eup %7157  ;;  %v1490_v19 = vadd.f32 %v1489_v9, %v8377_v62 }
 0x2ba   :  { %7175 = vtanh.f32 %v1480_v26  ;;  %v1491_v29 = vpop.f32.mrf.mxu0  ;;  %2279 = vmatmul.mubr.bf16.gmra.mxu1 %v1702_v52  ;;  %2432 = vmatmul.mubr.bf16.gmra.mxu0 %v1688_v10  ;;  %v7160_v11 = vpop.eup %7159 }
 0x2bb   :  { %v1492_v12 = vadd.f32 %v1491_v29, %v8366_v58  ;;  %2288 = vmatprep.mubr.bf16.mxu1 %v1707_v28  ;;  %v7162_v13 = vpop.eup %7161  ;;  %v1706_v35 = vpack.c.bf16 %v7160_v11, %v7158_v15 }
 0x2bc   :  { %v1493_v14 = vpop.f32.mrf.mxu0  ;;  %v7164_v16 = vpop.eup %7163 }
 0x2bd   :  { %v1494_v33 = vadd.f32 %v1493_v14, %v8377_v62  ;;  %7177 = vtanh.f32 %v1492_v12 }
 0x2be   :  { %v7166_v17 = vpop.eup %7165  ;;  %v1495_v27 = vpop.f32.mrf.mxu0 }
 0x2bf   :  { %v7168_v20 = vpop.eup %7167  ;;  %v1496_v30 = vadd.f32 %v1495_v27, %v8366_v58  ;;  %v1693_v41 = vpack.c.bf16 %v7166_v17, %v7162_v13  ;;  %7179 = vtanh.f32 %v1494_v33 }
 0x2c0   :  { %v1499_v7 = vpop.f32.mrf.mxu0  ;;  %v1692_v45 = vpack.c.bf16 %v7164_v16, %v7168_v20 }
 0x2c1   :  { %7181 = vtanh.f32 %v1496_v30  ;;  %2441 = vmatprep.mubr.bf16.mxu0 %v1693_v41  ;;  %v1500_v8 = vadd.f32 %v1499_v7, %v8377_v62  ;;  %v8582_v7 = vrot.slane %v1774_v25, %v8316_v51 }
 0x2c2   :  { %7183 = vtanh.f32 %v1490_v19  ;;  %v1501_v42 = vpop.f32.mrf.mxu0  ;;  %2289 = vmatmul.mubr.bf16.gmra.mxu1 %v1706_v35  ;;  %2442 = vmatmul.mubr.bf16.gmra.mxu0 %v1692_v45  ;;  %v7170_v22 = vpop.eup %7169  ;;  %v8587_v45 = vrot.slane %v1774_v25, %v8324_v3 }
 0x2c3   :  { %v1502_v47 = vadd.f32 %v1501_v42, %v8366_v58 }
 0x2c4   :  { %v1503_v48 = vpop.f32.mrf.mxu0  ;;  %v7172_v50 = vpop.eup %7171 }
 0x2c5   :  { %v1504_v43 = vadd.f32 %v1503_v48, %v8377_v62  ;;  %7185 = vtanh.f32 %v1502_v47 }
 0x2c6   :  { %v7174_v49 = vpop.eup %7173  ;;  %v1505_v54 = vpop.f32.mrf.mxu0 }
 0x2c7   :  { %v7176_v32 = vpop.eup %7175  ;;  %v1506_v23 = vadd.f32 %v1505_v54, %v8366_v58  ;;  %v1697_v55 = vpack.c.bf16 %v7174_v49, %v7170_v22  ;;  %7187 = vtanh.f32 %v1504_v43 }
 0x2c8   :  { %v1509_v56 = vpop.f32.mrf.mxu0  ;;  %v1696_v2 = vpack.c.bf16 %v7172_v50, %v7176_v32 }
 0x2c9   :  { %7189 = vtanh.f32 %v1506_v23  ;;  %2451 = vmatprep.mubr.bf16.mxu0 %v1697_v55  ;;  %v1510_v0 = vadd.f32 %v1509_v56, %v8377_v62 }
 0x2ca   :  { %7191 = vtanh.f32 %v1500_v8  ;;  %v1511_v31 = vpop.f32.mrf.mxu0  ;;  %2452 = vmatmul.mubr.bf16.gmra.mxu0 %v1696_v2  ;;  %v7178_v61 = vpop.eup %7177 }
 0x2cb   :  { %v1512_v57 = vadd.f32 %v1511_v31, %v8366_v58 }
 0x2cc   :  { %v1513_v59 = vpop.f32.mrf.mxu0  ;;  %v7180_v37 = vpop.eup %7179 }
 0x2cd   :  { %v1514_v1 = vadd.f32 %v1513_v59, %v8377_v62  ;;  %7193 = vtanh.f32 %v1512_v57 }
 0x2ce   :  { %v7182_v39 = vpop.eup %7181  ;;  %v1515_v34 = vpop.f32.mrf.mxu0 }
 0x2cf   :  { %v7184_v36 = vpop.eup %7183  ;;  %v1516_v44 = vadd.f32 %v1515_v34, %v8366_v58  ;;  %v1701_v5 = vpack.c.bf16 %v7182_v39, %v7178_v61  ;;  %7195 = vtanh.f32 %v1514_v1 }
 0x2d0   :  { %v1700_v53 = vpack.c.bf16 %v7180_v37, %v7184_v36 }
 0x2d1   :  { %7197 = vtanh.f32 %v1516_v44  ;;  %2461 = vmatprep.mubr.bf16.mxu0 %v1701_v5 }
 0x2d2   :  { %7199 = vtanh.f32 %v1510_v0  ;;  %2462 = vmatmul.mubr.bf16.gmra.mxu0 %v1700_v53  ;;  %v7186_v26 = vpop.eup %7185 }
 0x2d4   :  { %v7188_v18 = vpop.eup %7187 }
 0x2d6   :  { %v7190_v4 = vpop.eup %7189 }
 0x2d7   :  { %v7192_v40 = vpop.eup %7191  ;;  %v1705_v60 = vpack.c.bf16 %v7190_v4, %v7186_v26 }
 0x2d8   :  { %v1704_v46 = vpack.c.bf16 %v7188_v18, %v7192_v40 }
 0x2d9   :  { %2471 = vmatprep.mubr.bf16.mxu0 %v1705_v60 }
 0x2da   :  { %2472 = vmatmul.mubr.bf16.gmra.mxu0 %v1704_v46  ;;  %v7194_v62 = vpop.eup %7193 }
 0x2dc   :  { %v7196_v9 = vpop.eup %7195 }
 0x2de   :  { %v7198_v52 = vpop.eup %7197 }
 0x2df   :  { %v7200_v10 = vpop.eup %7199  ;;  %v1709_v58 = vpack.c.bf16 %v7198_v52, %v7194_v62 }
 0x2e0   :  { %v1708_v28 = vpack.c.bf16 %v7196_v9, %v7200_v10 }
 0x2e1   :  { %2481 = vmatprep.mubr.bf16.mxu0 %v1709_v58  ;;  %v3019_v58 = vld [vmem:[#allocation2] sm:$0x1] }
 0x2e2   :  { %2482 = vmatmul.mubr.bf16.gmra.mxu0 %v1708_v28  ;;  %3022 = vperm.xlu1 %6673, %v3019_v58  }
 0x30a   :  { %v2140_v15 = vpop.f32.mrf.mxu1 }
 0x30b   :  { %v2141_v8 = vadd.f32 %v2140_v15, %v8587_v45 }
 0x30c   :  { %v2142_v29 = vpop.f32.mrf.mxu1 }
 0x30d   :  { %v2143_v22 = vadd.f32 %v2142_v29, %v8582_v7 }
 0x30e   :  { %v2144_v11 = vpop.f32.mrf.mxu1 }
 0x30f   :  { %v2145_v43 = vadd.f32 %v2144_v11, %v8587_v45 }
 0x310   :  { %v2146_v12 = vpop.f32.mrf.mxu1 }
 0x311   :  { %v2147_v23 = vadd.f32 %v2146_v12, %v8582_v7 }
 0x312   :  { %v2150_v13 = vpop.f32.mrf.mxu1 }
 0x313   :  { %v2151_v36 = vadd.f32 %v2150_v13, %v8587_v45 }
 0x314   :  { %v2152_v14 = vpop.f32.mrf.mxu1 }
 0x315   :  { %v2153_v37 = vadd.f32 %v2152_v14, %v8582_v7 }
 0x316   :  { %v2154_v16 = vpop.f32.mrf.mxu1 }
 0x317   :  { %v2155_v0 = vadd.f32 %v2154_v16, %v8587_v45 }
 0x318   :  { %v2156_v33 = vpop.f32.mrf.mxu1 }
 0x319   :  { %v2157_v53 = vadd.f32 %v2156_v33, %v8582_v7 }
 0x31a   :  { %v2160_v17 = vpop.f32.mrf.mxu1 }
 0x31b   :  { %v2161_v11 = vadd.f32 %v2160_v17, %v8587_v45 }
 0x31c   :  { %v2162_v19 = vpop.f32.mrf.mxu1 }
 0x31d   :  { %v2163_v9 = vadd.f32 %v2162_v19, %v8582_v7 }
 0x31e   :  { %v2164_v27 = vpop.f32.mrf.mxu1 }
 0x31f   :  { %v2165_v28 = vadd.f32 %v2164_v27, %v8587_v45 }
 0x320   :  { %v2166_v20 = vpop.f32.mrf.mxu1 }
 0x321   :  { %v2167_v16 = vadd.f32 %v2166_v20, %v8582_v7 }
 0x322   :  { %v8572_v30 = vpop.f32.mrf.mxu1 }
 0x324   :  { %v8574_v41 = vpop.f32.mrf.mxu1 }
 0x326   :  { %v8579_v6 = vpop.f32.mrf.mxu1 }
 0x328   :  { %v8584_v35 = vpop.f32.mrf.mxu1 }
 0x32a   :  { %v8589_v42 = vpop.f32.mrf.mxu1  ;;  %v2333_v47 = vpop.f32.mrf.mxu0 }
 0x32b   :  { %v2334_v56 = vadd.f32 %v2333_v47, %v2141_v8 }
 0x32c   :  { %v8592_v48 = vpop.f32.mrf.mxu1  ;;  %v2335_v50 = vpop.f32.mrf.mxu0 }
 0x32d   :  { %v2336_v49 = vadd.f32 %v2335_v50, %v2143_v22 }
 0x32e   :  { %v8596_v54 = vpop.f32.mrf.mxu1  ;;  %v2337_v32 = vpop.f32.mrf.mxu0 }
 0x32f   :  { %v2338_v55 = vadd.f32 %v2337_v32, %v2145_v43  ;;  %7201 = vtanh.f32 %v2336_v49  ;;  %v2173_v32 = vadd.f32 %v8574_v41, %v8582_v7  ;;  %v2177_v41 = vadd.f32 %v8584_v35, %v8582_v7 }
 0x330   :  { %v8599_v2 = vpop.f32.mrf.mxu1  ;;  %v2339_v31 = vpop.f32.mrf.mxu0 }
 0x331   :  { %v2340_v57 = vadd.f32 %v2339_v31, %v2147_v23  ;;  %7203 = vtanh.f32 %v2338_v55  ;;  %v2175_v55 = vadd.f32 %v8579_v6, %v8587_v45 }
 0x332   :  { %v8601_v61 = vpop.f32.mrf.mxu1  ;;  %v2343_v59 = vpop.f32.mrf.mxu0 }
 0x333   :  { %7205 = vtanh.f32 %v2340_v57  ;;  %v2344_v18 = vadd.f32 %v2343_v59, %v2151_v36  ;;  %v2171_v57 = vadd.f32 %v8572_v30, %v8587_v45 }
 0x334   :  { %7207 = vtanh.f32 %v2334_v56  ;;  %v8604_v1 = vpop.f32.mrf.mxu1  ;;  %v2345_v39 = vpop.f32.mrf.mxu0 }
 0x335   :  { %v2346_v34 = vadd.f32 %v2345_v39, %v2153_v37 }
 0x336   :  { %v8608_v44 = vpop.f32.mrf.mxu1  ;;  %v2347_v5 = vpop.f32.mrf.mxu0 }
 0x337   :  { %v2348_v26 = vadd.f32 %v2347_v5, %v2155_v0  ;;  %7209 = vtanh.f32 %v2346_v34 }
 0x338   :  { %v8611_v4 = vpop.f32.mrf.mxu1  ;;  %v2349_v40 = vpop.f32.mrf.mxu0 }
 0x339   :  { %v2350_v60 = vadd.f32 %v2349_v40, %v2157_v53  ;;  %7211 = vtanh.f32 %v2348_v26 }
 0x33a   :  { %v8613_v46 = vpop.f32.mrf.mxu1  ;;  %v2353_v62 = vpop.f32.mrf.mxu0 }
 0x33b   :  { %7213 = vtanh.f32 %v2350_v60  ;;  %v2354_v25 = vadd.f32 %v2353_v62, %v2161_v11  ;;  %v2183_v62 = vadd.f32 %v8592_v48, %v8582_v7  ;;  %v2187_v48 = vadd.f32 %v8599_v2, %v8582_v7 }
 0x33c   :  { %7215 = vtanh.f32 %v2344_v18  ;;  %v8616_v52 = vpop.f32.mrf.mxu1  ;;  %v2355_v10 = vpop.f32.mrf.mxu0 }
 0x33d   :  { %v2356_v15 = vadd.f32 %v2355_v10, %v2163_v9  ;;  %v7202_v29 = vpop.eup %7201  ;;  %v2185_v10 = vadd.f32 %v8596_v54, %v8587_v45 }
 0x33e   :  { %v8620_v12 = vpop.f32.mrf.mxu1  ;;  %v2357_v13 = vpop.f32.mrf.mxu0 }
 0x33f   :  { %v7204_v14 = vpop.eup %7203  ;;  %v2358_v33 = vadd.f32 %v2357_v13, %v2165_v28  ;;  %7217 = vtanh.f32 %v2356_v15  ;;  %v2181_v15 = vadd.f32 %v8589_v42, %v8587_v45 }
 0x340   :  { %v7206_v19 = vpop.eup %7205  ;;  %v8623_v47 = vpop.f32.mrf.mxu1 }
 0x341   :  { %v2359_v22 = vpop.f32.mrf.mxu0  ;;  %v7208_v50 = vpop.eup %7207  ;;  %v2557_v43 = vpack.c.bf16 %v7206_v19, %v7202_v29  ;;  %7219 = vtanh.f32 %v2358_v33 }
 0x342   :  { %v2360_v27 = vadd.f32 %v2359_v22, %v2167_v16  ;;  %v2556_v49 = vpack.c.bf16 %v7204_v14, %v7208_v50  ;;  %v8625_v8 = vpop.f32.mrf.mxu1 }
 0x343   :  { %v2363_v17 = vpop.f32.mrf.mxu0  ;;  %2755 = vmatprep.mubr.bf16.mxu1 %v2557_v43 }
 0x344   :  { %7221 = vtanh.f32 %v2360_v27  ;;  %v8629_v20 = vpop.f32.mrf.mxu1  ;;  %2756 = vmatmul.mubr.bf16.vlgmr.msra.gmra.mxu1 %v2556_v49  ;;  %v7210_v31 = vpop.eup %7209  ;;  %v2364_v36 = vadd.f32 %v2363_v17, %v2171_v57  ;;  %v2193_v49 = vadd.f32 %v8604_v1, %v8582_v7  ;;  %v2197_v1 = vadd.f32 %v8611_v4, %v8582_v7 }
 0x345   :  { %7223 = vtanh.f32 %v2354_v25  ;;  %v2365_v23 = vpop.f32.mrf.mxu0 }
 0x346   :  { %v2366_v56 = vadd.f32 %v2365_v23, %v2173_v32  ;;  %v8635_v59 = vpop.f32.mrf.mxu1  ;;  %v7212_v39 = vpop.eup %7211  ;;  %v2195_v32 = vadd.f32 %v8608_v44, %v8587_v45 }
 0x347   :  { %v2367_v37 = vpop.f32.mrf.mxu0 }
 0x348   :  { %v2368_v0 = vadd.f32 %v2367_v37, %v2175_v55  ;;  %v7214_v34 = vpop.eup %7213  ;;  %v8639_v5 = vpop.f32.mrf.mxu1  ;;  %7225 = vtanh.f32 %v2366_v56  ;;  %v2191_v56 = vadd.f32 %v8601_v61, %v8587_v45 }
 0x349   :  { %v2369_v53 = vpop.f32.mrf.mxu0  ;;  %v7216_v26 = vpop.eup %7215  ;;  %v2559_v18 = vpack.c.bf16 %v7214_v34, %v7210_v31 }
 0x34a   :  { %v2370_v6 = vadd.f32 %v2369_v53, %v2177_v41  ;;  %7227 = vtanh.f32 %v2368_v0  ;;  %v8641_v40 = vpop.f32.mrf.mxu1  ;;  %v2558_v60 = vpack.c.bf16 %v7212_v39, %v7216_v26 }
 0x34b   :  { %v2373_v30 = vpop.f32.mrf.mxu0  ;;  %2763 = vmatprep.mubr.bf16.mxu1 %v2559_v18 }
 0x34c   :  { %7229 = vtanh.f32 %v2370_v6  ;;  %v8645_v35 = vpop.f32.mrf.mxu1  ;;  %2764 = vmatmul.mubr.bf16.gmra.mxu1 %v2558_v60  ;;  %v7218_v28 = vpop.eup %7217  ;;  %v2374_v33 = vadd.f32 %v2373_v30, %v2181_v15  ;;  %v2203_v30 = vadd.f32 %v8616_v52, %v8582_v7  ;;  %v2207_v52 = vadd.f32 %v8623_v47, %v8582_v7 }
 0x34d   :  { %7231 = vtanh.f32 %v2364_v36  ;;  %v2375_v9 = vpop.f32.mrf.mxu0 }
 0x34e   :  { %v2376_v58 = vadd.f32 %v2375_v9, %v2183_v62  ;;  %v8651_v29 = vpop.f32.mrf.mxu1  ;;  %v7220_v13 = vpop.eup %7219  ;;  %v2205_v62 = vadd.f32 %v8620_v12, %v8587_v45 }
 0x34f   :  { %v2377_v11 = vpop.f32.mrf.mxu0 }
 0x350   :  { %v2378_v14 = vadd.f32 %v2377_v11, %v2185_v10  ;;  %v8655_v19 = vpop.f32.mrf.mxu1  ;;  %7233 = vtanh.f32 %v2376_v58  ;;  %v2201_v58 = vadd.f32 %v8613_v46, %v8587_v45 }
 0x351   :  { %v7222_v16 = vpop.eup %7221  ;;  %v2379_v25 = vpop.f32.mrf.mxu0 }
 0x352   :  { %v7224_v22 = vpop.eup %7223  ;;  %v2380_v54 = vadd.f32 %v2379_v25, %v2187_v48  ;;  %v2561_v50 = vpack.c.bf16 %v7222_v16, %v7218_v28  ;;  %7235 = vtanh.f32 %v2378_v14  ;;  %v8657_v27 = vpop.f32.mrf.mxu1 }
 0x353   :  { %v2383_v42 = vpop.f32.mrf.mxu0  ;;  %v2560_v43 = vpack.c.bf16 %v7220_v13, %v7224_v22 }
 0x354   :  { %7237 = vtanh.f32 %v2380_v54  ;;  %2771 = vmatprep.mubr.bf16.mxu1 %v2561_v50  ;;  %v8661_v2 = vpop.f32.mrf.mxu1  ;;  %v2384_v0 = vadd.f32 %v2383_v42, %v2191_v56  ;;  %v2213_v42 = vadd.f32 %v8629_v20, %v8582_v7  ;;  %v2217_v20 = vadd.f32 %v8639_v5, %v8582_v7 }
 0x355   :  { %7239 = vtanh.f32 %v2374_v33  ;;  %v2385_v17 = vpop.f32.mrf.mxu0  ;;  %2772 = vmatmul.mubr.bf16.gmra.mxu1 %v2560_v43  ;;  %v7226_v55 = vpop.eup %7225 }
 0x356   :  { %v2386_v23 = vadd.f32 %v2385_v17, %v2193_v49  ;;  %v8667_v31 = vpop.f32.mrf.mxu1  ;;  %v2215_v49 = vadd.f32 %v8635_v59, %v8587_v45 }
 0x357   :  { %v2387_v57 = vpop.f32.mrf.mxu0  ;;  %v7228_v37 = vpop.eup %7227 }
 0x358   :  { %v2388_v39 = vadd.f32 %v2387_v57, %v2195_v32  ;;  %v8671_v34 = vpop.f32.mrf.mxu1  ;;  %7241 = vtanh.f32 %v2386_v23  ;;  %v2211_v23 = vadd.f32 %v8625_v8, %v8587_v45 }
 0x359   :  { %v7230_v41 = vpop.eup %7229  ;;  %v2389_v36 = vpop.f32.mrf.mxu0 }
 0x35a   :  { %v7232_v53 = vpop.eup %7231  ;;  %v2390_v44 = vadd.f32 %v2389_v36, %v2197_v1  ;;  %v2563_v26 = vpack.c.bf16 %v7230_v41, %v7226_v55  ;;  %7243 = vtanh.f32 %v2388_v39  ;;  %v8673_v6 = vpop.f32.mrf.mxu1 }
 0x35b   :  { %v2393_v61 = vpop.f32.mrf.mxu0  ;;  %v2562_v18 = vpack.c.bf16 %v7228_v37, %v7232_v53 }
 0x35c   :  { %7245 = vtanh.f32 %v2390_v44  ;;  %2779 = vmatprep.mubr.bf16.mxu1 %v2563_v26  ;;  %v8677_v4 = vpop.f32.mrf.mxu1  ;;  %v2394_v14 = vadd.f32 %v2393_v61, %v2201_v58  ;;  %v2223_v61 = vadd.f32 %v8645_v35, %v8582_v7  ;;  %v2227_v35 = vadd.f32 %v8655_v19, %v8582_v7 }
 0x35d   :  { %7247 = vtanh.f32 %v2384_v0  ;;  %v2395_v60 = vpop.f32.mrf.mxu0  ;;  %2780 = vmatmul.mubr.bf16.gmra.mxu1 %v2562_v18  ;;  %v7234_v10 = vpop.eup %7233 }
 0x35e   :  { %v2396_v9 = vadd.f32 %v2395_v60, %v2203_v30  ;;  %v8683_v28 = vpop.f32.mrf.mxu1  ;;  %v2225_v30 = vadd.f32 %v8651_v29, %v8587_v45 }
 0x35f   :  { %v2397_v15 = vpop.f32.mrf.mxu0  ;;  %v7236_v11 = vpop.eup %7235 }
 0x360   :  { %v2398_v13 = vadd.f32 %v2397_v15, %v2205_v62  ;;  %v8687_v16 = vpop.f32.mrf.mxu1  ;;  %7249 = vtanh.f32 %v2396_v9  ;;  %v2221_v9 = vadd.f32 %v8641_v40, %v8587_v45  ;;  %v2233_v40 = vadd.f32 %v8661_v2, %v8582_v7 }
 0x361   :  { %v7238_v48 = vpop.eup %7237  ;;  %v2399_v33 = vpop.f32.mrf.mxu0  ;;  %v2237_v2 = vadd.f32 %v8671_v34, %v8582_v7 }
 0x362   :  { %v7240_v25 = vpop.eup %7239  ;;  %v2400_v12 = vadd.f32 %v2399_v33, %v2207_v52  ;;  %v2565_v22 = vpack.c.bf16 %v7238_v48, %v7234_v10  ;;  %7251 = vtanh.f32 %v2398_v13  ;;  %v8689_v54 = vpop.f32.mrf.mxu1 }
 0x363   :  { %v2403_v46 = vpop.f32.mrf.mxu0  ;;  %v2564_v50 = vpack.c.bf16 %v7236_v11, %v7240_v25 }
 0x364   :  { %7253 = vtanh.f32 %v2400_v12  ;;  %2787 = vmatprep.mubr.bf16.mxu1 %v2565_v22  ;;  %v8693_v47 = vpop.f32.mrf.mxu1  ;;  %v2404_v39 = vadd.f32 %v2403_v46, %v2211_v23  ;;  %v2235_v46 = vadd.f32 %v8667_v31, %v8587_v45 }
 0x365   :  { %7255 = vtanh.f32 %v2394_v14  ;;  %v2405_v43 = vpop.f32.mrf.mxu0  ;;  %2788 = vmatmul.mubr.bf16.gmra.mxu1 %v2564_v50  ;;  %v7242_v32 = vpop.eup %7241 }
 0x366   :  { %v2406_v17 = vadd.f32 %v2405_v43, %v2213_v42  ;;  %v8699_v55 = vpop.f32.mrf.mxu1  ;;  %v2231_v43 = vadd.f32 %v8657_v27, %v8587_v45  ;;  %v2243_v27 = vadd.f32 %v8677_v4, %v8582_v7  ;;  %v2247_v4 = vadd.f32 %v8687_v16, %v8582_v7 }
 0x367   :  { %v2407_v56 = vpop.f32.mrf.mxu0  ;;  %v7244_v57 = vpop.eup %7243 }
 0x368   :  { %v2408_v37 = vadd.f32 %v2407_v56, %v2215_v49  ;;  %v8703_v41 = vpop.f32.mrf.mxu1  ;;  %7257 = vtanh.f32 %v2406_v17 }
 0x369   :  { %v7246_v1 = vpop.eup %7245  ;;  %v2409_v0 = vpop.f32.mrf.mxu0 }
 0x36a   :  { %v7248_v36 = vpop.eup %7247  ;;  %v2410_v59 = vadd.f32 %v2409_v0, %v2217_v20  ;;  %v2567_v53 = vpack.c.bf16 %v7246_v1, %v7242_v32  ;;  %7259 = vtanh.f32 %v2408_v37  ;;  %v8705_v44 = vpop.f32.mrf.mxu1 }
 0x36b   :  { %v2413_v8 = vpop.f32.mrf.mxu0  ;;  %v2566_v26 = vpack.c.bf16 %v7244_v57, %v7248_v36 }
 0x36c   :  { %7261 = vtanh.f32 %v2410_v59  ;;  %2795 = vmatprep.mubr.bf16.mxu1 %v2567_v53  ;;  %v8709_v5 = vpop.f32.mrf.mxu1  ;;  %v2414_v52 = vadd.f32 %v2413_v8, %v2221_v9  ;;  %v2245_v59 = vadd.f32 %v8683_v28, %v8587_v45 }
 0x36d   :  { %7263 = vtanh.f32 %v2404_v39  ;;  %v2415_v18 = vpop.f32.mrf.mxu0  ;;  %2796 = vmatmul.mubr.bf16.gmra.mxu1 %v2566_v26  ;;  %v7250_v62 = vpop.eup %7249  ;;  %v2241_v26 = vadd.f32 %v8673_v6, %v8587_v45  ;;  %v2253_v6 = vadd.f32 %v8693_v47, %v8582_v7 }
 0x36e   :  { %v2416_v60 = vadd.f32 %v2415_v18, %v2223_v61  ;;  %v8717_v13 = vpop.f32.mrf.mxu1 }
 0x36f   :  { %v2417_v10 = vpop.f32.mrf.mxu0  ;;  %v7252_v58 = vpop.eup %7251 }
 0x370   :  { %v2418_v15 = vadd.f32 %v2417_v10, %v2225_v30  ;;  %7265 = vtanh.f32 %v2416_v60  ;;  %v8721_v19 = vpop.f32.mrf.mxu1 }
 0x371   :  { %v7254_v11 = vpop.eup %7253  ;;  %v2419_v48 = vpop.f32.mrf.mxu0 }
 0x372   :  { %v7256_v14 = vpop.eup %7255  ;;  %v2420_v33 = vadd.f32 %v2419_v48, %v2227_v35  ;;  %v2569_v29 = vpack.c.bf16 %v7254_v11, %v7250_v62  ;;  %7267 = vtanh.f32 %v2418_v15  ;;  %v8729_v56 = vpop.f32.mrf.mxu1  ;;  %v2255_v48 = vadd.f32 %v8699_v55, %v8587_v45 }
 0x373   :  { %v2423_v25 = vpop.f32.mrf.mxu0  ;;  %v2568_v12 = vpack.c.bf16 %v7252_v58, %v7256_v14 }
 0x374   :  { %7269 = vtanh.f32 %v2420_v33  ;;  %2803 = vmatprep.mubr.bf16.mxu1 %v2569_v29  ;;  %v2424_v57 = vadd.f32 %v2423_v25, %v2231_v43  ;;  %v8733_v34 = vpop.f32.mrf.mxu1  ;;  %v2251_v29 = vadd.f32 %v8689_v54, %v8587_v45  ;;  %v2263_v54 = vadd.f32 %v8709_v5, %v8582_v7 }
 0x375   :  { %7271 = vtanh.f32 %v2414_v52  ;;  %v2425_v22 = vpop.f32.mrf.mxu0  ;;  %2804 = vmatmul.mubr.bf16.gmra.mxu1 %v2568_v12  ;;  %v7258_v42 = vpop.eup %7257 }
 0x376   :  { %v2426_v50 = vadd.f32 %v2425_v22, %v2233_v40  ;;  %v8741_v62 = vpop.f32.mrf.mxu1  ;;  %v2257_v40 = vadd.f32 %v8703_v41, %v8582_v7 }
 0x377   :  { %v2427_v49 = vpop.f32.mrf.mxu0  ;;  %v7260_v17 = vpop.eup %7259 }
 0x378   :  { %v2428_v32 = vadd.f32 %v2427_v49, %v2235_v46  ;;  %7273 = vtanh.f32 %v2426_v50  ;;  %v2276_v52 = vpop.f32.mrf.mxu1 }
 0x379   :  { %v7262_v23 = vpop.eup %7261  ;;  %v2429_v20 = vpop.f32.mrf.mxu0 }
 0x37a   :  { %v7264_v37 = vpop.eup %7263  ;;  %v2430_v1 = vadd.f32 %v2429_v20, %v2237_v2  ;;  %v2571_v31 = vpack.c.bf16 %v7262_v23, %v7258_v42  ;;  %7275 = vtanh.f32 %v2428_v32  ;;  %v8751_v46 = vpop.f32.mrf.mxu1  ;;  %v2265_v23 = vadd.f32 %v8717_v13, %v8587_v45 }
 0x37b   :  { %v2433_v39 = vpop.f32.mrf.mxu0  ;;  %v2570_v0 = vpack.c.bf16 %v7260_v17, %v7264_v37  ;;  %v2261_v37 = vadd.f32 %v8705_v44, %v8587_v45  ;;  %v2273_v44 = vadd.f32 %v8733_v34, %v8582_v7 }
 0x37c   :  { %7277 = vtanh.f32 %v2430_v1  ;;  %2811 = vmatprep.mubr.bf16.mxu1 %v2571_v31  ;;  %v2434_v9 = vadd.f32 %v2433_v39, %v2241_v26  ;;  %v2282_v32 = vpop.f32.mrf.mxu1  ;;  %v2267_v39 = vadd.f32 %v8721_v19, %v8582_v7 }
 0x37d   :  { %7279 = vtanh.f32 %v2424_v57  ;;  %v2435_v36 = vpop.f32.mrf.mxu0  ;;  %2812 = vmatmul.mubr.bf16.gmra.mxu1 %v2570_v0  ;;  %v7266_v8 = vpop.eup %7265 }
 0x37e   :  { %v2436_v53 = vadd.f32 %v2435_v36, %v2243_v27  ;;  %v2284_v27 = vpop.f32.mrf.mxu1 }
 0x37f   :  { %v2437_v61 = vpop.f32.mrf.mxu0  ;;  %v7268_v18 = vpop.eup %7267 }
 0x380   :  { %v2438_v30 = vadd.f32 %v2437_v61, %v2245_v59  ;;  %7281 = vtanh.f32 %v2436_v53 }
 0x381   :  { %v7270_v60 = vpop.eup %7269  ;;  %v2439_v10 = vpop.f32.mrf.mxu0 }
 0x382   :  { %v7272_v58 = vpop.eup %7271  ;;  %v2440_v35 = vadd.f32 %v2439_v10, %v2247_v4  ;;  %v2573_v28 = vpack.c.bf16 %v7270_v60, %v7266_v8  ;;  %7283 = vtanh.f32 %v2438_v30  ;;  %v2275_v4 = vadd.f32 %v8741_v62, %v8587_v45 }
 0x383   :  { %v2443_v15 = vpop.f32.mrf.mxu0  ;;  %v2572_v11 = vpack.c.bf16 %v7268_v18, %v7272_v58  ;;  %v2286_v18 = vpop.f32.mrf.mxu1 }
 0x384   :  { %7285 = vtanh.f32 %v2440_v35  ;;  %2819 = vmatprep.mubr.bf16.mxu1 %v2573_v28  ;;  %v2444_v50 = vadd.f32 %v2443_v15, %v2251_v29  ;;  %v2277_v35 = vadd.f32 %v2276_v52, %v8582_v7  ;;  %v2283_v29 = vadd.f32 %v2282_v32, %v8582_v7 }
 0x385   :  { %7287 = vtanh.f32 %v2434_v9  ;;  %v2445_v16 = vpop.f32.mrf.mxu0  ;;  %2820 = vmatmul.mubr.bf16.gmra.mxu1 %v2572_v11  ;;  %v7274_v33 = vpop.eup %7273  ;;  %v2271_v9 = vadd.f32 %v8729_v56, %v8587_v45  ;;  %v2285_v52 = vadd.f32 %v2284_v27, %v8587_v45 }
 0x386   :  { %v2446_v14 = vadd.f32 %v2445_v16, %v2253_v6  ;;  %v2290_v15 = vpop.f32.mrf.mxu1 }
 0x387   :  { %v2447_v25 = vpop.f32.mrf.mxu0  ;;  %v7276_v12 = vpop.eup %7275 }
 0x388   :  { %v2448_v47 = vadd.f32 %v2447_v25, %v2255_v48  ;;  %7289 = vtanh.f32 %v2446_v14  ;;  %v2292_v56 = vpop.f32.mrf.mxu1 }
 0x389   :  { %v7278_v22 = vpop.eup %7277  ;;  %v2449_v42 = vpop.f32.mrf.mxu0 }
 0x38a   :  { %v7280_v43 = vpop.eup %7279  ;;  %v2450_v49 = vadd.f32 %v2449_v42, %v2257_v40  ;;  %v2575_v55 = vpack.c.bf16 %v7278_v22, %v7274_v33  ;;  %7291 = vtanh.f32 %v2448_v47  ;;  %v2281_v47 = vadd.f32 %v8751_v46, %v8587_v45 }
 0x38b   :  { %v2453_v17 = vpop.f32.mrf.mxu0  ;;  %v2574_v2 = vpack.c.bf16 %v7276_v12, %v7280_v43  ;;  %v2287_v42 = vadd.f32 %v2286_v18, %v8582_v7 }
 0x38c   :  { %7293 = vtanh.f32 %v2450_v49  ;;  %2827 = vmatprep.mubr.bf16.mxu1 %v2575_v55  ;;  %v2454_v36 = vadd.f32 %v2453_v17, %v2261_v37  ;;  %v2294_v55 = vpop.f32.mrf.mxu1 }
 0x38d   :  { %7295 = vtanh.f32 %v2444_v50  ;;  %v2455_v41 = vpop.f32.mrf.mxu0  ;;  %2828 = vmatmul.mubr.bf16.gmra.mxu1 %v2574_v2  ;;  %v7282_v20 = vpop.eup %7281 }
 0x38e   :  { %v2456_v57 = vadd.f32 %v2455_v41, %v2263_v54  ;;  %v2296_v46 = vpop.f32.mrf.mxu1 }
 0x38f   :  { %v2457_v1 = vpop.f32.mrf.mxu0  ;;  %v7284_v31 = vpop.eup %7283 }
 0x390   :  { %v2458_v5 = vadd.f32 %v2457_v1, %v2265_v23  ;;  %7297 = vtanh.f32 %v2456_v57  ;;  %v2295_v1 = vadd.f32 %v2294_v55, %v8587_v45 }
 0x391   :  { %v7286_v0 = vpop.eup %7285  ;;  %v2459_v59 = vpop.f32.mrf.mxu0 }
 0x392   :  { %v7288_v53 = vpop.eup %7287  ;;  %v2460_v8 = vadd.f32 %v2459_v59, %v2267_v39  ;;  %v2577_v26 = vpack.c.bf16 %v7286_v0, %v7282_v20  ;;  %7299 = vtanh.f32 %v2458_v5  ;;  %v2293_v20 = vadd.f32 %v2292_v56, %v8582_v7 }
 0x393   :  { %v2463_v13 = vpop.f32.mrf.mxu0  ;;  %v2576_v61 = vpack.c.bf16 %v7284_v31, %v7288_v53  ;;  %v2291_v5 = vadd.f32 %v2290_v15, %v8587_v45 }
 0x394   :  { %7301 = vtanh.f32 %v2460_v8  ;;  %2835 = vmatprep.mubr.bf16.mxu1 %v2577_v26  ;;  %v2464_v11 = vadd.f32 %v2463_v13, %v2271_v9 }
 0x395   :  { %7303 = vtanh.f32 %v2454_v36  ;;  %v2465_v19 = vpop.f32.mrf.mxu0  ;;  %2836 = vmatmul.mubr.bf16.gmra.mxu1 %v2576_v61  ;;  %v7290_v60 = vpop.eup %7289  ;;  %v2297_v36 = vadd.f32 %v2296_v46, %v8582_v7 }
 0x396   :  { %v2466_v30 = vadd.f32 %v2465_v19, %v2273_v44 }
 0x397   :  { %v2467_v10 = vpop.f32.mrf.mxu0  ;;  %v7292_v58 = vpop.eup %7291 }
 0x398   :  { %v2468_v28 = vadd.f32 %v2467_v10, %v2275_v4  ;;  %7305 = vtanh.f32 %v2466_v30 }
 0x399   :  { %v7294_v34 = vpop.eup %7293  ;;  %v2469_v6 = vpop.f32.mrf.mxu0 }
 0x39a   :  { %v7296_v16 = vpop.eup %7295  ;;  %v2470_v48 = vadd.f32 %v2469_v6, %v2277_v35  ;;  %v2579_v14 = vpack.c.bf16 %v7294_v34, %v7290_v60  ;;  %7307 = vtanh.f32 %v2468_v28 }
 0x39b   :  { %v2473_v62 = vpop.f32.mrf.mxu0  ;;  %v2578_v33 = vpack.c.bf16 %v7292_v58, %v7296_v16 }
 0x39c   :  { %7309 = vtanh.f32 %v2470_v48  ;;  %2843 = vmatprep.mubr.bf16.mxu1 %v2579_v14  ;;  %v2474_v17 = vadd.f32 %v2473_v62, %v2281_v47 }
 0x39d   :  { %7311 = vtanh.f32 %v2464_v11  ;;  %v2475_v25 = vpop.f32.mrf.mxu0  ;;  %2844 = vmatmul.mubr.bf16.gmra.mxu1 %v2578_v33  ;;  %v7298_v40 = vpop.eup %7297  ;;  %v8780_v11 = vld [vmem:[%s9741_s9] ss:$0 sm:$0xff] }
 0x39e   :  { %v2476_v12 = vadd.f32 %v2475_v25, %v2283_v29 }
 0x39f   :  { %v2477_v22 = vpop.f32.mrf.mxu0  ;;  %v7300_v50 = vpop.eup %7299 }
 0x3a0   :  { %v2478_v43 = vadd.f32 %v2477_v22, %v2285_v52  ;;  %7313 = vtanh.f32 %v2476_v12 }
 0x3a1   :  { %v7302_v49 = vpop.eup %7301  ;;  %v2479_v2 = vpop.f32.mrf.mxu0 }
 0x3a2   :  { %v7304_v54 = vpop.eup %7303  ;;  %v2480_v32 = vadd.f32 %v2479_v2, %v2287_v42  ;;  %v2581_v41 = vpack.c.bf16 %v7302_v49, %v7298_v40  ;;  %7315 = vtanh.f32 %v2478_v43  ;;  %v8789_v49 = vld [vmem:[%s9742_s10] ss:$0 sm:$0xff]  ;;  %s7546_s10 = smov [#allocation3]  }
 0x3a3   :  { %v2483_v23 = vpop.f32.mrf.mxu0  ;;  %v2580_v57 = vpack.c.bf16 %v7300_v50, %v7304_v54  ;;  %s6190_s11 = sshll.u32 %s7546_s10, 4  ;;  %s6191_s11 = int_to_ptr.vmem [resolvable:$true] %s6190_s11 }
 0x3a4   :  { %7317 = vtanh.f32 %v2480_v32  ;;  %2851 = vmatprep.mubr.bf16.mxu1 %v2581_v41  ;;  %v2484_v8 = vadd.f32 %v2483_v23, %v2291_v5  ;;  %s7521_s29 = scalar_lea.vmem %s6191_s11, 32  ;;  %p7526_p1 = scmp.lt.s32.totalorder %s6191_s11, %s6191_s11 }
 0x3a5   :  { %7319 = vtanh.f32 %v2474_v17  ;;  %v2485_v37 = vpop.f32.mrf.mxu0  ;;  %2852 = vmatmul.mubr.bf16.gmra.mxu1 %v2580_v57  ;;  %v7306_v39 = vpop.eup %7305  ;;  %p7522_p0 = scmp.ne.s32.totalorder %s6191_s11, %s7521_s29  ;;  %p7527_p2 = scmp.lt.s32.totalorder %s7521_s29, %s7521_s29 }
 0x3a6   :  { %v2486_v31 = vadd.f32 %v2485_v37, %v2293_v20 }
 0x3a7   :  { %v2487_v0 = vpop.f32.mrf.mxu0  ;;  %v7308_v27 = vpop.eup %7307  ;;  %p7528_p3 = por %p7527_p2, %p7526_p1 }
 0x3a8   :  { %v2488_v59 = vadd.f32 %v2487_v0, %v2295_v1  ;;  %7321 = vtanh.f32 %v2486_v31 }
 0x3a9   :  { %v7310_v53 = vpop.eup %7309  ;;  %v2489_v26 = vpop.f32.mrf.mxu0  ;;  %p7529_p4 = pnand %p7528_p3, %p7522_p0 }
 0x3aa   :  { %v7312_v13 = vpop.eup %7311  ;;  %v2490_v61 = vadd.f32 %v2489_v26, %v2297_v36  ;;  %v2583_v44 = vpack.c.bf16 %v7310_v53, %v7306_v39  ;;  %7323 = vtanh.f32 %v2488_v59 }
 0x3ab   :  { %v2582_v18 = vpack.c.bf16 %v7308_v27, %v7312_v13 }
 0x3ac   :  { %7325 = vtanh.f32 %v2490_v61  ;;  %2859 = vmatprep.mubr.bf16.mxu1 %v2583_v44 }
 0x3ad   :  { %7327 = vtanh.f32 %v2484_v8  ;;  %2860 = vmatmul.mubr.bf16.gmra.mxu1 %v2582_v18  ;;  %v7314_v19 = vpop.eup %7313 }
 0x3af   :  { %v7316_v45 = vpop.eup %7315 }
 0x3b1   :  { %v7318_v4 = vpop.eup %7317 }
 0x3b2   :  { %v7320_v30 = vpop.eup %7319  ;;  %v2585_v60 = vpack.c.bf16 %v7318_v4, %v7314_v19 }
 0x3b3   :  { %v2584_v7 = vpack.c.bf16 %v7316_v45, %v7320_v30 }
 0x3b4   :  { %2867 = vmatprep.mubr.bf16.mxu1 %v2585_v60 }
 0x3b5   :  { %2868 = vmatmul.mubr.bf16.gmra.mxu1 %v2584_v7  ;;  %v7322_v9 = vpop.eup %7321 }
 0x3b7   :  { %v7324_v10 = vpop.eup %7323 }
 0x3b9   :  { %v7326_v58 = vpop.eup %7325 }
 0x3ba   :  { %v7328_v35 = vpop.eup %7327  ;;  %v2587_v28 = vpack.c.bf16 %v7326_v58, %v7322_v9 }
 0x3bb   :  { %v2586_v34 = vpack.c.bf16 %v7324_v10, %v7328_v35 }
 0x3bc   :  { %2875 = vmatprep.mubr.bf16.mxu1 %v2587_v28 }
 0x3bd   :  { %2876 = vmatmul.mubr.bf16.gmra.mxu1 %v2586_v34 }
 0x404   :  { %v6533_v15 = vpop.f32.mrf.mxu1 }
 0x406   :  { %v6534_v6 = vpop.f32.mrf.mxu1 }
 0x407   :  { %v6535_v16 = vadd.f32 %v6534_v6, %v6533_v15 }
 0x408   :  { %v6536_v48 = vpop.f32.mrf.mxu1 }
 0x409   :  { %v2758_v14 = vadd.f32 %v6535_v16, %v8780_v11 }
 0x40a   :  { %v6537_v62 = vpop.f32.mrf.mxu1 }
 0x40b   :  { %7329 = vtanh.f32 %v2758_v14  ;;  %v6538_v33 = vadd.f32 %v6537_v62, %v6536_v48 }
 0x40c   :  { %v6539_v29 = vpop.f32.mrf.mxu1 }
 0x40d   :  { %v2761_v56 = vadd.f32 %v6538_v33, %v8780_v11 }
 0x40e   :  { %v6540_v25 = vpop.f32.mrf.mxu1 }
 0x40f   :  { %7331 = vtanh.f32 %v2761_v56  ;;  %v6541_v52 = vadd.f32 %v6540_v25, %v6539_v29 }
 0x410   :  { %v6542_v12 = vpop.f32.mrf.mxu1 }
 0x411   :  { %v2766_v40 = vadd.f32 %v6541_v52, %v8780_v11 }
 0x412   :  { %v6543_v47 = vpop.f32.mrf.mxu1 }
 0x413   :  { %7333 = vtanh.f32 %v2766_v40  ;;  %v6544_v22 = vadd.f32 %v6543_v47, %v6542_v12 }
 0x415   :  { %v6545_v50 = vpop.f32.mrf.mxu1  ;;  %v2769_v42 = vadd.f32 %v6544_v22, %v8780_v11 }
 0x417   :  { %v6546_v43 = vpop.f32.mrf.mxu1  ;;  %7335 = vtanh.f32 %v2769_v42 }
 0x418   :  { %v6547_v55 = vadd.f32 %v6546_v43, %v6545_v50  ;;  %v7330_v17 = vpop.eup %7329 }
 0x419   :  { %v6548_v2 = vpop.f32.mrf.mxu1  ;;  %v2923_v32 = vmul.f32 %v7330_v17, %v8789_v49 }
 0x41a   :  { %v2774_v54 = vadd.f32 %v6547_v55, %v8780_v11 }
 0x41b   :  { %v6549_v41 = vpop.f32.mrf.mxu1  ;;  %2955 = vadd.xlane.f32.xlu0 %v2923_v32 }
 0x41c   :  { %7337 = vtanh.f32 %v2774_v54  ;;  %v6550_v23 = vadd.f32 %v6549_v41, %v6548_v2  ;;  %v7332_v57 = vpop.eup %7331 }
 0x41d   :  { %v6551_v20 = vpop.f32.mrf.mxu1  ;;  %v2924_v37 = vmul.f32 %v7332_v57, %v8789_v49 }
 0x41e   :  { %v2777_v46 = vadd.f32 %v6550_v23, %v8780_v11 }
 0x41f   :  { %v6552_v1 = vpop.f32.mrf.mxu1  ;;  %2957 = vadd.xlane.f32.xlu1 %v2924_v37 }
 0x420   :  { %7339 = vtanh.f32 %v2777_v46  ;;  %v6553_v31 = vadd.f32 %v6552_v1, %v6551_v20  ;;  %v7334_v39 = vpop.eup %7333 }
 0x421   :  { %v6554_v5 = vpop.f32.mrf.mxu1  ;;  %v2925_v27 = vmul.f32 %v7334_v39, %v8789_v49 }
 0x422   :  { %v2782_v0 = vadd.f32 %v6553_v31, %v8780_v11 }
 0x423   :  { %v6555_v36 = vpop.f32.mrf.mxu1  ;;  %2959 = vadd.xlane.f32.xlu0 %v2925_v27 }
 0x424   :  { %7341 = vtanh.f32 %v2782_v0  ;;  %v6556_v59 = vadd.f32 %v6555_v36, %v6554_v5  ;;  %v7336_v53 = vpop.eup %7335 }
 0x425   :  { %v6557_v8 = vpop.f32.mrf.mxu1  ;;  %v2926_v13 = vmul.f32 %v7336_v53, %v8789_v49 }
 0x426   :  { %v2785_v26 = vadd.f32 %v6556_v59, %v8780_v11 }
 0x427   :  { %v6558_v61 = vpop.f32.mrf.mxu1  ;;  %2961 = vadd.xlane.f32.xlu0 %v2926_v13 }
 0x428   :  { %7343 = vtanh.f32 %v2785_v26  ;;  %v6559_v44 = vadd.f32 %v6558_v61, %v6557_v8 }
 0x429   :  { %v7338_v18 = vpop.eup %7337  ;;  %v6560_v19 = vpop.f32.mrf.mxu1 }
 0x42a   :  { %v2790_v45 = vadd.f32 %v6559_v44, %v8780_v11  ;;  %v2927_v4 = vmul.f32 %v7338_v18, %v8789_v49 }
 0x42b   :  { %v6561_v30 = vpop.f32.mrf.mxu1 }
 0x42c   :  { %7345 = vtanh.f32 %v2790_v45  ;;  %2963 = vadd.xlane.f32.xlu1 %v2927_v4  ;;  %v6562_v37 = vadd.f32 %v6561_v30, %v6560_v19 }
 0x42d   :  { %v7340_v60 = vpop.eup %7339  ;;  %v6563_v7 = vpop.f32.mrf.mxu1 }
 0x42e   :  { %v2928_v9 = vmul.f32 %v7340_v60, %v8789_v49  ;;  %v2793_v59 = vadd.f32 %v6562_v37, %v8780_v11 }
 0x42f   :  { %v6564_v10 = vpop.f32.mrf.mxu1 }
 0x430   :  { %2965 = vadd.xlane.f32.xlu0 %v2928_v9  ;;  %v6565_v41 = vadd.f32 %v6564_v10, %v6563_v7 }
 0x431   :  { %v7342_v58 = vpop.eup %7341  ;;  %v6566_v35 = vpop.f32.mrf.mxu1 }
 0x432   :  { %v2929_v28 = vmul.f32 %v7342_v58, %v8789_v49  ;;  %v2798_v1 = vadd.f32 %v6565_v41, %v8780_v11 }
 0x433   :  { %v6567_v34 = vpop.f32.mrf.mxu1 }
 0x434   :  { %2967 = vadd.xlane.f32.xlu1 %v2929_v28  ;;  %v6568_v39 = vadd.f32 %v6567_v34, %v6566_v35 }
 0x435   :  { %v7344_v15 = vpop.eup %7343  ;;  %v6569_v6 = vpop.f32.mrf.mxu1 }
 0x436   :  { %v2930_v16 = vmul.f32 %v7344_v15, %v8789_v49  ;;  %v2801_v26 = vadd.f32 %v6568_v39, %v8780_v11 }
 0x437   :  { %v6570_v48 = vpop.f32.mrf.mxu1 }
 0x438   :  { %2969 = vadd.xlane.f32.xlu0 %v2930_v16  ;;  %v6571_v53 = vadd.f32 %v6570_v48, %v6569_v6 }
 0x439   :  { %v7346_v14 = vpop.eup %7345  ;;  %v6572_v62 = vpop.f32.mrf.mxu1 }
 0x43a   :  { %v2931_v33 = vmul.f32 %v7346_v14, %v8789_v49  ;;  %v2806_v45 = vadd.f32 %v6571_v53, %v8780_v11 }
 0x43b   :  { %v6573_v29 = vpop.f32.mrf.mxu1 }
 0x43c   :  { %2971 = vadd.xlane.f32.xlu0 %v2931_v33  ;;  %v6574_v4 = vadd.f32 %v6573_v29, %v6572_v62 }
 0x43d   :  { %v6575_v56 = vpop.f32.mrf.mxu1 }
 0x43e   :  { %v2809_v35 = vadd.f32 %v6574_v4, %v8780_v11 }
 0x43f   :  { %v6576_v25 = vpop.f32.mrf.mxu1 }
 0x440   :  { %v6577_v13 = vadd.f32 %v6576_v25, %v6575_v56 }
 0x441   :  { %v6578_v52 = vpop.f32.mrf.mxu1 }
 0x442   :  { %v2814_v60 = vadd.f32 %v6577_v13, %v8780_v11 }
 0x443   :  { %v6579_v12 = vpop.f32.mrf.mxu1 }
 0x444   :  { %v6580_v7 = vadd.f32 %v6579_v12, %v6578_v52 }
 0x445   :  { %v6581_v40 = vpop.f32.mrf.mxu1 }
 0x446   :  { %v2817_v34 = vadd.f32 %v6580_v7, %v8780_v11 }
 0x447   :  { %v6582_v47 = vpop.f32.mrf.mxu1 }
 0x448   :  { %v6583_v22 = vadd.f32 %v6582_v47, %v6581_v40 }
 0x449   :  { %v6584_v50 = vpop.f32.mrf.mxu1 }
 0x44a   :  { %v2822_v42 = vadd.f32 %v6583_v22, %v8780_v11 }
 0x44b   :  { %v6585_v43 = vpop.f32.mrf.mxu1 }
 0x44c   :  { %7347 = vtanh.f32 %v2822_v42  ;;  %v6586_v55 = vadd.f32 %v6585_v43, %v6584_v50 }
 0x44d   :  { %v6587_v17 = vpop.f32.mrf.mxu1 }
 0x44e   :  { %v2825_v2 = vadd.f32 %v6586_v55, %v8780_v11 }
 0x44f   :  { %v6588_v54 = vpop.f32.mrf.mxu1 }
 0x450   :  { %7349 = vtanh.f32 %v2825_v2  ;;  %v6589_v32 = vadd.f32 %v6588_v54, %v6587_v17 }
 0x451   :  { %v6590_v23 = vpop.f32.mrf.mxu1 }
 0x452   :  { %v2830_v57 = vadd.f32 %v6589_v32, %v8780_v11 }
 0x453   :  { %v6591_v20 = vpop.f32.mrf.mxu1 }
 0x454   :  { %7351 = vtanh.f32 %v2830_v57  ;;  %v6592_v46 = vadd.f32 %v6591_v20, %v6590_v23 }
 0x455   :  { %v6593_v31 = vpop.f32.mrf.mxu1 }
 0x456   :  { %v2833_v5 = vadd.f32 %v6592_v46, %v8780_v11 }
 0x457   :  { %v6594_v0 = vpop.f32.mrf.mxu1 }
 0x458   :  { %7353 = vtanh.f32 %v2833_v5  ;;  %v6595_v27 = vadd.f32 %v6594_v0, %v6593_v31 }
 0x459   :  { %v7348_v36 = vpop.eup %7347  ;;  %7355 = vtanh.f32 %v2798_v1  ;;  %v6596_v8 = vpop.f32.mrf.mxu1 }
 0x45a   :  { %v2838_v61 = vadd.f32 %v6595_v27, %v8780_v11  ;;  %v2939_v44 = vmul.f32 %v7348_v36, %v8789_v49 }
 0x45b   :  { %v6597_v18 = vpop.f32.mrf.mxu1 }
 0x45c   :  { %7357 = vtanh.f32 %v2838_v61  ;;  %2987 = vadd.xlane.f32.xlu1 %v2939_v44  ;;  %v6598_v15 = vadd.f32 %v6597_v18, %v6596_v8 }
 0x45d   :  { %v7350_v19 = vpop.eup %7349  ;;  %7359 = vtanh.f32 %v2793_v59  ;;  %v6599_v30 = vpop.f32.mrf.mxu1 }
 0x45e   :  { %7361 = vtanh.f32 %v2801_v26  ;;  %v2940_v9 = vmul.f32 %v7350_v19, %v8789_v49  ;;  %v2841_v33 = vadd.f32 %v6598_v15, %v8780_v11 }
 0x45f   :  { %v6600_v10 = vpop.f32.mrf.mxu1  ;;  %7363 = vtanh.f32 %v2806_v45 }
 0x460   :  { %2989 = vadd.xlane.f32.xlu0 %v2940_v9  ;;  %7365 = vtanh.f32 %v2814_v60  ;;  %v6601_v29 = vadd.f32 %v6600_v10, %v6599_v30 }
 0x461   :  { %v7352_v58 = vpop.eup %7351  ;;  %v6602_v28 = vpop.f32.mrf.mxu1  ;;  %7367 = vtanh.f32 %v2809_v35 }
 0x462   :  { %v2941_v6 = vmul.f32 %v7352_v58, %v8789_v49  ;;  %7369 = vtanh.f32 %v2817_v34  ;;  %v2846_v22 = vadd.f32 %v6601_v29, %v8780_v11 }
 0x463   :  { %v6603_v16 = vpop.f32.mrf.mxu1  ;;  %7371 = vtanh.f32 %v2841_v33 }
 0x464   :  { %2991 = vadd.xlane.f32.xlu1 %v2941_v6  ;;  %v6604_v50 = vadd.f32 %v6603_v16, %v6602_v28  ;;  %7373 = vtanh.f32 %v2846_v22 }
 0x465   :  { %v7354_v48 = vpop.eup %7353  ;;  %v6605_v14 = vpop.f32.mrf.mxu1 }
 0x466   :  { %v7356_v62 = vpop.eup %7355  ;;  %v2942_v56 = vmul.f32 %v7354_v48, %v8789_v49  ;;  %v2849_v32 = vadd.f32 %v6604_v50, %v8780_v11 }
 0x467   :  { %v6606_v25 = vpop.f32.mrf.mxu1  ;;  %v2933_v40 = vmul.f32 %v7356_v62, %v8789_v49 }
 0x468   :  { %2993 = vadd.xlane.f32.xlu0 %v2942_v56  ;;  %v6607_v41 = vadd.f32 %v6606_v25, %v6605_v14  ;;  %7375 = vtanh.f32 %v2849_v32  ;;  %v3023_v32 = vpop.permute.xlu1 %3022 }
 0x469   :  { %v7358_v52 = vpop.eup %7357  ;;  %v6608_v12 = vpop.f32.mrf.mxu1 }
 0x46a   :  { %v7360_v47 = vpop.eup %7359  ;;  %v2943_v42 = vmul.f32 %v7358_v52, %v8789_v49  ;;  %v2854_v31 = vadd.f32 %v6607_v41, %v8780_v11  ;;  %v8851_v41 = vrot.slane %v3023_v32, %v8324_v3 }
 0x46b   :  { %v7362_v43 = vpop.eup %7361  ;;  %v6609_v55 = vpop.f32.mrf.mxu1  ;;  %v2932_v2 = vmul.f32 %v7360_v47, %v8789_v49 }
 0x46c   :  { %2995 = vadd.xlane.f32.xlu1 %v2943_v42  ;;  %2975 = vadd.xlane.f32.xlu0 %v2933_v40  ;;  %v7364_v54 = vpop.eup %7363  ;;  %v2934_v23 = vmul.f32 %v7362_v43, %v8789_v49  ;;  %v6610_v39 = vadd.f32 %v6609_v55, %v6608_v12  ;;  %7377 = vtanh.f32 %v2854_v31 }
 0x46d   :  { %v6611_v17 = vpop.f32.mrf.mxu1  ;;  %v7366_v57 = vpop.eup %7365  ;;  %v2935_v37 = vmul.f32 %v7364_v54, %v8789_v49 }
 0x46e   :  { %v7368_v1 = vpop.eup %7367  ;;  %v2937_v5 = vmul.f32 %v7366_v57, %v8789_v49  ;;  %v2857_v53 = vadd.f32 %v6610_v39, %v8780_v11 }
 0x46f   :  { %v6612_v20 = vpop.f32.mrf.mxu1  ;;  %v7370_v0 = vpop.eup %7369  ;;  %v2936_v59 = vmul.f32 %v7368_v1, %v8789_v49 }
 0x470   :  { %2973 = vadd.xlane.f32.xlu1 %v2932_v2  ;;  %2977 = vadd.xlane.f32.xlu0 %v2934_v23  ;;  %v6613_v8 = vadd.f32 %v6612_v20, %v6611_v17  ;;  %v2938_v26 = vmul.f32 %v7370_v0, %v8789_v49  ;;  %v7372_v13 = vpop.eup %7371  ;;  %7379 = vtanh.f32 %v2857_v53 }
 0x471   :  { %v6614_v46 = vpop.f32.mrf.mxu1  ;;  %v2944_v45 = vmul.f32 %v7372_v13, %v8789_v49  ;;  %v7374_v4 = vpop.eup %7373 }
 0x472   :  { %v2862_v18 = vadd.f32 %v6613_v8, %v8780_v11  ;;  %v2945_v10 = vmul.f32 %v7374_v4, %v8789_v49 }
 0x473   :  { %v6615_v27 = vpop.f32.mrf.mxu1 }
 0x474   :  { %2983 = vadd.xlane.f32.xlu1 %v2937_v5  ;;  %2979 = vadd.xlane.f32.xlu0 %v2935_v37  ;;  %v6616_v19 = vadd.f32 %v6615_v27, %v6614_v46  ;;  %7381 = vtanh.f32 %v2862_v18 }
 0x475   :  { %v6617_v36 = vpop.f32.mrf.mxu1  ;;  %v7376_v58 = vpop.eup %7375 }
 0x476   :  { %v2865_v7 = vadd.f32 %v6616_v19, %v8780_v11  ;;  %v2946_v15 = vmul.f32 %v7376_v58, %v8789_v49 }
 0x477   :  { %v6618_v61 = vpop.f32.mrf.mxu1 }
 0x478   :  { %2985 = vadd.xlane.f32.xlu1 %v2938_v26  ;;  %2981 = vadd.xlane.f32.xlu0 %v2936_v59  ;;  %v6619_v9 = vadd.f32 %v6618_v61, %v6617_v36  ;;  %7383 = vtanh.f32 %v2865_v7  ;;  %v7545_v7 = vmov 1966171168  }
 0x479   :  { %v6620_v44 = vpop.f32.mrf.mxu1  ;;  %v7378_v6 = vpop.eup %7377 }
 0x47a   :  { %v2870_v28 = vadd.f32 %v6619_v9, %v8780_v11  ;;  %v2947_v62 = vmul.f32 %v7378_v6, %v8789_v49  ;;  %v4314_v9 = vunpack.c.l.s4 %v7545_v7 }
 0x47b   :  { %v6621_v30 = vpop.f32.mrf.mxu1 }
 0x47c   :  { %2997 = vadd.xlane.f32.xlu0 %v2944_v45  ;;  %v6622_v34 = vadd.f32 %v6621_v30, %v6620_v44  ;;  %7385 = vtanh.f32 %v2870_v28 }
 0x47d   :  { %v6623_v60 = vpop.f32.mrf.mxu1  ;;  %v7380_v33 = vpop.eup %7379 }
 0x47e   :  { %v2873_v48 = vadd.f32 %v6622_v34, %v8780_v11  ;;  %v2948_v52 = vmul.f32 %v7380_v33, %v8789_v49 }
 0x47f   :  { %v6624_v35 = vpop.f32.mrf.mxu1 }
 0x480   :  { %2999 = vadd.xlane.f32.xlu0 %v2945_v10  ;;  %v6625_v14 = vadd.f32 %v6624_v35, %v6623_v60  ;;  %7387 = vtanh.f32 %v2873_v48 }
 0x481   :  { %v6626_v16 = vpop.f32.mrf.mxu1  ;;  %v7382_v12 = vpop.eup %7381 }
 0x482   :  { %v2878_v56 = vadd.f32 %v6625_v14, %v8780_v11  ;;  %v2949_v47 = vmul.f32 %v7382_v12, %v8789_v49  ;;  %v8863_v14 = vsub.s32 4, %v8313_v38 }
 0x483   :  { %v6627_v29 = vpop.f32.mrf.mxu1 }
 0x484   :  { %3001 = vadd.xlane.f32.xlu0 %v2946_v15  ;;  %v6628_v25 = vadd.f32 %v6627_v29, %v6626_v16  ;;  %7389 = vtanh.f32 %v2878_v56  ;;  %v4315_v15 = vunpack.c.0.s8 %v4314_v9  ;;  %v8870_v29 = vsub.s32 6, %v8313_v38 }
 0x485   :  { %v7384_v22 = vpop.eup %7383  ;;  %v8873_v56 = vsub.s32 7, %v8313_v38 }
 0x486   :  { %v2881_v40 = vadd.f32 %v6628_v25, %v8780_v11  ;;  %v2950_v50 = vmul.f32 %v7384_v22, %v8789_v49 }
 0x488   :  { %3003 = vadd.xlane.f32.xlu0 %v2947_v62  ;;  %7391 = vtanh.f32 %v2881_v40  ;;  %v8866_v62 = vsub.s32 5, %v8313_v38 }
 0x489   :  { %v7386_v42 = vpop.eup %7385 }
 0x48a   :  { %v2951_v43 = vmul.f32 %v7386_v42, %v8789_v49 }
 0x48c   :  { %3005 = vadd.xlane.f32.xlu0 %v2948_v52  ;;  %v8876_v52 = vsub.s32 %v4315_v15, %v8313_v38 }
 0x48d   :  { %v7388_v55 = vpop.eup %7387 }
 0x48e   :  { %v2952_v17 = vmul.f32 %v7388_v55, %v8789_v49 }
 0x490   :  { %3007 = vadd.xlane.f32.xlu0 %v2949_v47 }
 0x491   :  { %v7390_v2 = vpop.eup %7389 }
 0x492   :  { %v2953_v54 = vmul.f32 %v7390_v2, %v8789_v49 }
 0x494   :  { %3009 = vadd.xlane.f32.xlu0 %v2950_v50 }
 0x495   :  { %v7392_v11 = vpop.eup %7391 }
 0x496   :  { %v2954_v23 = vmul.f32 %v7392_v11, %v8789_v49 }
 0x498   :  { %3011 = vadd.xlane.f32.xlu0 %v2951_v43 }
 0x49c   :  { %3013 = vadd.xlane.f32.xlu0 %v2952_v17 }
 0x4a0   :  { %3015 = vadd.xlane.f32.xlu0 %v2953_v54 }
 0x4a4   :  { %3017 = vadd.xlane.f32.xlu0 %v2954_v23  ;;  %v2956_v57 = vpop.xlane.xlu0 %2955 }
 0x4a5   :  { %v3029_v20 = vadd.f32 %v8851_v41, %v2956_v57 }
 0x4a7   :  { %v6435_v46 = vmul.f32 -1.442695, %v3029_v20 }
 0x4a8   :  { %v2958_v37 = vpop.xlane.xlu1 %2957 }
 0x4a9   :  { %7393 = vpow2.f32 %v6435_v46  ;;  %v3030_v1 = vadd.f32 %v8851_v41, %v2958_v37 }
 0x4ab   :  { %v6436_v31 = vmul.f32 -1.442695, %v3030_v1 }
 0x4ac   :  { %v2960_v39 = vpop.xlane.xlu0 %2959 }
 0x4ad   :  { %7395 = vpow2.f32 %v6436_v31  ;;  %v3031_v5 = vadd.f32 %v8851_v41, %v2960_v39 }
 0x4af   :  { %v6437_v0 = vmul.f32 -1.442695, %v3031_v5 }
 0x4b0   :  { %v2962_v27 = vpop.xlane.xlu0 %2961 }
 0x4b1   :  { %7397 = vpow2.f32 %v6437_v0  ;;  %v3032_v36 = vadd.f32 %v8851_v41, %v2962_v27 }
 0x4b3   :  { %v6438_v49 = vmul.f32 -1.442695, %v3032_v36 }
 0x4b5   :  { %v2964_v59 = vpop.xlane.xlu1 %2963  ;;  %7399 = vpow2.f32 %v6438_v49 }
 0x4b6   :  { %v3033_v53 = vadd.f32 %v8851_v41, %v2964_v59  ;;  %v7394_v8 = vpop.eup %7393 }
 0x4b7   :  { %v3157_v26 = vadd.f32 1.0, %v7394_v8 }
 0x4b8   :  { %v6439_v13 = vmul.f32 -1.442695, %v3033_v53 }
 0x4b9   :  { %v2966_v61 = vpop.xlane.xlu0 %2965  ;;  %7401 = vrcp.f32 %v3157_v26 }
 0x4ba   :  { %v3034_v44 = vadd.f32 %v8851_v41, %v2966_v61  ;;  %v7396_v18 = vpop.eup %7395  ;;  %7403 = vpow2.f32 %v6439_v13 }
 0x4bb   :  { %v3158_v19 = vadd.f32 1.0, %v7396_v18 }
 0x4bc   :  { %v6440_v45 = vmul.f32 -1.442695, %v3034_v44 }
 0x4bd   :  { %v2968_v4 = vpop.xlane.xlu1 %2967  ;;  %7405 = vrcp.f32 %v3158_v19 }
 0x4be   :  { %v3035_v30 = vadd.f32 %v8851_v41, %v2968_v4  ;;  %v7398_v60 = vpop.eup %7397  ;;  %7407 = vpow2.f32 %v6440_v45 }
 0x4bf   :  { %v3159_v10 = vadd.f32 1.0, %v7398_v60 }
 0x4c0   :  { %v6441_v58 = vmul.f32 -1.442695, %v3035_v30 }
 0x4c1   :  { %v2970_v35 = vpop.xlane.xlu0 %2969  ;;  %7409 = vrcp.f32 %v3159_v10 }
 0x4c2   :  { %v3036_v28 = vadd.f32 %v8851_v41, %v2970_v35  ;;  %v7400_v34 = vpop.eup %7399  ;;  %7411 = vpow2.f32 %v6441_v58 }
 0x4c3   :  { %v3160_v6 = vadd.f32 1.0, %v7400_v34 }
 0x4c4   :  { %v6442_v16 = vmul.f32 -1.442695, %v3036_v28 }
 0x4c5   :  { %v2972_v48 = vpop.xlane.xlu0 %2971  ;;  %7413 = vrcp.f32 %v3160_v6 }
 0x4c6   :  { %v3037_v33 = vadd.f32 %v8851_v41, %v2972_v48  ;;  %v7402_v25 = vpop.eup %7401  ;;  %7415 = vpow2.f32 %v6442_v16 }
 0x4c7   :  { %v7404_v12 = vpop.eup %7403  ;;  %v3288_v47 = vrot.slane %v7402_v25, %v8324_v3  ;;  %v3292_v22 = vrot.slane %v7402_v25, %v8316_v51  ;;  %v3296_v50 = vrot.slane %v7402_v25, %v8362_v63  ;;  %v3300_v43 = vrot.slane %v7402_v25, %v8356_v24 }
 0x4c8   :  { %v6443_v40 = vmul.f32 -1.442695, %v3037_v33  ;;  %v3161_v42 = vadd.f32 1.0, %v7404_v12  ;;  %v3304_v55 = vrot.slane %v7402_v25, %v8863_v14  ;;  %v3308_v17 = vrot.slane %v7402_v25, %v8866_v62 }
 0x4c9   :  { %v3312_v2 = vrot.slane %v7402_v25, %v8870_v29  ;;  %v3316_v54 = vrot.slane %v7402_v25, %v8873_v56  ;;  %v4309_v11 = vcombine.low %v3288_v47, %v3292_v22  ;;  %v4310_v23 = vcombine.low %v3296_v50, %v3300_v43 }
 0x4ca   :  { %7417 = vpow2.f32 %v6443_v40  ;;  %v7406_v32 = vpop.eup %7405  ;;  %v4311_v57 = vcombine.low %v3304_v55, %v3308_v17 }
 0x4cb   :  { %7419 = vrcp.f32 %v3161_v42  ;;  %v7408_v20 = vpop.eup %7407  ;;  %v4312_v46 = vcombine.low %v3312_v2, %v3316_v54  ;;  %v4319_v37 = vrot.slane %v4309_v11, %v8876_v52  ;;  %v3320_v1 = vrot.slane %v7406_v32, %v8324_v3 }
 0x4cc   :  { %v3324_v31 = vrot.slane %v7406_v32, %v8316_v51  ;;  %v3162_v39 = vadd.f32 1.0, %v7408_v20  ;;  %v4326_v5 = vrot.slane %v4310_v23, %v8876_v52  ;;  %v4333_v0 = vrot.slane %v4311_v57, %v8876_v52 }
 0x4cd   :  { %v3328_v27 = vrot.slane %v7406_v32, %v8362_v63  ;;  %v4340_v36 = vrot.slane %v4312_v46, %v8876_v52  ;;  %v3332_v49 = vrot.slane %v7406_v32, %v8356_v24  ;;  %v3336_v59 = vrot.slane %v7406_v32, %v8863_v14 }
 0x4ce   :  { %v3340_v53 = vrot.slane %v7406_v32, %v8866_v62  ;;  %v7410_v8 = vpop.eup %7409  ;;  %7421 = vrcp.f32 %v3162_v39  ;;  %v4341_v26 = vcombine.low %v4319_v37, %v4326_v5  ;;  %v3344_v13 = vrot.slane %v7406_v32, %v8870_v29 }
 0x4cf   :  { %v3348_v61 = vrot.slane %v7406_v32, %v8873_v56  ;;  %v7412_v44 = vpop.eup %7411  ;;  %v4342_v18 = vcombine.low %v4333_v0, %v4340_v36  ;;  %v4358_v19 = vcombine.low %v3320_v1, %v3324_v31  ;;  %v4359_v45 = vcombine.low %v3328_v27, %v3332_v49 }
 0x4d0   :  { %v4360_v4 = vcombine.low %v3336_v59, %v3340_v53  ;;  %v3163_v30 = vadd.f32 1.0, %v7412_v44  ;;  %v4349_v60 = vrot.slane %v4341_v26, %v8876_v52  ;;  %v3352_v9 = vrot.slane %v7410_v8, %v8324_v3 }
 0x4d1   :  { %v4361_v7 = vcombine.low %v3344_v13, %v3348_v61  ;;  %v4356_v10 = vrot.slane %v4342_v18, %v8876_v52  ;;  %v4368_v58 = vrot.slane %v4358_v19, %v8876_v52  ;;  %v4375_v35 = vrot.slane %v4359_v45, %v8876_v52 }
 0x4d2   :  { %v4382_v28 = vrot.slane %v4360_v4, %v8876_v52  ;;  %v7414_v34 = vpop.eup %7413  ;;  %7423 = vrcp.f32 %v3163_v30  ;;  %v3356_v6 = vrot.slane %v7410_v8, %v8316_v51  ;;  %v3360_v16 = vrot.slane %v7410_v8, %v8362_v63 }
 0x4d3   :  { %v4389_v15 = vrot.slane %v4361_v7, %v8876_v52  ;;  %v7416_v48 = vpop.eup %7415  ;;  %v4357_v33 = vcombine.low %v4349_v60, %v4356_v10  ;;  %v4390_v25 = vcombine.low %v4368_v58, %v4375_v35  ;;  %v3364_v12 = vrot.slane %v7410_v8, %v8356_v24 }
 0x4d4   :  { %v3368_v40 = vrot.slane %v7410_v8, %v8863_v14  ;;  %v3164_v47 = vadd.f32 1.0, %v7416_v48  ;;  %v3372_v50 = vrot.slane %v7410_v8, %v8866_v62  ;;  %v3376_v42 = vrot.slane %v7410_v8, %v8870_v29 }
 0x4d5   :  { %v4391_v22 = vcombine.low %v4382_v28, %v4389_v15  ;;  %5878 = vperm.xlu1 %6673, %v4357_v33   ;;  %v4398_v43 = vrot.slane %v4390_v25, %v8876_v52  ;;  %v3380_v55 = vrot.slane %v7410_v8, %v8873_v56  ;;  %v4407_v17 = vcombine.low %v3352_v9, %v3356_v6 }
 0x4d6   :  { %v4408_v2 = vcombine.low %v3360_v16, %v3364_v12  ;;  %7425 = vrcp.f32 %v3164_v47  ;;  %v4409_v32 = vcombine.low %v3368_v40, %v3372_v50  ;;  %v3384_v23 = vrot.slane %v7414_v34, %v8324_v3 }
 0x4d7   :  { %v7418_v54 = vpop.eup %7417  ;;  %v4405_v11 = vrot.slane %v4391_v22, %v8876_v52  ;;  %v4410_v46 = vcombine.low %v3376_v42, %v3380_v55  ;;  %v4417_v37 = vrot.slane %v4407_v17, %v8876_v52  ;;  %v3388_v5 = vrot.slane %v7414_v34, %v8316_v51 }
 0x4d8   :  { %v7420_v57 = vpop.eup %7419  ;;  %v3165_v20 = vadd.f32 1.0, %v7418_v54  ;;  %v4424_v1 = vrot.slane %v4408_v2, %v8876_v52  ;;  %v4431_v39 = vrot.slane %v4409_v32, %v8876_v52  ;;  %v3392_v0 = vrot.slane %v7414_v34, %v8362_v63 }
 0x4d9   :  { %v4406_v31 = vcombine.low %v4398_v43, %v4405_v11  ;;  %v4438_v27 = vrot.slane %v4410_v46, %v8876_v52  ;;  %v3396_v49 = vrot.slane %v7414_v34, %v8356_v24  ;;  %v3400_v59 = vrot.slane %v7414_v34, %v8863_v14 }
 0x4da   :  { %7427 = vrcp.f32 %v3165_v20  ;;  %v4439_v36 = vcombine.low %v4417_v37, %v4424_v1  ;;  %v3404_v53 = vrot.slane %v7414_v34, %v8866_v62  ;;  %v3408_v8 = vrot.slane %v7414_v34, %v8870_v29 }
 0x4db   :  { %5881 = vperm.xlu0 %6674, %v4406_v31   ;;  %v3412_v26 = vrot.slane %v7414_v34, %v8873_v56  ;;  %v7422_v13 = vpop.eup %7421  ;;  %v4440_v61 = vcombine.low %v4431_v39, %v4438_v27  ;;  %v4456_v18 = vcombine.low %v3384_v23, %v3388_v5  ;;  %v4457_v19 = vcombine.low %v3392_v0, %v3396_v49 }
 0x4dc   :  { %v4447_v44 = vrot.slane %v4439_v36, %v8876_v52  ;;  %v4458_v45 = vcombine.low %v3400_v59, %v3404_v53  ;;  %v3416_v30 = vrot.slane %v7420_v57, %v8324_v3  ;;  %v3420_v60 = vrot.slane %v7420_v57, %v8316_v51 }
 0x4dd   :  { %v4459_v4 = vcombine.low %v3408_v8, %v3412_v26  ;;  %v4454_v7 = vrot.slane %v4440_v61, %v8876_v52  ;;  %v4466_v9 = vrot.slane %v4456_v18, %v8876_v52  ;;  %v4473_v10 = vrot.slane %v4457_v19, %v8876_v52 }
 0x4de   :  { %v3424_v58 = vrot.slane %v7420_v57, %v8362_v63  ;;  %v4480_v35 = vrot.slane %v4458_v45, %v8876_v52  ;;  %v3428_v34 = vrot.slane %v7420_v57, %v8356_v24  ;;  %v3432_v15 = vrot.slane %v7420_v57, %v8863_v14 }
 0x4df   :  { %v4487_v28 = vrot.slane %v4459_v4, %v8876_v52  ;;  %v8937_v6 = vpop.eup %7423  ;;  %v4455_v16 = vcombine.low %v4447_v44, %v4454_v7  ;;  %v4488_v48 = vcombine.low %v4466_v9, %v4473_v10  ;;  %v3436_v33 = vrot.slane %v7420_v57, %v8866_v62 }
 0x4e0   :  { %v3440_v25 = vrot.slane %v7420_v57, %v8870_v29  ;;  %v3444_v40 = vrot.slane %v7420_v57, %v8873_v56  ;;  %v4505_v47 = vcombine.low %v3416_v30, %v3420_v60  ;;  %v4506_v22 = vcombine.low %v3424_v58, %v3428_v34 }
 0x4e1   :  { %v4489_v12 = vcombine.low %v4480_v35, %v4487_v28  ;;  %5884 = vperm.xlu1 %6673, %v4455_v16   ;;  %v4496_v50 = vrot.slane %v4488_v48, %v8876_v52  ;;  %v4507_v42 = vcombine.low %v3432_v15, %v3436_v33  ;;  %v3448_v43 = vrot.slane %v7422_v13, %v8324_v3 }
 0x4e2   :  { %v3452_v55 = vrot.slane %v7422_v13, %v8316_v51  ;;  %v4508_v2 = vcombine.low %v3440_v25, %v3444_v40  ;;  %v4515_v54 = vrot.slane %v4505_v47, %v8876_v52  ;;  %v4522_v11 = vrot.slane %v4506_v22, %v8876_v52 }
 0x4e3   :  { %v4503_v17 = vrot.slane %v4489_v12, %v8876_v52  ;;  %v8948_v32 = vpop.eup %7425  ;;  %v4529_v23 = vrot.slane %v4507_v42, %v8876_v52  ;;  %v3456_v57 = vrot.slane %v7422_v13, %v8362_v63  ;;  %v3460_v20 = vrot.slane %v7422_v13, %v8356_v24 }
 0x4e4   :  { %v3464_v46 = vrot.slane %v7422_v13, %v8863_v14  ;;  %v4536_v1 = vrot.slane %v4508_v2, %v8876_v52  ;;  %v4537_v31 = vcombine.low %v4515_v54, %v4522_v11  ;;  %v3468_v5 = vrot.slane %v7422_v13, %v8866_v62 }
 0x4e5   :  { %v4504_v37 = vcombine.low %v4496_v50, %v4503_v17  ;;  %v2988_v39 = vpop.xlane.xlu1 %2987  ;;  %v3472_v27 = vrot.slane %v7422_v13, %v8870_v29  ;;  %v3476_v36 = vrot.slane %v7422_v13, %v8873_v56  ;;  %v4554_v49 = vcombine.low %v3448_v43, %v3452_v55 }
 0x4e6   :  { %v3045_v0 = vadd.f32 %v8851_v41, %v2988_v39  ;;  %v4538_v53 = vcombine.low %v4529_v23, %v4536_v1  ;;  %v4545_v8 = vrot.slane %v4537_v31, %v8876_v52  ;;  %v4555_v26 = vcombine.low %v3456_v57, %v3460_v20 }
 0x4e7   :  { %v8959_v59 = vpop.eup %7427  ;;  %5887 = vperm.xlu1 %6673, %v4504_v37   ;;  %v4556_v61 = vcombine.low %v3464_v46, %v3468_v5  ;;  %v4557_v18 = vcombine.low %v3472_v27, %v3476_v36  ;;  %v4564_v19 = vrot.slane %v4554_v49, %v8876_v52  ;;  %v3480_v45 = vrot.slane %v8937_v6, %v8324_v3 }
 0x4e8   :  { %v6451_v44 = vmul.f32 -1.442695, %v3045_v0  ;;  %v4552_v4 = vrot.slane %v4538_v53, %v8876_v52  ;;  %v4571_v13 = vrot.slane %v4555_v26, %v8876_v52  ;;  %v3484_v7 = vrot.slane %v8937_v6, %v8316_v51 }
 0x4e9   :  { %v4578_v30 = vrot.slane %v4556_v61, %v8876_v52  ;;  %v2990_v60 = vpop.xlane.xlu0 %2989  ;;  %v4585_v9 = vrot.slane %v4557_v18, %v8876_v52  ;;  %v3488_v58 = vrot.slane %v8937_v6, %v8362_v63  ;;  %v3492_v34 = vrot.slane %v8937_v6, %v8356_v24 }
 0x4ea   :  { %7429 = vpow2.f32 %v6451_v44  ;;  %v3046_v10 = vadd.f32 %v8851_v41, %v2990_v60  ;;  %v4553_v35 = vcombine.low %v4545_v8, %v4552_v4  ;;  %v4586_v28 = vcombine.low %v4564_v19, %v4571_v13 }
 0x4eb   :  { %v3496_v15 = vrot.slane %v8937_v6, %v8863_v14  ;;  %v4587_v16 = vcombine.low %v4578_v30, %v4585_v9  ;;  %v3500_v33 = vrot.slane %v8937_v6, %v8866_v62  ;;  %v3504_v25 = vrot.slane %v8937_v6, %v8870_v29 }
 0x4ec   :  { %v6452_v48 = vmul.f32 -1.442695, %v3046_v10  ;;  %5890 = vperm.xlu1 %6673, %v4553_v35   ;;  %v4594_v12 = vrot.slane %v4586_v28, %v8876_v52  ;;  %v3508_v40 = vrot.slane %v8937_v6, %v8873_v56  ;;  %v4603_v47 = vcombine.low %v3480_v45, %v3484_v7 }
 0x4ed   :  { %v4604_v22 = vcombine.low %v3488_v58, %v3492_v34  ;;  %v2992_v50 = vpop.xlane.xlu1 %2991  ;;  %v4601_v42 = vrot.slane %v4587_v16, %v8876_v52  ;;  %v4605_v43 = vcombine.low %v3496_v15, %v3500_v33  ;;  %v3512_v11 = vrot.slane %v8948_v32, %v8324_v3 }
 0x4ee   :  { %7431 = vpow2.f32 %v6452_v48  ;;  %v3047_v55 = vadd.f32 %v8851_v41, %v2992_v50  ;;  %v4606_v17 = vcombine.low %v3504_v25, %v3508_v40  ;;  %v4613_v2 = vrot.slane %v4603_v47, %v8876_v52 }
 0x4ef   :  { %v4620_v54 = vrot.slane %v4604_v22, %v8876_v52  ;;  %v4602_v23 = vcombine.low %v4594_v12, %v4601_v42  ;;  %v4627_v6 = vrot.slane %v4605_v43, %v8876_v52  ;;  %v3516_v20 = vrot.slane %v8948_v32, %v8316_v51 }
 0x4f0   :  { %v6453_v57 = vmul.f32 -1.442695, %v3047_v55  ;;  %v4634_v46 = vrot.slane %v4606_v17, %v8876_v52  ;;  %v3520_v1 = vrot.slane %v8948_v32, %v8362_v63  ;;  %v3524_v31 = vrot.slane %v8948_v32, %v8356_v24 }
 0x4f1   :  { %v4635_v37 = vcombine.low %v4613_v2, %v4620_v54  ;;  %v2994_v39 = vpop.xlane.xlu0 %2993  ;;  %5893 = vperm.xlu0 %6674, %v4602_v23   ;;  %v3528_v5 = vrot.slane %v8948_v32, %v8863_v14  ;;  %v3532_v0 = vrot.slane %v8948_v32, %v8866_v62  ;;  %v3536_v27 = vrot.slane %v8948_v32, %v8870_v29 }
 0x4f2   :  { %7433 = vpow2.f32 %v6453_v57  ;;  %v4636_v36 = vcombine.low %v4627_v6, %v4634_v46  ;;  %v3540_v53 = vrot.slane %v8948_v32, %v8873_v56  ;;  %v4652_v8 = vcombine.low %v3512_v11, %v3516_v20 }
 0x4f3   :  { %v4643_v49 = vrot.slane %v4635_v37, %v8876_v52  ;;  %v4653_v26 = vcombine.low %v3520_v1, %v3524_v31  ;;  %v4654_v61 = vcombine.low %v3528_v5, %v3532_v0  ;;  %v3048_v44 = vadd.f32 %v8851_v41, %v2994_v39 }
 0x4f4   :  { %v3544_v18 = vrot.slane %v8959_v59, %v8324_v3  ;;  %v4650_v19 = vrot.slane %v4636_v36, %v8876_v52  ;;  %v4655_v45 = vcombine.low %v3536_v27, %v3540_v53  ;;  %v4662_v4 = vrot.slane %v4652_v8, %v8876_v52 }
 0x4f5   :  { %v3548_v13 = vrot.slane %v8959_v59, %v8316_v51  ;;  %v2996_v30 = vpop.xlane.xlu1 %2995  ;;  %v2976_v60 = vpop.xlane.xlu0 %2975  ;;  %v4669_v32 = vrot.slane %v4653_v26, %v8876_v52  ;;  %v4676_v7 = vrot.slane %v4654_v61, %v8876_v52  ;;  %v6454_v9 = vmul.f32 -1.442695, %v3048_v44 }
 0x4f6   :  { %v3552_v10 = vrot.slane %v8959_v59, %v8362_v63  ;;  %v4651_v35 = vcombine.low %v4643_v49, %v4650_v19  ;;  %v4683_v28 = vrot.slane %v4655_v45, %v8876_v52  ;;  %v3556_v34 = vrot.slane %v8959_v59, %v8356_v24 }
 0x4f7   :  { %v7430_v58 = vpop.eup %7429  ;;  %v3560_v15 = vrot.slane %v8959_v59, %v8863_v14  ;;  %v4684_v48 = vcombine.low %v4662_v4, %v4669_v32  ;;  %7435 = vpow2.f32 %v6454_v9  ;;  %v3564_v33 = vrot.slane %v8959_v59, %v8866_v62 }
 0x4f8   :  { %v3173_v16 = vadd.f32 1.0, %v7430_v58  ;;  %5896 = vperm.xlu0 %6674, %v4651_v35   ;;  %v4685_v25 = vcombine.low %v4676_v7, %v4683_v28  ;;  %v3568_v12 = vrot.slane %v8959_v59, %v8870_v29  ;;  %v3572_v40 = vrot.slane %v8959_v59, %v8873_v56 }
 0x4f9   :  { %v4701_v47 = vcombine.low %v3544_v18, %v3548_v13  ;;  %v2974_v22 = vpop.xlane.xlu1 %2973  ;;  %v2978_v50 = vpop.xlane.xlu0 %2977  ;;  %v4692_v42 = vrot.slane %v4684_v48, %v8876_v52  ;;  %v4702_v43 = vcombine.low %v3552_v10, %v3556_v34  ;;  %v4703_v55 = vcombine.low %v3560_v15, %v3564_v33 }
 0x4fa   :  { %7437 = vrcp.f32 %v3173_v16  ;;  %v4699_v2 = vrot.slane %v4685_v25, %v8876_v52  ;;  %v4704_v54 = vcombine.low %v3568_v12, %v3572_v40  ;;  %v3049_v23 = vadd.f32 %v8851_v41, %v2996_v30 }
 0x4fb   :  { %v7432_v17 = vpop.eup %7431  ;;  %v4711_v11 = vrot.slane %v4701_v47, %v8876_v52  ;;  %v4718_v57 = vrot.slane %v4702_v43, %v8876_v52  ;;  %v4725_v59 = vrot.slane %v4703_v55, %v8876_v52  ;;  %v3039_v20 = vadd.f32 %v8851_v41, %v2976_v60 }
 0x4fc   :  { %v3174_v6 = vadd.f32 1.0, %v7432_v17  ;;  %v4700_v46 = vcombine.low %v4692_v42, %v4699_v2  ;;  %v4732_v37 = vrot.slane %v4704_v54, %v8876_v52  ;;  %v6455_v1 = vmul.f32 -1.442695, %v3049_v23 }
 0x4fd   :  { %v3038_v31 = vadd.f32 %v8851_v41, %v2974_v22  ;;  %v2984_v39 = vpop.xlane.xlu1 %2983  ;;  %v2980_v5 = vpop.xlane.xlu0 %2979  ;;  %v4733_v0 = vcombine.low %v4711_v11, %v4718_v57  ;;  %v6445_v27 = vmul.f32 -1.442695, %v3039_v20  ;;  %v3040_v36 = vadd.f32 %v8851_v41, %v2978_v50 }
 0x4fe   :  { %7439 = vrcp.f32 %v3174_v6  ;;  %5899 = vperm.xlu0 %6674, %v4700_v46   ;;  %v4734_v53 = vcombine.low %v4725_v59, %v4732_v37  ;;  %v3043_v26 = vadd.f32 %v8851_v41, %v2984_v39  ;;  %v3041_v4 = vadd.f32 %v8851_v41, %v2980_v5 }
 0x4ff   :  { %v7434_v49 = vpop.eup %7433  ;;  %7441 = vpow2.f32 %v6455_v1  ;;  %v6444_v8 = vmul.f32 -1.442695, %v3038_v31  ;;  %v4741_v44 = vrot.slane %v4733_v0, %v8876_v52  ;;  %v6446_v18 = vmul.f32 -1.442695, %v3040_v36 }
 0x500   :  { %v3175_v61 = vadd.f32 1.0, %v7434_v49  ;;  %7443 = vpow2.f32 %v6445_v27  ;;  %v4748_v19 = vrot.slane %v4734_v53, %v8876_v52  ;;  %v6449_v45 = vmul.f32 -1.442695, %v3043_v26 }
 0x501   :  { %7445 = vpow2.f32 %v6444_v8  ;;  %v2986_v13 = vpop.xlane.xlu1 %2985  ;;  %v2982_v30 = vpop.xlane.xlu0 %2981  ;;  %v6447_v9 = vmul.f32 -1.442695, %v3041_v4 }
 0x502   :  { %7447 = vrcp.f32 %v3175_v61  ;;  %v3044_v60 = vadd.f32 %v8851_v41, %v2986_v13  ;;  %v3042_v32 = vadd.f32 %v8851_v41, %v2982_v30  ;;  %v4749_v7 = vcombine.low %v4741_v44, %v4748_v19 }
 0x503   :  { %7449 = vpow2.f32 %v6446_v18 }
 0x504   :  { %7451 = vpow2.f32 %v6449_v45  ;;  %v6450_v10 = vmul.f32 -1.442695, %v3044_v60  ;;  %v6448_v58 = vmul.f32 -1.442695, %v3042_v32  ;;  %v7436_v35 = vpop.eup %7435  ;;  %5902 = vperm.xlu0 %6674, %v4749_v7  }
 0x505   :  { %7453 = vpow2.f32 %v6447_v9  ;;  %v2998_v28 = vpop.xlane.xlu0 %2997  ;;  %v3176_v16 = vadd.f32 1.0, %v7436_v35 }
 0x506   :  { %7455 = vpow2.f32 %v6450_v10  ;;  %v3050_v34 = vadd.f32 %v8851_v41, %v2998_v28 }
 0x507   :  { %v7438_v15 = vpop.eup %7437  ;;  %7457 = vpow2.f32 %v6448_v58 }
 0x508   :  { %v6456_v48 = vmul.f32 -1.442695, %v3050_v34  ;;  %v3800_v33 = vrot.slane %v7438_v15, %v8324_v3  ;;  %v3804_v25 = vrot.slane %v7438_v15, %v8316_v51  ;;  %v3808_v40 = vrot.slane %v7438_v15, %v8362_v63 }
 0x509   :  { %v3000_v12 = vpop.xlane.xlu0 %2999  ;;  %v3812_v47 = vrot.slane %v7438_v15, %v8356_v24  ;;  %v3816_v22 = vrot.slane %v7438_v15, %v8863_v14  ;;  %v3820_v50 = vrot.slane %v7438_v15, %v8866_v62  ;;  %v3824_v43 = vrot.slane %v7438_v15, %v8870_v29 }
 0x50a   :  { %7459 = vpow2.f32 %v6456_v48  ;;  %v3051_v42 = vadd.f32 %v8851_v41, %v3000_v12  ;;  %v3828_v55 = vrot.slane %v7438_v15, %v8873_v56  ;;  %v5093_v2 = vcombine.low %v3800_v33, %v3804_v25 }
 0x50b   :  { %v9056_v17 = vpop.eup %7439  ;;  %7461 = vrcp.f32 %v3176_v16  ;;  %v5094_v54 = vcombine.low %v3808_v40, %v3812_v47  ;;  %v5095_v11 = vcombine.low %v3816_v22, %v3820_v50 }
 0x50c   :  { %v7442_v23 = vpop.eup %7441  ;;  %v6457_v6 = vmul.f32 -1.442695, %v3051_v42  ;;  %v5096_v57 = vcombine.low %v3824_v43, %v3828_v55  ;;  %v3832_v59 = vrot.slane %v9056_v17, %v8324_v3  ;;  %v3836_v20 = vrot.slane %v9056_v17, %v8316_v51 }
 0x50d   :  { %v7444_v46 = vpop.eup %7443  ;;  %v3177_v37 = vadd.f32 1.0, %v7442_v23  ;;  %v3002_v1 = vpop.xlane.xlu0 %3001  ;;  %v5103_v31 = vrot.slane %v5093_v2, %v8876_v52  ;;  %v5110_v39 = vrot.slane %v5094_v54, %v8876_v52  ;;  %v5117_v5 = vrot.slane %v5095_v11, %v8876_v52 }
 0x50e   :  { %v7446_v0 = vpop.eup %7445  ;;  %v3167_v27 = vadd.f32 1.0, %v7444_v46  ;;  %7463 = vpow2.f32 %v6457_v6  ;;  %v3052_v36 = vadd.f32 %v8851_v41, %v3002_v1  ;;  %v5124_v49 = vrot.slane %v5096_v57, %v8876_v52 }
 0x50f   :  { %v9067_v53 = vpop.eup %7447  ;;  %7465 = vrcp.f32 %v3177_v37  ;;  %v3166_v8 = vadd.f32 1.0, %v7446_v0  ;;  %v5125_v26 = vcombine.low %v5103_v31, %v5110_v39  ;;  %v3840_v61 = vrot.slane %v9056_v17, %v8362_v63 }
 0x510   :  { %v7450_v44 = vpop.eup %7449  ;;  %7467 = vrcp.f32 %v3167_v27  ;;  %v6458_v18 = vmul.f32 -1.442695, %v3052_v36  ;;  %v5126_v19 = vcombine.low %v5117_v5, %v5124_v49  ;;  %v3844_v45 = vrot.slane %v9056_v17, %v8356_v24 }
 0x511   :  { %v7452_v4 = vpop.eup %7451  ;;  %7469 = vrcp.f32 %v3166_v8  ;;  %v3168_v13 = vadd.f32 1.0, %v7450_v44  ;;  %v3004_v30 = vpop.xlane.xlu0 %3003  ;;  %v5133_v60 = vrot.slane %v5125_v26, %v8876_v52  ;;  %v3848_v32 = vrot.slane %v9056_v17, %v8863_v14 }
 0x512   :  { %v7454_v7 = vpop.eup %7453  ;;  %v3171_v9 = vadd.f32 1.0, %v7452_v4  ;;  %7471 = vpow2.f32 %v6458_v18  ;;  %v3053_v10 = vadd.f32 %v8851_v41, %v3004_v30  ;;  %v5140_v58 = vrot.slane %v5126_v19, %v8876_v52 }
 0x513   :  { %v7456_v35 = vpop.eup %7455  ;;  %7473 = vrcp.f32 %v3168_v13  ;;  %v3169_v28 = vadd.f32 1.0, %v7454_v7  ;;  %v3852_v34 = vrot.slane %v9056_v17, %v8866_v62  ;;  %v3856_v15 = vrot.slane %v9056_v17, %v8870_v29 }
 0x514   :  { %v7458_v16 = vpop.eup %7457  ;;  %7475 = vrcp.f32 %v3171_v9  ;;  %v3172_v48 = vadd.f32 1.0, %v7456_v35  ;;  %v6459_v33 = vmul.f32 -1.442695, %v3053_v10  ;;  %v5141_v25 = vcombine.low %v5133_v60, %v5140_v58 }
 0x515   :  { %7477 = vrcp.f32 %v3169_v28  ;;  %v3170_v12 = vadd.f32 1.0, %v7458_v16  ;;  %v3006_v40 = vpop.xlane.xlu0 %3005  ;;  %v3860_v47 = vrot.slane %v9056_v17, %v8873_v56  ;;  %v5142_v22 = vcombine.low %v3832_v59, %v3836_v20 }
 0x516   :  { %7479 = vrcp.f32 %v3172_v48  ;;  %5926 = vperm.xlu1 %6673, %v5141_v25   ;;  %v3054_v50 = vadd.f32 %v8851_v41, %v3006_v40  ;;  %v5143_v42 = vcombine.low %v3840_v61, %v3844_v45  ;;  %v5144_v43 = vcombine.low %v3848_v32, %v3852_v34 }
 0x517   :  { %v7460_v55 = vpop.eup %7459  ;;  %7481 = vrcp.f32 %v3170_v12  ;;  %v5145_v2 = vcombine.low %v3856_v15, %v3860_v47  ;;  %v5152_v54 = vrot.slane %v5142_v22, %v8876_v52  ;;  %v3864_v11 = vrot.slane %v9067_v53, %v8324_v3 }
 0x518   :  { %v9088_v23 = vpop.eup %7461  ;;  %v3178_v6 = vadd.f32 1.0, %v7460_v55  ;;  %7483 = vpow2.f32 %v6459_v33  ;;  %v6460_v17 = vmul.f32 -1.442695, %v3054_v50  ;;  %v5159_v57 = vrot.slane %v5143_v42, %v8876_v52 }
 0x519   :  { %v5166_v59 = vrot.slane %v5144_v43, %v8876_v52  ;;  %v5173_v20 = vrot.slane %v5145_v2, %v8876_v52  ;;  %v3008_v46 = vpop.xlane.xlu0 %3007  ;;  %v3868_v37 = vrot.slane %v9067_v53, %v8316_v51  ;;  %v3872_v1 = vrot.slane %v9067_v53, %v8362_v63 }
 0x51a   :  { %7485 = vrcp.f32 %v3178_v6  ;;  %v5174_v31 = vcombine.low %v5152_v54, %v5159_v57  ;;  %v3055_v39 = vadd.f32 %v8851_v41, %v3008_v46  ;;  %v3876_v5 = vrot.slane %v9067_v53, %v8356_v24 }
 0x51b   :  { %v7464_v0 = vpop.eup %7463  ;;  %7487 = vpow2.f32 %v6460_v17  ;;  %v5175_v27 = vcombine.low %v5166_v59, %v5173_v20  ;;  %v3880_v36 = vrot.slane %v9067_v53, %v8863_v14  ;;  %v3884_v49 = vrot.slane %v9067_v53, %v8866_v62 }
 0x51c   :  { %v9104_v8 = vpop.eup %7465  ;;  %v3179_v26 = vadd.f32 1.0, %v7464_v0  ;;  %v5182_v61 = vrot.slane %v5174_v31, %v8876_v52  ;;  %v6461_v44 = vmul.f32 -1.442695, %v3055_v39  ;;  %v3888_v18 = vrot.slane %v9067_v53, %v8870_v29 }
 0x51d   :  { %v9109_v19 = vpop.eup %7467  ;;  %v5189_v45 = vrot.slane %v5175_v27, %v8876_v52  ;;  %v3892_v4 = vrot.slane %v9067_v53, %v8873_v56  ;;  %v5191_v13 = vcombine.low %v3864_v11, %v3868_v37  ;;  %v5192_v30 = vcombine.low %v3872_v1, %v3876_v5  ;;  %v3010_v60 = vpop.xlane.xlu0 %3009 }
 0x51e   :  { %v9114_v32 = vpop.eup %7469  ;;  %7489 = vrcp.f32 %v3179_v26  ;;  %v5193_v7 = vcombine.low %v3880_v36, %v3884_v49  ;;  %v3056_v9 = vadd.f32 %v8851_v41, %v3010_v60  ;;  %v3896_v10 = vrot.slane %v9088_v23, %v8324_v3 }
 0x51f   :  { %v7472_v58 = vpop.eup %7471  ;;  %v5190_v35 = vcombine.low %v5182_v61, %v5189_v45  ;;  %7491 = vpow2.f32 %v6461_v44  ;;  %v5194_v28 = vcombine.low %v3888_v18, %v3892_v4  ;;  %v5201_v34 = vrot.slane %v5191_v13, %v8876_v52 }
 0x520   :  { %v9120_v15 = vpop.eup %7473  ;;  %v3180_v53 = vadd.f32 1.0, %v7472_v58  ;;  %v5208_v16 = vrot.slane %v5192_v30, %v8876_v52  ;;  %v5215_v48 = vrot.slane %v5193_v7, %v8876_v52  ;;  %v6462_v33 = vmul.f32 -1.442695, %v3056_v9 }
 0x521   :  { %v9124_v25 = vpop.eup %7475  ;;  %5929 = vperm.xlu1 %6673, %v5190_v35   ;;  %v5222_v12 = vrot.slane %v5194_v28, %v8876_v52  ;;  %v3900_v40 = vrot.slane %v9088_v23, %v8316_v51  ;;  %v3904_v47 = vrot.slane %v9088_v23, %v8362_v63  ;;  %v3908_v22 = vrot.slane %v9088_v23, %v8356_v24  ;;  %v3012_v2 = vpop.xlane.xlu0 %3011 }
 0x522   :  { %v9133_v50 = vpop.eup %7477  ;;  %7493 = vrcp.f32 %v3180_v53  ;;  %v5223_v42 = vcombine.low %v5201_v34, %v5208_v16  ;;  %v3912_v43 = vrot.slane %v9088_v23, %v8863_v14  ;;  %v3916_v55 = vrot.slane %v9088_v23, %v8866_v62 }
 0x523   :  { %v9139_v54 = vpop.eup %7479  ;;  %v5224_v11 = vcombine.low %v5215_v48, %v5222_v12  ;;  %7495 = vpow2.f32 %v6462_v33  ;;  %v3920_v6 = vrot.slane %v9088_v23, %v8870_v29  ;;  %v3924_v17 = vrot.slane %v9088_v23, %v8873_v56 }
 0x524   :  { %v9145_v57 = vpop.eup %7481  ;;  %v5231_v59 = vrot.slane %v5223_v42, %v8876_v52  ;;  %v5240_v20 = vcombine.low %v3896_v10, %v3900_v40  ;;  %v5241_v46 = vcombine.low %v3904_v47, %v3908_v22  ;;  %v5242_v37 = vcombine.low %v3912_v43, %v3916_v55 }
 0x525   :  { %v7484_v1 = vpop.eup %7483  ;;  %v5238_v31 = vrot.slane %v5224_v11, %v8876_v52  ;;  %v5243_v39 = vcombine.low %v3920_v6, %v3924_v17  ;;  %v3057_v5 = vadd.f32 %v8851_v41, %v3012_v2  ;;  %v3928_v0 = vrot.slane %v9104_v8, %v8324_v3  ;;  %v3014_v58 = vpop.xlane.xlu0 %3013 }
 0x526   :  { %v3181_v27 = vadd.f32 1.0, %v7484_v1  ;;  %v5250_v36 = vrot.slane %v5240_v20, %v8876_v52  ;;  %v5257_v23 = vrot.slane %v5241_v46, %v8876_v52  ;;  %v5264_v49 = vrot.slane %v5242_v37, %v8876_v52 }
 0x527   :  { %v9155_v26 = vpop.eup %7485  ;;  %v5239_v61 = vcombine.low %v5231_v59, %v5238_v31  ;;  %v5271_v44 = vrot.slane %v5243_v39, %v8876_v52  ;;  %v6463_v18 = vmul.f32 -1.442695, %v3057_v5  ;;  %v3932_v45 = vrot.slane %v9104_v8, %v8316_v51 }
 0x528   :  { %v7488_v4 = vpop.eup %7487  ;;  %7497 = vrcp.f32 %v3181_v27  ;;  %v5272_v13 = vcombine.low %v5250_v36, %v5257_v23  ;;  %v3936_v30 = vrot.slane %v9104_v8, %v8362_v63  ;;  %v3940_v60 = vrot.slane %v9104_v8, %v8356_v24 }
 0x529   :  { %v3182_v7 = vadd.f32 1.0, %v7488_v4  ;;  %5932 = vperm.xlu1 %6673, %v5239_v61   ;;  %v5273_v9 = vcombine.low %v5264_v49, %v5271_v44  ;;  %7499 = vpow2.f32 %v6463_v18  ;;  %v3944_v10 = vrot.slane %v9104_v8, %v8863_v14  ;;  %v3016_v36 = vpop.xlane.xlu0 %3015 }
 0x52a   :  { %v5280_v35 = vrot.slane %v5272_v13, %v8876_v52  ;;  %v3948_v28 = vrot.slane %v9104_v8, %v8866_v62  ;;  %v3952_v34 = vrot.slane %v9104_v8, %v8870_v29  ;;  %v3956_v53 = vrot.slane %v9104_v8, %v8873_v56 }
 0x52b   :  { %v9173_v16 = vpop.eup %7489  ;;  %7501 = vrcp.f32 %v3182_v7  ;;  %v5287_v48 = vrot.slane %v5273_v9, %v8876_v52  ;;  %v5289_v33 = vcombine.low %v3928_v0, %v3932_v45  ;;  %v5290_v12 = vcombine.low %v3936_v30, %v3940_v60 }
 0x52c   :  { %v7492_v40 = vpop.eup %7491  ;;  %v5291_v47 = vcombine.low %v3944_v10, %v3948_v28  ;;  %v5292_v22 = vcombine.low %v3952_v34, %v3956_v53  ;;  %v3058_v42 = vadd.f32 %v8851_v41, %v3014_v58  ;;  %v3576_v43 = vrot.slane %v9114_v32, %v8324_v3 }
 0x52d   :  { %v3183_v55 = vadd.f32 1.0, %v7492_v40  ;;  %v5288_v2 = vcombine.low %v5280_v35, %v5287_v48  ;;  %v5299_v11 = vrot.slane %v5289_v33, %v8876_v52  ;;  %v5306_v8 = vrot.slane %v5290_v12, %v8876_v52 }
 0x52e   :  { %v5313_v6 = vrot.slane %v5291_v47, %v8876_v52  ;;  %v5320_v17 = vrot.slane %v5292_v22, %v8876_v52  ;;  %v6464_v59 = vmul.f32 -1.442695, %v3058_v42  ;;  %v3580_v20 = vrot.slane %v9114_v32, %v8316_v51  ;;  %v3018_v42 = vpop.xlane.xlu0 %3017 }
 0x52f   :  { %v9185_v46 = vpop.eup %7493  ;;  %7503 = vrcp.f32 %v3183_v55  ;;  %5935 = vperm.xlu1 %6673, %v5288_v2   ;;  %v5321_v37 = vcombine.low %v5299_v11, %v5306_v8  ;;  %v3584_v1 = vrot.slane %v9114_v32, %v8362_v63  ;;  %v3588_v31 = vrot.slane %v9114_v32, %v8356_v24 }
 0x530   :  { %v7496_v39 = vpop.eup %7495  ;;  %v5322_v5 = vcombine.low %v5313_v6, %v5320_v17  ;;  %7505 = vpow2.f32 %v6464_v59  ;;  %v3592_v0 = vrot.slane %v9114_v32, %v8863_v14  ;;  %v3596_v27 = vrot.slane %v9114_v32, %v8866_v62 }
 0x531   :  { %v3184_v23 = vadd.f32 1.0, %v7496_v39  ;;  %v5329_v49 = vrot.slane %v5321_v37, %v8876_v52  ;;  %v3600_v61 = vrot.slane %v9114_v32, %v8870_v29  ;;  %v3604_v44 = vrot.slane %v9114_v32, %v8873_v56 }
 0x532   :  { %v5336_v18 = vrot.slane %v5322_v5, %v8876_v52  ;;  %v4750_v45 = vcombine.low %v3576_v43, %v3580_v20  ;;  %v4751_v4 = vcombine.low %v3584_v1, %v3588_v31  ;;  %v4752_v13 = vcombine.low %v3592_v0, %v3596_v27 }
 0x533   :  { %7507 = vrcp.f32 %v3184_v23  ;;  %v4753_v30 = vcombine.low %v3600_v61, %v3604_v44  ;;  %v3059_v60 = vadd.f32 %v8851_v41, %v3016_v36  ;;  %v3608_v7 = vrot.slane %v9109_v19, %v8324_v3 }
 0x534   :  { %v5337_v9 = vcombine.low %v5329_v49, %v5336_v18  ;;  %v4760_v10 = vrot.slane %v4750_v45, %v8876_v52  ;;  %v4767_v58 = vrot.slane %v4751_v4, %v8876_v52  ;;  %v4774_v35 = vrot.slane %v4752_v13, %v8876_v52 }
 0x535   :  { %v9207_v32 = vpop.eup %7497  ;;  %v4781_v28 = vrot.slane %v4753_v30, %v8876_v52  ;;  %v6465_v34 = vmul.f32 -1.442695, %v3059_v60  ;;  %v3612_v53 = vrot.slane %v9109_v19, %v8316_v51  ;;  %v3616_v48 = vrot.slane %v9109_v19, %v8362_v63 }
 0x536   :  { %v7500_v33 = vpop.eup %7499  ;;  %5938 = vperm.xlu1 %6673, %v5337_v9   ;;  %v4782_v12 = vcombine.low %v4760_v10, %v4767_v58  ;;  %v3620_v40 = vrot.slane %v9109_v19, %v8356_v24  ;;  %v3624_v47 = vrot.slane %v9109_v19, %v8863_v14  ;;  %v3628_v22 = vrot.slane %v9109_v19, %v8866_v62 }
 0x537   :  { %v4783_v43 = vcombine.low %v4774_v35, %v4781_v28  ;;  %7509 = vpow2.f32 %v6465_v34  ;;  %v3632_v55 = vrot.slane %v9109_v19, %v8870_v29  ;;  %v3636_v8 = vrot.slane %v9109_v19, %v8873_v56 }
 0x538   :  { %v9222_v2 = vpop.eup %7501  ;;  %v4790_v11 = vrot.slane %v4782_v12, %v8876_v52  ;;  %v4799_v6 = vcombine.low %v3608_v7, %v3612_v53  ;;  %v4800_v17 = vcombine.low %v3616_v48, %v3620_v40  ;;  %v3185_v59 = vadd.f32 1.0, %v7500_v33 }
 0x539   :  { %v4797_v20 = vrot.slane %v4783_v43, %v8876_v52  ;;  %v4801_v37 = vcombine.low %v3624_v47, %v3628_v22  ;;  %v3060_v1 = vadd.f32 %v8851_v41, %v3018_v42  ;;  %v4802_v31 = vcombine.low %v3632_v55, %v3636_v8 }
 0x53a   :  { %v4809_v39 = vrot.slane %v4799_v6, %v8876_v52  ;;  %v4816_v5 = vrot.slane %v4800_v17, %v8876_v52  ;;  %v3640_v0 = vrot.slane %v9120_v15, %v8324_v3  ;;  %v3644_v23 = vrot.slane %v9120_v15, %v8316_v51 }
 0x53b   :  { %v4798_v27 = vcombine.low %v4790_v11, %v4797_v20  ;;  %v4823_v36 = vrot.slane %v4801_v37, %v8876_v52  ;;  %v6466_v19 = vmul.f32 -1.442695, %v3060_v1  ;;  %v4830_v61 = vrot.slane %v4802_v31, %v8876_v52 }
 0x53c   :  { %v9236_v49 = vpop.eup %7503  ;;  %v4831_v41 = vcombine.low %v4809_v39, %v4816_v5  ;;  %v3648_v44 = vrot.slane %v9120_v15, %v8362_v63  ;;  %v3652_v18 = vrot.slane %v9120_v15, %v8356_v24  ;;  %v3656_v4 = vrot.slane %v9120_v15, %v8863_v14 }
 0x53d   :  { %v7506_v45 = vpop.eup %7505  ;;  %5905 = vperm.xlu0 %6674, %v4798_v27   ;;  %7511 = vpow2.f32 %v6466_v19  ;;  %v3660_v13 = vrot.slane %v9120_v15, %v8866_v62  ;;  %v3664_v30 = vrot.slane %v9120_v15, %v8870_v29  ;;  %v4832_v60 = vcombine.low %v4823_v36, %v4830_v61 }
 0x53e   :  { %7513 = vrcp.f32 %v3185_v59  ;;  %v4839_v7 = vrot.slane %v4831_v41, %v8876_v52  ;;  %v3668_v9 = vrot.slane %v9120_v15, %v8873_v56  ;;  %v3186_v10 = vadd.f32 1.0, %v7506_v45 }
 0x53f   :  { %v4848_v58 = vcombine.low %v3640_v0, %v3644_v23  ;;  %v4849_v35 = vcombine.low %v3648_v44, %v3652_v18  ;;  %v4850_v28 = vcombine.low %v3656_v4, %v3660_v13  ;;  %v4846_v53 = vrot.slane %v4832_v60, %v8876_v52 }
 0x540   :  { %v9252_v34 = vpop.eup %7507  ;;  %v4851_v48 = vcombine.low %v3664_v30, %v3668_v9  ;;  %v3960_v33 = vrot.slane %v9155_v26, %v8324_v3  ;;  %v3964_v12 = vrot.slane %v9155_v26, %v8316_v51  ;;  %v3968_v22 = vrot.slane %v9155_v26, %v8362_v63 }
 0x541   :  { %v4858_v40 = vrot.slane %v4848_v58, %v8876_v52  ;;  %v4865_v47 = vrot.slane %v4849_v35, %v8876_v52  ;;  %v4872_v15 = vrot.slane %v4850_v28, %v8876_v52  ;;  %v4847_v42 = vcombine.low %v4839_v7, %v4846_v53 }
 0x542   :  { %v4879_v43 = vrot.slane %v4851_v48, %v8876_v52  ;;  %v3972_v55 = vrot.slane %v9155_v26, %v8356_v24  ;;  %v3976_v11 = vrot.slane %v9155_v26, %v8863_v14  ;;  %v3980_v6 = vrot.slane %v9155_v26, %v8866_v62 }
 0x543   :  { %v4880_v8 = vcombine.low %v4858_v40, %v4865_v47  ;;  %v3984_v17 = vrot.slane %v9155_v26, %v8870_v29  ;;  %v3988_v59 = vrot.slane %v9155_v26, %v8873_v56  ;;  %5908 = vperm.xlu0 %6674, %v4847_v42   ;;  %v5338_v1 = vcombine.low %v3960_v33, %v3964_v12 }
 0x544   :  { %v7510_v20 = vpop.eup %7509  ;;  %v4881_v37 = vcombine.low %v4872_v15, %v4879_v43  ;;  %v5339_v31 = vcombine.low %v3968_v22, %v3972_v55  ;;  %v3672_v39 = vrot.slane %v9133_v50, %v8324_v3  ;;  %v5340_v27 = vcombine.low %v3976_v11, %v3980_v6 }
 0x545   :  { %v3187_v5 = vadd.f32 1.0, %v7510_v20  ;;  %v4888_v0 = vrot.slane %v4880_v8, %v8876_v52  ;;  %v5341_v36 = vcombine.low %v3984_v17, %v3988_v59  ;;  %v5348_v23 = vrot.slane %v5338_v1, %v8876_v52 }
 0x546   :  { %v4895_v19 = vrot.slane %v4881_v37, %v8876_v52  ;;  %v5355_v61 = vrot.slane %v5339_v31, %v8876_v52  ;;  %v3676_v26 = vrot.slane %v9133_v50, %v8316_v51  ;;  %7515 = vrcp.f32 %v3186_v10 }
 0x547   :  { %v5362_v41 = vrot.slane %v5340_v27, %v8876_v52  ;;  %v5369_v44 = vrot.slane %v5341_v36, %v8876_v52  ;;  %v3680_v18 = vrot.slane %v9133_v50, %v8362_v63  ;;  %v3684_v13 = vrot.slane %v9133_v50, %v8356_v24 }
 0x548   :  { %v4896_v45 = vcombine.low %v4888_v0, %v4895_v19  ;;  %v5370_v4 = vcombine.low %v5348_v23, %v5355_v61  ;;  %v3688_v30 = vrot.slane %v9133_v50, %v8863_v14  ;;  %v3692_v7 = vrot.slane %v9133_v50, %v8866_v62 }
 0x549   :  { %v5371_v60 = vcombine.low %v5362_v41, %v5369_v44  ;;  %v3696_v9 = vrot.slane %v9133_v50, %v8870_v29  ;;  %v3700_v10 = vrot.slane %v9133_v50, %v8873_v56  ;;  %7517 = vrcp.f32 %v3187_v5 }
 0x54a   :  { %v7512_v58 = vpop.eup %7511  ;;  %5911 = vperm.xlu0 %6674, %v4896_v45   ;;  %v5378_v35 = vrot.slane %v5370_v4, %v8876_v52  ;;  %v4897_v28 = vcombine.low %v3672_v39, %v3676_v26  ;;  %v4898_v53 = vcombine.low %v3680_v18, %v3684_v13  ;;  %v4899_v12 = vcombine.low %v3688_v30, %v3692_v7 }
 0x54b   :  { %v9298_v48 = vpop.eup %7513  ;;  %v5385_v33 = vrot.slane %v5371_v60, %v8876_v52  ;;  %v4900_v40 = vcombine.low %v3696_v9, %v3700_v10  ;;  %v3992_v47 = vrot.slane %v9173_v16, %v8324_v3  ;;  %v3996_v22 = vrot.slane %v9173_v16, %v8316_v51 }
 0x54c   :  { %v4907_v15 = vrot.slane %v4897_v28, %v8876_v52  ;;  %v4914_v50 = vrot.slane %v4898_v53, %v8876_v52  ;;  %v4000_v42 = vrot.slane %v9173_v16, %v8362_v63  ;;  %v9309_v43 = vadd.f32 1.0, %v7512_v58 }
 0x54d   :  { %v5386_v55 = vcombine.low %v5378_v35, %v5385_v33  ;;  %v4921_v11 = vrot.slane %v4899_v12, %v8876_v52  ;;  %v4928_v8 = vrot.slane %v4900_v40, %v8876_v52  ;;  %v4004_v17 = vrot.slane %v9173_v16, %v8356_v24 }
 0x54e   :  { %v4929_v6 = vcombine.low %v4907_v15, %v4914_v50  ;;  %v4008_v59 = vrot.slane %v9173_v16, %v8863_v14  ;;  %v4012_v20 = vrot.slane %v9173_v16, %v8866_v62  ;;  %v4016_v1 = vrot.slane %v9173_v16, %v8870_v29 }
 0x54f   :  { %5941 = vperm.xlu1 %6673, %v5386_v55   ;;  %v4930_v37 = vcombine.low %v4921_v11, %v4928_v8  ;;  %v4020_v31 = vrot.slane %v9173_v16, %v8873_v56  ;;  %v5387_v39 = vcombine.low %v3992_v47, %v3996_v22  ;;  %v5388_v0 = vcombine.low %v4000_v42, %v4004_v17 }
 0x550   :  { %v4937_v5 = vrot.slane %v4929_v6, %v8876_v52  ;;  %v5389_v27 = vcombine.low %v4008_v59, %v4012_v20  ;;  %v3704_v36 = vrot.slane %v9145_v57, %v8324_v3  ;;  %v3708_v26 = vrot.slane %v9145_v57, %v8316_v51 }
 0x551   :  { %v4944_v19 = vrot.slane %v4930_v37, %v8876_v52  ;;  %v5390_v23 = vcombine.low %v4016_v1, %v4020_v31  ;;  %v5397_v61 = vrot.slane %v5387_v39, %v8876_v52  ;;  %v5404_v41 = vrot.slane %v5388_v0, %v8876_v52 }
 0x552   :  { %v5411_v16 = vrot.slane %v5389_v27, %v8876_v52  ;;  %v3712_v44 = vrot.slane %v9145_v57, %v8362_v63  ;;  %v3716_v18 = vrot.slane %v9145_v57, %v8356_v24  ;;  %v3720_v13 = vrot.slane %v9145_v57, %v8863_v14 }
 0x553   :  { %v4945_v45 = vcombine.low %v4937_v5, %v4944_v19  ;;  %v5418_v4 = vrot.slane %v5390_v23, %v8876_v52  ;;  %v3724_v30 = vrot.slane %v9145_v57, %v8866_v62  ;;  %v9341_v60 = vpop.eup %7515  ;;  %v5419_v7 = vcombine.low %v5397_v61, %v5404_v41 }
 0x554   :  { %v3728_v9 = vrot.slane %v9145_v57, %v8870_v29  ;;  %v3732_v10 = vrot.slane %v9145_v57, %v8873_v56  ;;  %v4946_v58 = vcombine.low %v3704_v36, %v3708_v26  ;;  %v4947_v28 = vcombine.low %v3712_v44, %v3716_v18 }
 0x555   :  { %5914 = vperm.xlu0 %6674, %v4945_v45   ;;  %v5420_v35 = vcombine.low %v5411_v16, %v5418_v4  ;;  %v4948_v53 = vcombine.low %v3720_v13, %v3724_v30  ;;  %v4024_v33 = vrot.slane %v9185_v46, %v8324_v3  ;;  %v5427_v12 = vrot.slane %v5419_v7, %v8876_v52 }
 0x556   :  { %v4949_v40 = vcombine.low %v3728_v9, %v3732_v10  ;;  %v4956_v47 = vrot.slane %v4946_v58, %v8876_v52  ;;  %v4028_v15 = vrot.slane %v9185_v46, %v8316_v51  ;;  %v9353_v50 = vpop.eup %7517  ;;  %v4963_v22 = vrot.slane %v4947_v28, %v8876_v52 }
 0x557   :  { %v5434_v57 = vrot.slane %v5420_v35, %v8876_v52  ;;  %v4970_v42 = vrot.slane %v4948_v53, %v8876_v52  ;;  %v4032_v55 = vrot.slane %v9185_v46, %v8362_v63  ;;  %v4036_v8 = vrot.slane %v9185_v46, %v8356_v24 }
 0x558   :  { %v4977_v11 = vrot.slane %v4949_v40, %v8876_v52  ;;  %v4040_v6 = vrot.slane %v9185_v46, %v8863_v14  ;;  %v4044_v17 = vrot.slane %v9185_v46, %v8866_v62  ;;  %v4978_v20 = vcombine.low %v4956_v47, %v4963_v22 }
 0x559   :  { %v5435_v59 = vcombine.low %v5427_v12, %v5434_v57  ;;  %v4048_v37 = vrot.slane %v9185_v46, %v8870_v29  ;;  %v4052_v1 = vrot.slane %v9185_v46, %v8873_v56  ;;  %v5436_v39 = vcombine.low %v4024_v33, %v4028_v15 }
 0x55a   :  { %v4979_v31 = vcombine.low %v4970_v42, %v4977_v11  ;;  %v5437_v5 = vcombine.low %v4032_v55, %v4036_v8  ;;  %v5438_v0 = vcombine.low %v4040_v6, %v4044_v17  ;;  %v4986_v27 = vrot.slane %v4978_v20, %v8876_v52 }
 0x55b   :  { %5944 = vperm.xlu1 %6673, %v5435_v59   ;;  %v5439_v36 = vcombine.low %v4048_v37, %v4052_v1  ;;  %v3736_v19 = vrot.slane %v9124_v25, %v8324_v3  ;;  %v3740_v23 = vrot.slane %v9124_v25, %v8316_v51  ;;  %v5446_v26 = vrot.slane %v5436_v39, %v8876_v52 }
 0x55c   :  { %v4993_v61 = vrot.slane %v4979_v31, %v8876_v52  ;;  %v5453_v46 = vrot.slane %v5437_v5, %v8876_v52  ;;  %v5460_v41 = vrot.slane %v5438_v0, %v8876_v52  ;;  %v3744_v44 = vrot.slane %v9124_v25, %v8362_v63 }
 0x55d   :  { %v5467_v16 = vrot.slane %v5439_v36, %v8876_v52  ;;  %v3748_v18 = vrot.slane %v9124_v25, %v8356_v24  ;;  %v3752_v45 = vrot.slane %v9124_v25, %v8863_v14  ;;  %v3756_v30 = vrot.slane %v9124_v25, %v8866_v62 }
 0x55e   :  { %v4994_v4 = vcombine.low %v4986_v27, %v4993_v61  ;;  %v5468_v13 = vcombine.low %v5446_v26, %v5453_v46  ;;  %v3760_v7 = vrot.slane %v9124_v25, %v8870_v29  ;;  %v3764_v10 = vrot.slane %v9124_v25, %v8873_v56 }
 0x55f   :  { %v5469_v9 = vcombine.low %v5460_v41, %v5467_v16  ;;  %v4995_v58 = vcombine.low %v3736_v19, %v3740_v23  ;;  %v4996_v35 = vcombine.low %v3744_v44, %v3748_v18  ;;  %v4997_v53 = vcombine.low %v3752_v45, %v3756_v30 }
 0x560   :  { %5917 = vperm.xlu0 %6674, %v4994_v4   ;;  %v5476_v28 = vrot.slane %v5468_v13, %v8876_v52  ;;  %v4056_v33 = vrot.slane %v9207_v32, %v8324_v3  ;;  %v4060_v12 = vrot.slane %v9207_v32, %v8316_v51  ;;  %v4998_v47 = vcombine.low %v3760_v7, %v3764_v10 }
 0x561   :  { %v5483_v40 = vrot.slane %v5469_v9, %v8876_v52  ;;  %v5005_v15 = vrot.slane %v4995_v58, %v8876_v52  ;;  %v5012_v57 = vrot.slane %v4996_v35, %v8876_v52  ;;  %v5019_v25 = vrot.slane %v4997_v53, %v8876_v52 }
 0x562   :  { %v4064_v22 = vrot.slane %v9207_v32, %v8362_v63  ;;  %v4068_v42 = vrot.slane %v9207_v32, %v8356_v24  ;;  %v4072_v55 = vrot.slane %v9207_v32, %v8863_v14  ;;  %v5026_v8 = vrot.slane %v4998_v47, %v8876_v52 }
 0x563   :  { %v5484_v11 = vcombine.low %v5476_v28, %v5483_v40  ;;  %v5027_v6 = vcombine.low %v5005_v15, %v5012_v57  ;;  %v4076_v17 = vrot.slane %v9207_v32, %v8866_v62  ;;  %v4080_v59 = vrot.slane %v9207_v32, %v8870_v29 }
 0x564   :  { %v4084_v20 = vrot.slane %v9207_v32, %v8873_v56  ;;  %v5485_v37 = vcombine.low %v4056_v33, %v4060_v12  ;;  %v5486_v1 = vcombine.low %v4064_v22, %v4068_v42  ;;  %v5028_v31 = vcombine.low %v5019_v25, %v5026_v8 }
 0x565   :  { %5947 = vperm.xlu1 %6673, %v5484_v11   ;;  %v5035_v39 = vrot.slane %v5027_v6, %v8876_v52  ;;  %v5487_v5 = vcombine.low %v4072_v55, %v4076_v17  ;;  %v3768_v0 = vrot.slane %v9139_v54, %v8324_v3  ;;  %v3772_v23 = vrot.slane %v9139_v54, %v8316_v51 }
 0x566   :  { %v5488_v27 = vcombine.low %v4080_v59, %v4084_v20  ;;  %v5495_v36 = vrot.slane %v5485_v37, %v8876_v52  ;;  %v5502_v19 = vrot.slane %v5486_v1, %v8876_v52  ;;  %v5042_v32 = vrot.slane %v5028_v31, %v8876_v52 }
 0x567   :  { %v5509_v61 = vrot.slane %v5487_v5, %v8876_v52  ;;  %v3776_v26 = vrot.slane %v9139_v54, %v8362_v63  ;;  %v3780_v46 = vrot.slane %v9139_v54, %v8356_v24  ;;  %v3784_v44 = vrot.slane %v9139_v54, %v8863_v14 }
 0x568   :  { %v5516_v41 = vrot.slane %v5488_v27, %v8876_v52  ;;  %v5517_v16 = vcombine.low %v5495_v36, %v5502_v19  ;;  %v3788_v18 = vrot.slane %v9139_v54, %v8866_v62  ;;  %v5043_v45 = vcombine.low %v5035_v39, %v5042_v32 }
 0x569   :  { %v3792_v4 = vrot.slane %v9139_v54, %v8870_v29  ;;  %v3796_v13 = vrot.slane %v9139_v54, %v8873_v56  ;;  %v5044_v30 = vcombine.low %v3768_v0, %v3772_v23  ;;  %v5045_v10 = vcombine.low %v3776_v26, %v3780_v46 }
 0x56a   :  { %v5518_v7 = vcombine.low %v5509_v61, %v5516_v41  ;;  %v5525_v9 = vrot.slane %v5517_v16, %v8876_v52  ;;  %v5046_v58 = vcombine.low %v3784_v44, %v3788_v18  ;;  %5920 = vperm.xlu0 %6674, %v5043_v45   ;;  %v4088_v53 = vrot.slane %v9222_v2, %v8324_v3 }
 0x56b   :  { %v5047_v35 = vcombine.low %v3792_v4, %v3796_v13  ;;  %v5054_v28 = vrot.slane %v5044_v30, %v8876_v52  ;;  %v4092_v33 = vrot.slane %v9222_v2, %v8316_v51  ;;  %v5061_v54 = vrot.slane %v5045_v10, %v8876_v52 }
 0x56c   :  { %v5532_v12 = vrot.slane %v5518_v7, %v8876_v52  ;;  %v5068_v40 = vrot.slane %v5046_v58, %v8876_v52  ;;  %v4096_v47 = vrot.slane %v9222_v2, %v8362_v63  ;;  %v4100_v57 = vrot.slane %v9222_v2, %v8356_v24 }
 0x56d   :  { %v5075_v15 = vrot.slane %v5047_v35, %v8876_v52  ;;  %v4104_v25 = vrot.slane %v9222_v2, %v8863_v14  ;;  %v4108_v22 = vrot.slane %v9222_v2, %v8866_v62  ;;  %v5076_v55 = vcombine.low %v5054_v28, %v5061_v54 }
 0x56e   :  { %v5533_v42 = vcombine.low %v5525_v9, %v5532_v12  ;;  %v4112_v11 = vrot.slane %v9222_v2, %v8870_v29  ;;  %v4116_v8 = vrot.slane %v9222_v2, %v8873_v56  ;;  %v5534_v17 = vcombine.low %v4088_v53, %v4092_v33 }
 0x56f   :  { %v5077_v6 = vcombine.low %v5068_v40, %v5075_v15  ;;  %v5535_v59 = vcombine.low %v4096_v47, %v4100_v57  ;;  %v5536_v20 = vcombine.low %v4104_v25, %v4108_v22  ;;  %v5084_v37 = vrot.slane %v5076_v55, %v8876_v52 }
 0x570   :  { %5950 = vperm.xlu1 %6673, %v5533_v42   ;;  %v5537_v1 = vcombine.low %v4112_v11, %v4116_v8  ;;  %v4120_v31 = vrot.slane %v9236_v49, %v8324_v3  ;;  %v4124_v39 = vrot.slane %v9236_v49, %v8316_v51  ;;  %v5544_v0 = vrot.slane %v5534_v17, %v8876_v52 }
 0x571   :  { %v5091_v5 = vrot.slane %v5077_v6, %v8876_v52  ;;  %v5551_v2 = vrot.slane %v5535_v59, %v8876_v52  ;;  %v5558_v27 = vrot.slane %v5536_v20, %v8876_v52  ;;  %v4128_v19 = vrot.slane %v9236_v49, %v8362_v63 }
 0x572   :  { %v5565_v36 = vrot.slane %v5537_v1, %v8876_v52  ;;  %v4132_v23 = vrot.slane %v9236_v49, %v8356_v24  ;;  %v4136_v32 = vrot.slane %v9236_v49, %v8863_v14  ;;  %v4140_v46 = vrot.slane %v9236_v49, %v8866_v62 }
 0x573   :  { %v5092_v61 = vcombine.low %v5084_v37, %v5091_v5  ;;  %v5566_v26 = vcombine.low %v5544_v0, %v5551_v2  ;;  %v4144_v41 = vrot.slane %v9236_v49, %v8870_v29  ;;  %v4148_v44 = vrot.slane %v9236_v49, %v8873_v56 }
 0x574   :  { %v5567_v16 = vcombine.low %v5558_v27, %v5565_v36  ;;  %v5583_v18 = vcombine.low %v4120_v31, %v4124_v39  ;;  %v5584_v45 = vcombine.low %v4128_v19, %v4132_v23  ;;  %v5585_v13 = vcombine.low %v4136_v32, %v4140_v46 }
 0x575   :  { %5923 = vperm.xlu0 %6674, %v5092_v61   ;;  %v5574_v4 = vrot.slane %v5566_v26, %v8876_v52  ;;  %v4152_v30 = vrot.slane %v9252_v34, %v8324_v3  ;;  %v4156_v7 = vrot.slane %v9252_v34, %v8316_v51  ;;  %v5586_v10 = vcombine.low %v4144_v41, %v4148_v44 }
 0x576   :  { %v5581_v9 = vrot.slane %v5567_v16, %v8876_v52  ;;  %v5593_v58 = vrot.slane %v5583_v18, %v8876_v52  ;;  %v5600_v35 = vrot.slane %v5584_v45, %v8876_v52  ;;  %v5607_v49 = vrot.slane %v5585_v13, %v8876_v52 }
 0x577   :  { %v4160_v28 = vrot.slane %v9252_v34, %v8362_v63  ;;  %v4164_v53 = vrot.slane %v9252_v34, %v8356_v24  ;;  %v4168_v33 = vrot.slane %v9252_v34, %v8863_v14  ;;  %v5614_v54 = vrot.slane %v5586_v10, %v8876_v52 }
 0x578   :  { %v5582_v12 = vcombine.low %v5574_v4, %v5581_v9  ;;  %v5615_v40 = vcombine.low %v5593_v58, %v5600_v35  ;;  %v4172_v47 = vrot.slane %v9252_v34, %v8866_v62  ;;  %v4176_v15 = vrot.slane %v9252_v34, %v8870_v29 }
 0x579   :  { %v4180_v57 = vrot.slane %v9252_v34, %v8873_v56  ;;  %v5632_v25 = vcombine.low %v4152_v30, %v4156_v7  ;;  %v5633_v22 = vcombine.low %v4160_v28, %v4164_v53  ;;  %7519 = vrcp.f32 %v9309_v43 }
 0x57a   :  { %5953 = vperm.xlu1 %6673, %v5582_v12   ;;  %v5616_v42 = vcombine.low %v5607_v49, %v5614_v54  ;;  %v5623_v55 = vrot.slane %v5615_v40, %v8876_v52  ;;  %v5634_v11 = vcombine.low %v4168_v33, %v4172_v47  ;;  %v4184_v59 = vrot.slane %v9298_v48, %v8324_v3 }
 0x57b   :  { %v5635_v8 = vcombine.low %v4176_v15, %v4180_v57  ;;  %v5642_v6 = vrot.slane %v5632_v25, %v8876_v52  ;;  %v5649_v17 = vrot.slane %v5633_v22, %v8876_v52  ;;  %v4188_v43 = vrot.slane %v9298_v48, %v8316_v51 }
 0x57c   :  { %v5630_v20 = vrot.slane %v5616_v42, %v8876_v52  ;;  %v5656_v34 = vrot.slane %v5634_v11, %v8876_v52  ;;  %v4192_v37 = vrot.slane %v9298_v48, %v8362_v63  ;;  %v4196_v39 = vrot.slane %v9298_v48, %v8356_v24 }
 0x57d   :  { %v5663_v1 = vrot.slane %v5635_v8, %v8876_v52  ;;  %v5664_v31 = vcombine.low %v5642_v6, %v5649_v17  ;;  %v4200_v5 = vrot.slane %v9298_v48, %v8863_v14  ;;  %v4204_v2 = vrot.slane %v9298_v48, %v8866_v62 }
 0x57e   :  { %v5631_v0 = vcombine.low %v5623_v55, %v5630_v20  ;;  %v4208_v27 = vrot.slane %v9298_v48, %v8870_v29  ;;  %v4212_v36 = vrot.slane %v9298_v48, %v8873_v56  ;;  %v5681_v32 = vcombine.low %v4184_v59, %v4188_v43 }
 0x57f   :  { %v5665_v19 = vcombine.low %v5656_v34, %v5663_v1  ;;  %v5672_v23 = vrot.slane %v5664_v31, %v8876_v52  ;;  %v5682_v61 = vcombine.low %v4192_v37, %v4196_v39  ;;  %v5683_v26 = vcombine.low %v4200_v5, %v4204_v2 }
 0x580   :  { %5956 = vperm.xlu1 %6673, %v5631_v0   ;;  %v5684_v46 = vcombine.low %v4208_v27, %v4212_v36  ;;  %v5691_v16 = vrot.slane %v5681_v32, %v8876_v52  ;;  %v4216_v18 = vrot.slane %v9341_v60, %v8324_v3  ;;  %v4220_v4 = vrot.slane %v9341_v60, %v8316_v51 }
 0x581   :  { %v5679_v41 = vrot.slane %v5665_v19, %v8876_v52  ;;  %v5698_v44 = vrot.slane %v5682_v61, %v8876_v52  ;;  %v5705_v45 = vrot.slane %v5683_v26, %v8876_v52  ;;  %v4224_v7 = vrot.slane %v9341_v60, %v8362_v63 }
 0x582   :  { %v5712_v48 = vrot.slane %v5684_v46, %v8876_v52  ;;  %v4228_v9 = vrot.slane %v9341_v60, %v8356_v24  ;;  %v4232_v58 = vrot.slane %v9341_v60, %v8863_v14  ;;  %v4236_v35 = vrot.slane %v9341_v60, %v8866_v62 }
 0x583   :  { %v5680_v13 = vcombine.low %v5672_v23, %v5679_v41  ;;  %v5713_v30 = vcombine.low %v5691_v16, %v5698_v44  ;;  %v4240_v28 = vrot.slane %v9341_v60, %v8870_v29  ;;  %v4244_v53 = vrot.slane %v9341_v60, %v8873_v56 }
 0x584   :  { %v5714_v10 = vcombine.low %v5705_v45, %v5712_v48  ;;  %v5730_v33 = vcombine.low %v4216_v18, %v4220_v4  ;;  %v5731_v54 = vcombine.low %v4224_v7, %v4228_v9  ;;  %v5732_v40 = vcombine.low %v4232_v58, %v4236_v35 }
 0x585   :  { %5959 = vperm.xlu1 %6673, %v5680_v13   ;;  %v5721_v49 = vrot.slane %v5713_v30, %v8876_v52  ;;  %v5733_v15 = vcombine.low %v4240_v28, %v4244_v53  ;;  %v4248_v25 = vrot.slane %v9353_v50, %v8324_v3  ;;  %v4252_v60 = vrot.slane %v9353_v50, %v8316_v51 }
 0x586   :  { %v5728_v12 = vrot.slane %v5714_v10, %v8876_v52  ;;  %v7520_v47 = vpop.eup %7519  ;;  %v5740_v57 = vrot.slane %v5730_v33, %v8876_v52  ;;  %v5747_v42 = vrot.slane %v5731_v54, %v8876_v52  ;;  %v5754_v55 = vrot.slane %v5732_v40, %v8876_v52 }
 0x587   :  { %v5761_v11 = vrot.slane %v5733_v15, %v8876_v52  ;;  %v4256_v8 = vrot.slane %v9353_v50, %v8362_v63  ;;  %v4260_v6 = vrot.slane %v9353_v50, %v8356_v24  ;;  %v4264_v59 = vrot.slane %v9353_v50, %v8863_v14  ;;  %v5882_v15 = vpop.permute.xlu0 %5881 }
 0x588   :  { %v5729_v22 = vcombine.low %v5721_v49, %v5728_v12  ;;  %v5762_v17 = vcombine.low %v5740_v57, %v5747_v42  ;;  %v4268_v20 = vrot.slane %v9353_v50, %v8866_v62  ;;  %v4272_v43 = vrot.slane %v9353_v50, %v8870_v29  ;;  %v5879_v49 = vpop.permute.xlu1 %5878 }
 0x589   :  { %v5763_v34 = vcombine.low %v5754_v55, %v5761_v11  ;;  %v4276_v37 = vrot.slane %v9353_v50, %v8873_v56  ;;  %v5779_v1 = vcombine.low %v4248_v25, %v4252_v60  ;;  %v5780_v39 = vcombine.low %v4256_v8, %v4260_v6 }
 0x58a   :  { %5962 = vperm.xlu1 %6673, %v5729_v22   ;;  %v5770_v31 = vrot.slane %v5762_v17, %v8876_v52  ;;  %v5781_v5 = vcombine.low %v4264_v59, %v4268_v20  ;;  %v4280_v23 = vrot.slane %v7520_v47, %v8324_v3  ;;  %v4284_v50 = vrot.slane %v7520_v47, %v8316_v51 }
 0x58b   :  { %v5777_v0 = vrot.slane %v5763_v34, %v8876_v52  ;;  %v5782_v2 = vcombine.low %v4272_v43, %v4276_v37  ;;  %v5789_v27 = vrot.slane %v5779_v1, %v8876_v52  ;;  %v5796_v36 = vrot.slane %v5780_v39, %v8876_v52  ;;  %v5894_v25 = vpop.permute.xlu0 %5893 }
 0x58c   :  { %v5803_v19 = vrot.slane %v5781_v5, %v8876_v52  ;;  %v4288_v46 = vrot.slane %v7520_v47, %v8362_v63  ;;  %v4292_v41 = vrot.slane %v7520_v47, %v8356_v24  ;;  %v4296_v16 = vrot.slane %v7520_v47, %v8863_v14  ;;  %v5885_v28 = vpop.permute.xlu1 %5884 }
 0x58d   :  { %v5778_v32 = vcombine.low %v5770_v31, %v5777_v0  ;;  %v5810_v61 = vrot.slane %v5782_v2, %v8876_v52  ;;  %v5811_v26 = vcombine.low %v5789_v27, %v5796_v36  ;;  %v4300_v18 = vrot.slane %v7520_v47, %v8866_v62 }
 0x58e   :  { %v4304_v45 = vrot.slane %v7520_v47, %v8870_v29  ;;  %v4308_v48 = vrot.slane %v7520_v47, %v8873_v56  ;;  %v5828_v4 = vcombine.low %v4280_v23, %v4284_v50  ;;  %v5829_v13 = vcombine.low %v4288_v46, %v4292_v41 }
 0x58f   :  { %5965 = vperm.xlu1 %6673, %v5778_v32   ;;  %v5812_v44 = vcombine.low %v5803_v19, %v5810_v61  ;;  %v5819_v3 = vrot.slane %v5811_v26, %v8876_v52  ;;  %v5830_v30 = vcombine.low %v4296_v16, %v4300_v18  ;;  %v5897_v42 = vpop.permute.xlu0 %5896  ;;  %v9619_v34 = vand.u32 127, %v944_v21 }
 0x590   :  { %v5831_v63 = vcombine.low %v4304_v45, %v4308_v48  ;;  %v5838_v24 = vrot.slane %v5828_v4, %v8876_v52  ;;  %v5845_v14 = vrot.slane %v5829_v13, %v8876_v52  ;;  %v5888_v53 = vpop.permute.xlu1 %5887 }
 0x591   :  { %v5826_v51 = vrot.slane %v5812_v44, %v8876_v52  ;;  %v5852_v9 = vrot.slane %v5830_v30, %v8876_v52  ;;  %v5979_v43 = vadd.s32 4294967288, %v9619_v34  ;;  %v5986_v37 = vadd.s32 4294967280, %v9619_v34 }
 0x592   :  { %v5859_v62 = vrot.slane %v5831_v63, %v8876_v52  ;;  %v5860_v29 = vcombine.low %v5838_v24, %v5845_v14  ;;  %v5993_v31 = vadd.s32 4294967272, %v9619_v34  ;;  %v6000_v39 = vadd.s32 4294967264, %v9619_v34 }
 0x593   :  { %v5827_v7 = vcombine.low %v5819_v3, %v5826_v51  ;;  %v5900_v11 = vpop.permute.xlu0 %5899  ;;  %v5982_v0 = vsub.s32 %v5979_v43, %v8313_v38  ;;  %v6007_v2 = vadd.s32 4294967256, %v9619_v34  ;;  %v5989_v27 = vsub.s32 %v5986_v37, %v8313_v38 }
 0x594   :  { %v5861_v10 = vcombine.low %v5852_v9, %v5859_v62  ;;  %v5868_v56 = vrot.slane %v5860_v29, %v8876_v52  ;;  %v5891_v33 = vpop.permute.xlu1 %5890  ;;  %v6014_v36 = vadd.s32 4294967248, %v9619_v34  ;;  %v5977_v19 = vsub.s32 %v9619_v34, %v8313_v38 }
 0x595   :  { %5968 = vperm.xlu1 %6673, %v5827_v7   ;;  %v5996_v23 = vsub.s32 %v5993_v31, %v8313_v38  ;;  %v6021_v32 = vadd.s32 4294967240, %v9619_v34  ;;  %v9638_v61 = vsub.s32 %v6000_v39, %v8313_v38  ;;  %v5983_v26 = vrot.slane %v5882_v15, %v5982_v0 }
 0x596   :  { %v5875_v58 = vrot.slane %v5861_v10, %v8876_v52  ;;  %v9643_v46 = vsub.s32 %v6007_v2, %v8313_v38  ;;  %v5990_v41 = vrot.slane %v5885_v28, %v5989_v27  ;;  %v9646_v16 = vsub.s32 %v6014_v36, %v8313_v38 }
 0x597   :  { %v9608_v8 = vpop.permute.xlu0 %5902  ;;  %v6028_v44 = vadd.s32 4294967232, %v9619_v34  ;;  %v5978_v45 = vrot.slane %v5879_v49, %v5977_v19  ;;  %v5997_v3 = vrot.slane %v5888_v53, %v5996_v23  ;;  %v9652_v48 = vsub.s32 %v6021_v32, %v8313_v38 }
 0x598   :  { %v5876_v35 = vcombine.low %v5868_v56, %v5875_v58  ;;  %v9592_v12 = vpop.permute.xlu1 %5926  ;;  %v6004_v4 = vrot.slane %v5891_v33, %v9638_v61  ;;  %v6011_v51 = vrot.slane %v5894_v25, %v9643_v46  ;;  %v6018_v63 = vrot.slane %v5897_v42, %v9646_v16 }
 0x599   :  { %v5985_v13 = vsel %vm5984_vm1, %v5983_v26, %v5978_v45  ;;  %v6031_v24 = vsub.s32 %v6028_v44, %v8313_v38  ;;  %v6025_v9 = vrot.slane %v5900_v11, %v9652_v48  ;;  %v6035_v62 = vadd.s32 4294967224, %v9619_v34 }
 0x59a   :  { %5971 = vperm.xlu1 %6673, %v5876_v35   ;;  %v5992_v30 = vsel %vm5991_vm2, %v5990_v41, %v5985_v13  ;;  %v6042_v10 = vadd.s32 4294967216, %v9619_v34  ;;  %v6087_v35 = vrot.slane %v9592_v12, %v5977_v19  ;;  %v6049_v11 = vadd.s32 4294967208, %v9619_v34 }
 0x59b   :  { %v5999_v7 = vsel %vm5998_vm3, %v5997_v3, %v5992_v30  ;;  %v6032_v53 = vrot.slane %v9608_v8, %v6031_v24  ;;  %v6038_v42 = vsub.s32 %v6035_v62, %v8313_v38  ;;  %v6056_v43 = vadd.s32 4294967200, %v9619_v34 }
 0x59c   :  { %v9594_v54 = vpop.permute.xlu1 %5929  ;;  %v6006_v29 = vsel %vm6005_vm4, %v6004_v4, %v5999_v7  ;;  %v6052_v36 = vsub.s32 %v6049_v11, %v8313_v38 }
 0x59d   :  { %v6013_v58 = vsel %vm6012_vm5, %v6011_v51, %v6006_v29  ;;  %v6091_v49 = vrot.slane %v9594_v54, %v5982_v0  ;;  %v6045_v54 = vsub.s32 %v6042_v10, %v8313_v38  ;;  %v6070_v0 = vadd.s32 4294967184, %v9619_v34 }
 0x59e   :  { %v6020_v28 = vsel %vm6019_vm6, %v6018_v63, %v6013_v58  ;;  %v6059_v32 = vsub.s32 %v6056_v43, %v8313_v38 }
 0x59f   :  { %v6027_v15 = vsel %vm6026_vm7, %v6025_v9, %v6020_v28 }
 0x5a0   :  { %v6034_v31 = vsel %vm6033_vm8, %v6032_v53, %v6027_v15 }
 0x5a4   :  { %v9596_v40 = vpop.permute.xlu1 %5932 }
 0x5a5   :  { %v6096_v33 = vrot.slane %v9596_v40, %v5989_v27  ;;  %v6092_v40 = vsel %vm5984_vm1, %v6091_v49, %v6087_v35 }
 0x5a7   :  { %v6097_v39 = vsel %vm5991_vm2, %v6096_v33, %v6092_v40 }
 0x5aa   :  { %v9598_v47 = vpop.permute.xlu1 %5935 }
 0x5ab   :  { %v6101_v25 = vrot.slane %v9598_v47, %v5996_v23  ;;  %v6063_v47 = vadd.s32 4294967192, %v9619_v34 }
 0x5ad   :  { %v6102_v27 = vsel %vm5998_vm3, %v6101_v25, %v6097_v39 }
 0x5b1   :  { %v9600_v57 = vpop.permute.xlu1 %5938 }
 0x5b2   :  { %v6106_v12 = vrot.slane %v9600_v57, %v9638_v61 }
 0x5b4   :  { %v6107_v23 = vsel %vm6005_vm4, %v6106_v12, %v6102_v27 }
 0x5b8   :  { %v9612_v17 = vpop.permute.xlu0 %5905 }
 0x5be   :  { %v9616_v20 = vpop.permute.xlu0 %5908 }
 0x5c5   :  { %v9627_v5 = vpop.permute.xlu0 %5911 }
 0x5c6   :  { %v6053_v3 = vrot.slane %v9627_v5, %v6052_v36 }
 0x5ca   :  { %v9602_v22 = vpop.permute.xlu1 %5941 }
 0x5cb   :  { %v6111_v37 = vrot.slane %v9602_v22, %v9643_v46  ;;  %v6077_v22 = vadd.s32 4294967176, %v9619_v34  ;;  %v6066_v46 = vsub.s32 %v6063_v47, %v8313_v38  ;;  %v6073_v34 = vsub.s32 %v6070_v0, %v8313_v38 }
 0x5cd   :  { %v6112_v26 = vsel %vm6012_vm5, %v6111_v37, %v6107_v23 }
 0x5d0   :  { %v9649_v18 = vpop.permute.xlu0 %5914 }
 0x5d1   :  { %v6060_v4 = vrot.slane %v9649_v18, %v6059_v32 }
 0x5d6   :  { %v9604_v55 = vpop.permute.xlu1 %5944 }
 0x5d7   :  { %v6116_v57 = vrot.slane %v9604_v55, %v9646_v16  ;;  %v6039_v55 = vrot.slane %v9612_v17, %v6038_v42  ;;  %v6046_v16 = vrot.slane %v9616_v20, %v6045_v54  ;;  %v6080_v17 = vsub.s32 %v6077_v22, %v8313_v38 }
 0x5d9   :  { %v6041_v51 = vsel %vm6040_vm9, %v6039_v55, %v6034_v31 }
 0x5da   :  { %v6048_v63 = vsel %vm6047_vm10, %v6046_v16, %v6041_v51 }
 0x5db   :  { %v9667_v56 = vpop.permute.xlu0 %5917  ;;  %v6055_v18 = vsel %vm6054_vm11, %v6053_v3, %v6048_v63 }
 0x5e0   :  { %v9606_v60 = vpop.permute.xlu1 %5947 }
 0x5e1   :  { %v6121_v19 = vrot.slane %v9606_v60, %v9652_v48  ;;  %v6117_v60 = vsel %vm6019_vm6, %v6116_v57, %v6112_v26 }
 0x5e5   :  { %v5921_v2 = vpop.permute.xlu0 %5920 }
 0x5e6   :  { %v6074_v38 = vrot.slane %v5921_v2, %v6073_v34 }
 0x5eb   :  { %v9610_v6 = vpop.permute.xlu1 %5950 }
 0x5ec   :  { %v6126_v61 = vrot.slane %v9610_v6, %v6031_v24  ;;  %v6122_v6 = vsel %vm6026_vm7, %v6121_v19, %v6117_v60 }
 0x5f0   :  { %v5924_v20 = vpop.permute.xlu0 %5923 }
 0x5f1   :  { %v6081_v7 = vrot.slane %v5924_v20, %v6080_v17 }
 0x5f5   :  { %v9614_v59 = vpop.permute.xlu1 %5953 }
 0x5f6   :  { %v6131_v41 = vrot.slane %v9614_v59, %v6038_v42  ;;  %v6127_v59 = vsel %vm6033_vm8, %v6126_v61, %v6122_v6 }
 0x5f8   :  { %v6132_v5 = vsel %vm6040_vm9, %v6131_v41, %v6127_v59 }
 0x5fb   :  { %v9623_v1 = vpop.permute.xlu1 %5956 }
 0x5fc   :  { %v6136_v44 = vrot.slane %v9623_v1, %v6045_v54  ;;  %v6067_v1 = vrot.slane %v9667_v56, %v6066_v46 }
 0x600   :  { %v9640_v50 = vpop.permute.xlu1 %5959 }
 0x601   :  { %v6141_v48 = vrot.slane %v9640_v50, %v6052_v36  ;;  %v6137_v50 = vsel %vm6047_vm10, %v6136_v44, %v6132_v5 }
 0x603   :  { %v6142_v9 = vsel %vm6054_vm11, %v6141_v48, %v6137_v50 }
 0x605   :  { %v9660_v14 = vpop.permute.xlu1 %5962 }
 0x606   :  { %v6146_v13 = vrot.slane %v9660_v14, %v6059_v32  ;;  %v6062_v14 = vsel %vm6061_vm12, %v6060_v4, %v6055_v18 }
 0x607   :  { %v6069_v10 = vsel %vm6068_vm13, %v6067_v1, %v6062_v14 }
 0x608   :  { %v6147_v62 = vsel %vm6061_vm12, %v6146_v13, %v6142_v9  ;;  %v6076_v35 = vsel %vm6075_vm14, %v6074_v38, %v6069_v10 }
 0x609   :  { %v6083_v28 = vsel %vm6082_vm15, %v6081_v7, %v6076_v35 }
 0x60a   :  { %v5966_v8 = vpop.permute.xlu1 %5965 }
 0x60b   :  { %v6151_v30 = vrot.slane %v5966_v8, %v6066_v46 }
 0x60d   :  { %v6152_v56 = vsel %vm6068_vm13, %v6151_v30, %v6147_v62 }
 0x610   :  { %v5969_v45 = vpop.permute.xlu1 %5968 }
 0x611   :  { %v6156_v24 = vrot.slane %v5969_v45, %v6073_v34 }
 0x613   :  { %v6157_v49 = vsel %vm6075_vm14, %v6156_v24, %v6152_v56 }
 0x615   :  { %v5972_v29 = vpop.permute.xlu1 %5971 }
 0x616   :  { %v6161_v58 = vrot.slane %v5972_v29, %v6080_v17 }
 0x618   :  { %v6162_v53 = vsel %vm6082_vm15, %v6161_v58, %v6157_v49 }
 0x619   :  { %v6163_v33 = vcombine.low %v6083_v28, %v6162_v53 }
 0x61b   :  { %v6170_v15 = vrot.slane %v6163_v33, %v8876_v52 }
 0x61d   :  { %v6177_v25 = vrot.slane %v6170_v15, %v8876_v52 }
 0x61f   :  { %6183 = vst.msk [vmem:[#allocation3] sm:$0x3] %vm6181_vm0, %v6177_v25 }
 0x620   :  { %7532 = shalt.err (!%p7529_p4)
}
 0x621   :  { %6193 = dma.vmem_to_hbm [thread:$0]  %s6191_s11, 32, %s9744_s12, [#allocation4]  }
 0x622   :  { %7541 = dma.done.wait [#allocation4], 32  }
 0x623   :  { %7542 = vsyncadd [#allocation4], 4294967264 }
 0x624   :  { %6197 = vsyncpa [#allocation4], 1 }

</bundles_post_ra>
